<compile_context>
chip_gen: v7x
topology: tpu7x:2x2x1
jax: 0.10.0
libtpu: 0.0.40
codegen_flags: <defaults>
</compile_context>

<pallas_src>
import functools
import math

import jax
import jax.numpy as jnp
from jax.experimental import pallas as pl
from jax.experimental.pallas import tpu as pltpu


def _round_up(x, m):
    return (x + m - 1) // m * m


# ----------------------------------------------------------------------------
# Pallas kernels: fused  out = act(X @ W + b)
# ----------------------------------------------------------------------------
def _mm_bias_act_kernel_single(x_ref, w_ref, b_ref, o_ref, *, act):
    # Single K tile: no accumulator scratch, direct store.
    acc = jnp.dot(x_ref[...], w_ref[...], preferred_element_type=jnp.float32)
    acc = acc + b_ref[...]                     # (1, N) bias broadcasts over rows
    if act == "relu":
        acc = jnp.maximum(acc, 0.0)
    elif act == "sigmoid":
        acc = jax.nn.sigmoid(acc)
    o_ref[...] = acc.astype(o_ref.dtype)


def _mm_bias_act_kernel_acc(x_ref, w_ref, b_ref, o_ref, acc_ref, *, act):
    # K-tiled reduction with f32 VMEM accumulator (only used for huge K).
    @pl.when(pl.program_id(1) == 0)
    def _():
        acc_ref[...] = jnp.zeros_like(acc_ref)

    acc_ref[...] += jnp.dot(x_ref[...], w_ref[...],
                            preferred_element_type=jnp.float32)

    @pl.when(pl.program_id(1) == pl.num_programs(1) - 1)
    def _():
        acc = acc_ref[...] + b_ref[...]
        if act == "relu":
            acc = jnp.maximum(acc, 0.0)
        elif act == "sigmoid":
            acc = jax.nn.sigmoid(acc)
        o_ref[...] = acc.astype(o_ref.dtype)


def mm_bias_act(x, w, b, act="none", out_dtype=jnp.bfloat16):
    """x:(M,K) w:(K,N) b:(N,) -> act(x@w+b):(M,N) in out_dtype.

    bf16 MXU inputs, f32 accumulation/epilogue, true-N output (no lane
    padding / post-slice), M-tiled with footprint-aware tile size.
    """
    M, K = x.shape
    K2, N = w.shape
    assert K == K2 and b.shape == (N,)

    out_bytes = jnp.dtype(out_dtype).itemsize
    xb = x.astype(jnp.bfloat16)
    wb = w.astype(jnp.bfloat16)
    b2 = b.astype(jnp.float32).reshape(1, N)

    Mpad = _round_up(M, 8)
    vmem_limit = 48 * 1024 * 1024         # safe for v7x's 64 MiB / TC

    # Single K tile whenever the resident bf16 weight and one x-row fit easily.
    single_k = (K * N * 2 <= (8 << 20)) and (K * 2 <= (1 << 20))

    if single_k:
        # Per-row bytes of one M-tile step: x (double-buffered) + out (dbuf).
        per_row = 2 * (K * 2) + 2 * (N * out_bytes)
        TM = max(8, min(2048, ((8 << 20) // per_row) // 8 * 8))
        TM = min(TM, Mpad)
        # Keep >= 2 M tiles on large layers so the "parallel" axis can be
        # sharded across both v7x TensorCores.
        if Mpad > 1024 and TM >= Mpad:
            TM = _round_up((Mpad + 1) // 2, 8)
        Mpad = _round_up(Mpad, TM)
        if Mpad != M:
            xb = jnp.pad(xb, ((0, Mpad - M), (0, 0)))
        num_m = Mpad // TM

        out = pl.pallas_call(
            functools.partial(_mm_bias_act_kernel_single, act=act),
            out_shape=jax.ShapeDtypeStruct((Mpad, N), out_dtype),
            grid=(num_m,),
            in_specs=[
                pl.BlockSpec((TM, K), lambda i: (i, 0)),   # K = full dim
                pl.BlockSpec((K, N), lambda i: (0, 0)),    # resident weight
                pl.BlockSpec((1, N), lambda i: (0, 0)),
            ],
            out_specs=pl.BlockSpec((TM, N), lambda i: (i, 0)),
            compiler_params=pltpu.CompilerParams(
                dimension_semantics=("parallel",),
                vmem_limit_bytes=vmem_limit,
            ),
        )(xb, wb, b2)
    else:
        # Large-K fallback (e.g. fc1 with input_dim=256): K-tiled accumulation.
        tk_cap = max(128, ((4 << 20) // (2 * max(N, 128))) // 128 * 128)
        TK = min(_round_up(K, 128), tk_cap, 2048)
        Kpad = _round_up(K, TK)
        per_row = 2 * (TK * 2) + N * 4 + 2 * (N * out_bytes)
        TM = max(8, min(1024, ((8 << 20) // per_row) // 8 * 8))
        TM = min(TM, Mpad)
        Mpad = _round_up(Mpad, TM)
        if (Mpad, Kpad) != (M, K):
            xb = jnp.pad(xb, ((0, Mpad - M), (0, Kpad - K)))
        if Kpad != K:
            wb = jnp.pad(wb, ((0, Kpad - K), (0, 0)))
        num_m = Mpad // TM
        num_k = Kpad // TK

        out = pl.pallas_call(
            functools.partial(_mm_bias_act_kernel_acc, act=act),
            out_shape=jax.ShapeDtypeStruct((Mpad, N), out_dtype),
            grid=(num_m, num_k),
            in_specs=[
                pl.BlockSpec((TM, TK), lambda i, k: (i, k)),
                pl.BlockSpec((TK, N), lambda i, k: (k, 0)),
                pl.BlockSpec((1, N), lambda i, k: (0, 0)),
            ],
            out_specs=pl.BlockSpec((TM, N), lambda i, k: (i, 0)),
            scratch_shapes=[pltpu.VMEM((TM, N), jnp.float32)],
            compiler_params=pltpu.CompilerParams(
                dimension_semantics=("parallel", "arbitrary"),
                vmem_limit_bytes=vmem_limit,
            ),
        )(xb, wb, b2)

    if Mpad != M:
        out = out[:M]
    return out


# ----------------------------------------------------------------------------
# Conv2d(k=3, stride=2, pad=1)  via 9-tap im2col  (NHWC)
# ----------------------------------------------------------------------------
def conv2d_s2(x_nhwc, w, b, act, out_dtype=jnp.bfloat16):
    """PyTorch Conv2d(k=3, s=2, p=1). w: (Cout, Cin, 3, 3)."""
    N, H, W, C = x_nhwc.shape
    cout = w.shape[0]
    xp = jnp.pad(x_nhwc, ((0, 0), (1, 1), (1, 1), (0, 0)))
    Hout = (H - 1) // 2 + 1
    Wout = (W - 1) // 2 + 1
    taps = []
    for ki in range(3):
        for kj in range(3):
            taps.append(xp[:, ki:ki + 2 * Hout:2, kj:kj + 2 * Wout:2, :])
    patches = jnp.concatenate(taps, axis=-1).reshape(N * Hout * Wout, 9 * C)
    # feature ordering: ((ki*3 + kj)*Cin + cin)
    wmat = jnp.transpose(w, (2, 3, 1, 0)).reshape(9 * C, cout)
    out = mm_bias_act(patches, wmat, b, act, out_dtype)
    return out.reshape(N, Hout, Wout, cout)


# ----------------------------------------------------------------------------
# ConvTranspose2d(k=3, stride=2, pad=1, output_padding=1)  via 4-phase
# (sub-pixel) decomposition: one (4*Cin -> 4*Cout) matmul + pixel shuffle.
# ----------------------------------------------------------------------------
def _deconv_weight_4phase(wt):
    """wt: (Cin, Cout, 3, 3) ConvTranspose weight -> (4*Cin, 4*Cout) matrix.

    Row index:    (ti*2 + tj)*Cin + ci      (input tap x[i+ti, j+tj, ci])
    Column index: (dh*2 + dw)*Cout + co     (output phase y[2i+dh, 2j+dw, co])
    Entry = wt[ci, co, 1+dh-2*ti, 1+dw-2*tj] when the kernel index is valid,
    else 0 (invalid taps do not contribute).
    """
    cin, cout = wt.shape[0], wt.shape[1]
    wm = jnp.zeros((2, 2, cin, 2, 2, cout), wt.dtype)
    for ti in (0, 1):
        for tj in (0, 1):
            for dh in (0, 1):
                for dw in (0, 1):
                    ki = 1 + dh - 2 * ti
                    kj = 1 + dw - 2 * tj
                    if 0 <= ki <= 2 and 0 <= kj <= 2:
                        wm = wm.at[ti, tj, :, dh, dw, :].set(wt[:, :, ki, kj])
    return wm.reshape(4 * cin, 4 * cout)


def conv_transpose2d_s2(x_nhwc, wt, b, act, out_dtype=jnp.bfloat16):
    """PyTorch ConvTranspose2d(k=3, s=2, p=1, op=1). wt: (Cin, Cout, 3, 3)."""
    N, H, W, C = x_nhwc.shape
    cout = wt.shape[1]
    xp = jnp.pad(x_nhwc, ((0, 0), (0, 1), (0, 1), (0, 0)))  # high-side pad
    taps = [xp[:, ti:ti + H, tj:tj + W, :] for ti in (0, 1) for tj in (0, 1)]
    patches = jnp.concatenate(taps, axis=-1).reshape(N * H * W, 4 * C)
    wm = _deconv_weight_4phase(wt)
    bm = jnp.tile(b, 4)                                  # phase-major bias
    out = mm_bias_act(patches, wm, bm, act, out_dtype)   # (N*H*W, 4*Cout)
    out = out.reshape(N, H, W, 2, 2, cout)               # (n, i, j, dh, dw, co)
    out = jnp.transpose(out, (0, 1, 3, 2, 4, 5)).reshape(N, 2 * H, 2 * W, cout)
    return out


# ----------------------------------------------------------------------------
# Deterministic parameter init (PyTorch-default-style uniform, synthetic)
# ----------------------------------------------------------------------------
def _uniform(key, shape, fan_in):
    bound = 1.0 / math.sqrt(fan_in)
    return jax.random.uniform(key, shape, jnp.float32, -bound, bound)


def init_params(key, input_dim):
    params = {}
    enc_ch = [(3, 16), (16, 32), (32, 64), (64, 128)]
    dec_ch = [(128, 64), (64, 32), (32, 16), (16, 3)]
    keys = jax.random.split(key, 2 * (len(enc_ch) + len(dec_ch)) + 4)
    ki = 0
    for i, (cin, cout) in enumerate(enc_ch):
        fan_in = cin * 9
        w = _uniform(keys[ki], (cout, cin, 3, 3), fan_in); ki += 1
        b = _uniform(keys[ki], (cout,), fan_in); ki += 1
        params[f"enc{i}"] = (w, b)
    flat = 128 * (input_dim // 16) * (input_dim // 16)
    params["fc1"] = (_uniform(keys[ki], (6, flat), flat),
                     _uniform(keys[ki + 1], (6,), flat)); ki += 2
    params["fc2"] = (_uniform(keys[ki], (flat, 6), 6),
                     _uniform(keys[ki + 1], (flat,), 6)); ki += 2
    for i, (cin, cout) in enumerate(dec_ch):
        fan_in = cout * 9  # PyTorch ConvTranspose2d fan_in = weight.shape[1]*k*k
        w = _uniform(keys[ki], (cin, cout, 3, 3), fan_in); ki += 1
        b = _uniform(keys[ki], (cout,), fan_in); ki += 1
        params[f"dec{i}"] = (w, b)
    return params


# ----------------------------------------------------------------------------
# Forward pass (matches Autoencoder.forward)
# ----------------------------------------------------------------------------
def autoencoder_forward(params, x_nchw):
    x = jnp.transpose(x_nchw, (0, 2, 3, 1)).astype(jnp.bfloat16)  # NCHW -> NHWC
    # encoder: 4x (conv s2 + relu)
    for i in range(4):
        w, b = params[f"enc{i}"]
        x = conv2d_s2(x, w, b, "relu")
    N, H, W, C = x.shape
    # flatten in PyTorch NCHW order
    enc_flat = jnp.transpose(x, (0, 3, 1, 2)).reshape(N, C * H * W)
    w1, b1 = params["fc1"]
    w2, b2 = params["fc2"]
    z = mm_bias_act(enc_flat, w1.T, b1, "none")          # fc1 -> (N, 6)
    dec = mm_bias_act(z, w2.T, b2, "none")               # fc2 -> (N, C*H*W)
    x = jnp.transpose(dec.reshape(N, C, H, W), (0, 2, 3, 1))   # back to NHWC
    # decoder: 3x (convT s2 + relu) + (convT s2 + sigmoid); keep bf16 stores
    # throughout (true-N=12 on the last layer), upcast once at the end.
    acts = ["relu", "relu", "relu", "sigmoid"]
    for i in range(4):
        w, b = params[f"dec{i}"]
        x = conv_transpose2d_s2(x, w, b, acts[i], out_dtype=jnp.bfloat16)
    return jnp.transpose(x, (0, 3, 1, 2)).astype(jnp.float32)   # NHWC -> NCHW


if __name__ == "__main__":
    INPUT_DIM = 32   # small but /16-divisible spatial size (module default is 256)
    BATCH = 2
    key = jax.random.PRNGKey(0)
    k_param, k_x = jax.random.split(key)
    params = init_params(k_param, INPUT_DIM)
    x = jax.random.uniform(k_x, (BATCH, 3, INPUT_DIM, INPUT_DIM), jnp.float32)

    fwd = jax.jit(autoencoder_forward)
    y = fwd(params, x)
    jax.block_until_ready(y)

    assert y.shape == (BATCH, 3, INPUT_DIM, INPUT_DIM), y.shape
    assert bool(jnp.all((y >= 0.0) & (y <= 1.0)))  # sigmoid output range
    print("KERNEL_OK")
</pallas_src>

<mosaic_0001>
module attributes {stable_mosaic.version = 11 : i64} {
  func.func @_mm_bias_act_kernel_single(%arg0: i32, %arg1: memref<512x27xbf16, #tpu.memory_space<vmem>>, %arg2: memref<27x16xbf16, #tpu.memory_space<vmem>>, %arg3: memref<1x16xf32, #tpu.memory_space<vmem>>, %arg4: memref<512x16xbf16, #tpu.memory_space<vmem>>) attributes {dimension_semantics = [#tpu.dimension_semantics<parallel>], iteration_bounds = array<i64: 1>, scalar_prefetch = 0 : i64, scratch_operands = 0 : i64, tpu.core_type = #tpu.core_type<tc>, window_params = [{transform_indices = @transform_0, window_bounds = array<i64: 512, 27>}, {pipeline_mode = #tpu.pipeline_mode<synchronous>, transform_indices = @transform_1, window_bounds = array<i64: 27, 16>}, {pipeline_mode = #tpu.pipeline_mode<synchronous>, transform_indices = @transform_2, window_bounds = array<i64: 1, 16>}, {transform_indices = @transform_3, window_bounds = array<i64: 512, 16>}]} {
    %c0 = arith.constant 0 : index
    %c0_0 = arith.constant 0 : index
    %0 = vector.load %arg1[%c0, %c0_0] : memref<512x27xbf16, #tpu.memory_space<vmem>>, vector<512x27xbf16>
    %c0_1 = arith.constant 0 : index
    %c0_2 = arith.constant 0 : index
    %1 = vector.load %arg2[%c0_1, %c0_2] : memref<27x16xbf16, #tpu.memory_space<vmem>>, vector<27x16xbf16>
    %cst = arith.constant dense<0.000000e+00> : vector<512x16xf32>
    %2 = tpu.matmul %0, %1, %cst {dimension_numbers = #tpu.dot_dimension_numbers<[1], [0], [0], [1], [0, 0, 1, 1], [], []>} : vector<512x27xbf16>, vector<27x16xbf16>, vector<512x16xf32> -> vector<512x16xf32>
    %c0_3 = arith.constant 0 : index
    %c0_4 = arith.constant 0 : index
    %3 = vector.load %arg3[%c0_3, %c0_4] : memref<1x16xf32, #tpu.memory_space<vmem>>, vector<1x16xf32>
    %4 = vector.broadcast %3 : vector<1x16xf32> to vector<512x16xf32>
    %5 = arith.addf %2, %4 : vector<512x16xf32>
    %cst_5 = arith.constant 0.000000e+00 : f32
    %6 = vector.broadcast %cst_5 : f32 to vector<512x16xf32>
    %7 = arith.maximumf %5, %6 : vector<512x16xf32>
    %8 = arith.truncf %7 : vector<512x16xf32> to vector<512x16xbf16>
    %c0_6 = arith.constant 0 : index
    %c0_7 = arith.constant 0 : index
    %9 = vector.load %arg4[%c0_6, %c0_7] : memref<512x16xbf16, #tpu.memory_space<vmem>>, vector<512x16xbf16>
    tpu.vector_store %arg4[%c0_6, %c0_7], %8 {strides = array<i32>} : memref<512x16xbf16, #tpu.memory_space<vmem>>, vector<512x16xbf16>,
    return
  }
  func.func @transform_0(%arg0: i32) -> (i32, i32) {
    %c0_i32 = arith.constant 0 : i32
    %c0_i32_0 = arith.constant 0 : i32
    return %arg0, %c0_i32 : i32, i32
  }
  func.func @transform_1(%arg0: i32) -> (i32, i32) {
    %c0_i32 = arith.constant 0 : i32
    %c0_i32_0 = arith.constant 0 : i32
    %c0_i32_1 = arith.constant 0 : i32
    return %c0_i32, %c0_i32_0 : i32, i32
  }
  func.func @transform_2(%arg0: i32) -> (i32, i32) {
    %c0_i32 = arith.constant 0 : i32
    %c0_i32_0 = arith.constant 0 : i32
    %c0_i32_1 = arith.constant 0 : i32
    return %c0_i32, %c0_i32_0 : i32, i32
  }
  func.func @transform_3(%arg0: i32) -> (i32, i32) {
    %c0_i32 = arith.constant 0 : i32
    %c0_i32_0 = arith.constant 0 : i32
    return %arg0, %c0_i32 : i32, i32
  }
}

module attributes {stable_mosaic.version = 11 : i64} {
  func.func @_mm_bias_act_kernel_single(%arg0: i32, %arg1: memref<128x144xbf16, #tpu.memory_space<vmem>>, %arg2: memref<144x32xbf16, #tpu.memory_space<vmem>>, %arg3: memref<1x32xf32, #tpu.memory_space<vmem>>, %arg4: memref<128x32xbf16, #tpu.memory_space<vmem>>) attributes {dimension_semantics = [#tpu.dimension_semantics<parallel>], iteration_bounds = array<i64: 1>, scalar_prefetch = 0 : i64, scratch_operands = 0 : i64, tpu.core_type = #tpu.core_type<tc>, window_params = [{transform_indices = @transform_0, window_bounds = array<i64: 128, 144>}, {pipeline_mode = #tpu.pipeline_mode<synchronous>, transform_indices = @transform_1, window_bounds = array<i64: 144, 32>}, {pipeline_mode = #tpu.pipeline_mode<synchronous>, transform_indices = @transform_2, window_bounds = array<i64: 1, 32>}, {transform_indices = @transform_3, window_bounds = array<i64: 128, 32>}]} {
    %c0 = arith.constant 0 : index
    %c0_0 = arith.constant 0 : index
    %0 = vector.load %arg1[%c0, %c0_0] : memref<128x144xbf16, #tpu.memory_space<vmem>>, vector<128x144xbf16>
    %c0_1 = arith.constant 0 : index
    %c0_2 = arith.constant 0 : index
    %1 = vector.load %arg2[%c0_1, %c0_2] : memref<144x32xbf16, #tpu.memory_space<vmem>>, vector<144x32xbf16>
    %cst = arith.constant dense<0.000000e+00> : vector<128x32xf32>
    %2 = tpu.matmul %0, %1, %cst {dimension_numbers = #tpu.dot_dimension_numbers<[1], [0], [0], [1], [0, 0, 1, 1], [], []>} : vector<128x144xbf16>, vector<144x32xbf16>, vector<128x32xf32> -> vector<128x32xf32>
    %c0_3 = arith.constant 0 : index
    %c0_4 = arith.constant 0 : index
    %3 = vector.load %arg3[%c0_3, %c0_4] : memref<1x32xf32, #tpu.memory_space<vmem>>, vector<1x32xf32>
    %4 = vector.broadcast %3 : vector<1x32xf32> to vector<128x32xf32>
    %5 = arith.addf %2, %4 : vector<128x32xf32>
    %cst_5 = arith.constant 0.000000e+00 : f32
    %6 = vector.broadcast %cst_5 : f32 to vector<128x32xf32>
    %7 = arith.maximumf %5, %6 : vector<128x32xf32>
    %8 = arith.truncf %7 : vector<128x32xf32> to vector<128x32xbf16>
    %c0_6 = arith.constant 0 : index
    %c0_7 = arith.constant 0 : index
    %9 = vector.load %arg4[%c0_6, %c0_7] : memref<128x32xbf16, #tpu.memory_space<vmem>>, vector<128x32xbf16>
    tpu.vector_store %arg4[%c0_6, %c0_7], %8 {strides = array<i32>} : memref<128x32xbf16, #tpu.memory_space<vmem>>, vector<128x32xbf16>,
    return
  }
  func.func @transform_0(%arg0: i32) -> (i32, i32) {
    %c0_i32 = arith.constant 0 : i32
    %c0_i32_0 = arith.constant 0 : i32
    return %arg0, %c0_i32 : i32, i32
  }
  func.func @transform_1(%arg0: i32) -> (i32, i32) {
    %c0_i32 = arith.constant 0 : i32
    %c0_i32_0 = arith.constant 0 : i32
    %c0_i32_1 = arith.constant 0 : i32
    return %c0_i32, %c0_i32_0 : i32, i32
  }
  func.func @transform_2(%arg0: i32) -> (i32, i32) {
    %c0_i32 = arith.constant 0 : i32
    %c0_i32_0 = arith.constant 0 : i32
    %c0_i32_1 = arith.constant 0 : i32
    return %c0_i32, %c0_i32_0 : i32, i32
  }
  func.func @transform_3(%arg0: i32) -> (i32, i32) {
    %c0_i32 = arith.constant 0 : i32
    %c0_i32_0 = arith.constant 0 : i32
    return %arg0, %c0_i32 : i32, i32
  }
}

module attributes {stable_mosaic.version = 11 : i64} {
  func.func @_mm_bias_act_kernel_single(%arg0: i32, %arg1: memref<32x288xbf16, #tpu.memory_space<vmem>>, %arg2: memref<288x64xbf16, #tpu.memory_space<vmem>>, %arg3: memref<1x64xf32, #tpu.memory_space<vmem>>, %arg4: memref<32x64xbf16, #tpu.memory_space<vmem>>) attributes {dimension_semantics = [#tpu.dimension_semantics<parallel>], iteration_bounds = array<i64: 1>, scalar_prefetch = 0 : i64, scratch_operands = 0 : i64, tpu.core_type = #tpu.core_type<tc>, window_params = [{transform_indices = @transform_0, window_bounds = array<i64: 32, 288>}, {pipeline_mode = #tpu.pipeline_mode<synchronous>, transform_indices = @transform_1, window_bounds = array<i64: 288, 64>}, {pipeline_mode = #tpu.pipeline_mode<synchronous>, transform_indices = @transform_2, window_bounds = array<i64: 1, 64>}, {transform_indices = @transform_3, window_bounds = array<i64: 32, 64>}]} {
    %c0 = arith.constant 0 : index
    %c0_0 = arith.constant 0 : index
    %0 = vector.load %arg1[%c0, %c0_0] : memref<32x288xbf16, #tpu.memory_space<vmem>>, vector<32x288xbf16>
    %c0_1 = arith.constant 0 : index
    %c0_2 = arith.constant 0 : index
    %1 = vector.load %arg2[%c0_1, %c0_2] : memref<288x64xbf16, #tpu.memory_space<vmem>>, vector<288x64xbf16>
    %cst = arith.constant dense<0.000000e+00> : vector<32x64xf32>
    %2 = tpu.matmul %0, %1, %cst {dimension_numbers = #tpu.dot_dimension_numbers<[1], [0], [0], [1], [0, 0, 1, 1], [], []>} : vector<32x288xbf16>, vector<288x64xbf16>, vector<32x64xf32> -> vector<32x64xf32>
    %c0_3 = arith.constant 0 : index
    %c0_4 = arith.constant 0 : index
    %3 = vector.load %arg3[%c0_3, %c0_4] : memref<1x64xf32, #tpu.memory_space<vmem>>, vector<1x64xf32>
    %4 = vector.broadcast %3 : vector<1x64xf32> to vector<32x64xf32>
    %5 = arith.addf %2, %4 : vector<32x64xf32>
    %cst_5 = arith.constant 0.000000e+00 : f32
    %6 = vector.broadcast %cst_5 : f32 to vector<32x64xf32>
    %7 = arith.maximumf %5, %6 : vector<32x64xf32>
    %8 = arith.truncf %7 : vector<32x64xf32> to vector<32x64xbf16>
    %c0_6 = arith.constant 0 : index
    %c0_7 = arith.constant 0 : index
    %9 = vector.load %arg4[%c0_6, %c0_7] : memref<32x64xbf16, #tpu.memory_space<vmem>>, vector<32x64xbf16>
    tpu.vector_store %arg4[%c0_6, %c0_7], %8 {strides = array<i32>} : memref<32x64xbf16, #tpu.memory_space<vmem>>, vector<32x64xbf16>,
    return
  }
  func.func @transform_0(%arg0: i32) -> (i32, i32) {
    %c0_i32 = arith.constant 0 : i32
    %c0_i32_0 = arith.constant 0 : i32
    return %arg0, %c0_i32 : i32, i32
  }
  func.func @transform_1(%arg0: i32) -> (i32, i32) {
    %c0_i32 = arith.constant 0 : i32
    %c0_i32_0 = arith.constant 0 : i32
    %c0_i32_1 = arith.constant 0 : i32
    return %c0_i32, %c0_i32_0 : i32, i32
  }
  func.func @transform_2(%arg0: i32) -> (i32, i32) {
    %c0_i32 = arith.constant 0 : i32
    %c0_i32_0 = arith.constant 0 : i32
    %c0_i32_1 = arith.constant 0 : i32
    return %c0_i32, %c0_i32_0 : i32, i32
  }
  func.func @transform_3(%arg0: i32) -> (i32, i32) {
    %c0_i32 = arith.constant 0 : i32
    %c0_i32_0 = arith.constant 0 : i32
    return %arg0, %c0_i32 : i32, i32
  }
}

module attributes {stable_mosaic.version = 11 : i64} {
  func.func @_mm_bias_act_kernel_single(%arg0: i32, %arg1: memref<8x576xbf16, #tpu.memory_space<vmem>>, %arg2: memref<576x128xbf16, #tpu.memory_space<vmem>>, %arg3: memref<1x128xf32, #tpu.memory_space<vmem>>, %arg4: memref<8x128xbf16, #tpu.memory_space<vmem>>) attributes {dimension_semantics = [#tpu.dimension_semantics<parallel>], iteration_bounds = array<i64: 1>, scalar_prefetch = 0 : i64, scratch_operands = 0 : i64, tpu.core_type = #tpu.core_type<tc>, window_params = [{transform_indices = @transform_0, window_bounds = array<i64: 8, 576>}, {pipeline_mode = #tpu.pipeline_mode<synchronous>, transform_indices = @transform_1, window_bounds = array<i64: 576, 128>}, {pipeline_mode = #tpu.pipeline_mode<synchronous>, transform_indices = @transform_2, window_bounds = array<i64: 1, 128>}, {transform_indices = @transform_3, window_bounds = array<i64: 8, 128>}]} {
    %c0 = arith.constant 0 : index
    %c0_0 = arith.constant 0 : index
    %0 = vector.load %arg1[%c0, %c0_0] : memref<8x576xbf16, #tpu.memory_space<vmem>>, vector<8x576xbf16>
    %c0_1 = arith.constant 0 : index
    %c0_2 = arith.constant 0 : index
    %1 = vector.load %arg2[%c0_1, %c0_2] : memref<576x128xbf16, #tpu.memory_space<vmem>>, vector<576x128xbf16>
    %cst = arith.constant dense<0.000000e+00> : vector<8x128xf32>
    %2 = tpu.matmul %0, %1, %cst {dimension_numbers = #tpu.dot_dimension_numbers<[1], [0], [0], [1], [0, 0, 1, 1], [], []>} : vector<8x576xbf16>, vector<576x128xbf16>, vector<8x128xf32> -> vector<8x128xf32>
    %c0_3 = arith.constant 0 : index
    %c0_4 = arith.constant 0 : index
    %3 = vector.load %arg3[%c0_3, %c0_4] : memref<1x128xf32, #tpu.memory_space<vmem>>, vector<1x128xf32>
    %4 = vector.broadcast %3 : vector<1x128xf32> to vector<8x128xf32>
    %5 = arith.addf %2, %4 : vector<8x128xf32>
    %cst_5 = arith.constant 0.000000e+00 : f32
    %6 = vector.broadcast %cst_5 : f32 to vector<8x128xf32>
    %7 = arith.maximumf %5, %6 : vector<8x128xf32>
    %8 = arith.truncf %7 : vector<8x128xf32> to vector<8x128xbf16>
    %c0_6 = arith.constant 0 : index
    %c0_7 = arith.constant 0 : index
    %9 = vector.load %arg4[%c0_6, %c0_7] : memref<8x128xbf16, #tpu.memory_space<vmem>>, vector<8x128xbf16>
    tpu.vector_store %arg4[%c0_6, %c0_7], %8 {strides = array<i32>} : memref<8x128xbf16, #tpu.memory_space<vmem>>, vector<8x128xbf16>,
    return
  }
  func.func @transform_0(%arg0: i32) -> (i32, i32) {
    %c0_i32 = arith.constant 0 : i32
    %c0_i32_0 = arith.constant 0 : i32
    return %arg0, %c0_i32 : i32, i32
  }
  func.func @transform_1(%arg0: i32) -> (i32, i32) {
    %c0_i32 = arith.constant 0 : i32
    %c0_i32_0 = arith.constant 0 : i32
    %c0_i32_1 = arith.constant 0 : i32
    return %c0_i32, %c0_i32_0 : i32, i32
  }
  func.func @transform_2(%arg0: i32) -> (i32, i32) {
    %c0_i32 = arith.constant 0 : i32
    %c0_i32_0 = arith.constant 0 : i32
    %c0_i32_1 = arith.constant 0 : i32
    return %c0_i32, %c0_i32_0 : i32, i32
  }
  func.func @transform_3(%arg0: i32) -> (i32, i32) {
    %c0_i32 = arith.constant 0 : i32
    %c0_i32_0 = arith.constant 0 : i32
    return %arg0, %c0_i32 : i32, i32
  }
}

module attributes {stable_mosaic.version = 11 : i64} {
  func.func @_mm_bias_act_kernel_single(%arg0: i32, %arg1: memref<8x512xbf16, #tpu.memory_space<vmem>>, %arg2: memref<512x6xbf16, #tpu.memory_space<vmem>>, %arg3: memref<1x6xf32, #tpu.memory_space<vmem>>, %arg4: memref<8x6xbf16, #tpu.memory_space<vmem>>) attributes {dimension_semantics = [#tpu.dimension_semantics<parallel>], iteration_bounds = array<i64: 1>, scalar_prefetch = 0 : i64, scratch_operands = 0 : i64, tpu.core_type = #tpu.core_type<tc>, window_params = [{transform_indices = @transform_0, window_bounds = array<i64: 8, 512>}, {pipeline_mode = #tpu.pipeline_mode<synchronous>, transform_indices = @transform_1, window_bounds = array<i64: 512, 6>}, {pipeline_mode = #tpu.pipeline_mode<synchronous>, transform_indices = @transform_2, window_bounds = array<i64: 1, 6>}, {transform_indices = @transform_3, window_bounds = array<i64: 8, 6>}]} {
    %c0 = arith.constant 0 : index
    %c0_0 = arith.constant 0 : index
    %0 = vector.load %arg1[%c0, %c0_0] : memref<8x512xbf16, #tpu.memory_space<vmem>>, vector<8x512xbf16>
    %c0_1 = arith.constant 0 : index
    %c0_2 = arith.constant 0 : index
    %1 = vector.load %arg2[%c0_1, %c0_2] : memref<512x6xbf16, #tpu.memory_space<vmem>>, vector<512x6xbf16>
    %cst = arith.constant dense<0.000000e+00> : vector<8x6xf32>
    %2 = tpu.matmul %0, %1, %cst {dimension_numbers = #tpu.dot_dimension_numbers<[1], [0], [0], [1], [0, 0, 1, 1], [], []>} : vector<8x512xbf16>, vector<512x6xbf16>, vector<8x6xf32> -> vector<8x6xf32>
    %c0_3 = arith.constant 0 : index
    %c0_4 = arith.constant 0 : index
    %3 = vector.load %arg3[%c0_3, %c0_4] : memref<1x6xf32, #tpu.memory_space<vmem>>, vector<1x6xf32>
    %4 = vector.broadcast %3 : vector<1x6xf32> to vector<8x6xf32>
    %5 = arith.addf %2, %4 : vector<8x6xf32>
    %6 = arith.truncf %5 : vector<8x6xf32> to vector<8x6xbf16>
    %c0_5 = arith.constant 0 : index
    %c0_6 = arith.constant 0 : index
    %7 = vector.load %arg4[%c0_5, %c0_6] : memref<8x6xbf16, #tpu.memory_space<vmem>>, vector<8x6xbf16>
    tpu.vector_store %arg4[%c0_5, %c0_6], %6 {strides = array<i32>} : memref<8x6xbf16, #tpu.memory_space<vmem>>, vector<8x6xbf16>,
    return
  }
  func.func @transform_0(%arg0: i32) -> (i32, i32) {
    %c0_i32 = arith.constant 0 : i32
    %c0_i32_0 = arith.constant 0 : i32
    return %arg0, %c0_i32 : i32, i32
  }
  func.func @transform_1(%arg0: i32) -> (i32, i32) {
    %c0_i32 = arith.constant 0 : i32
    %c0_i32_0 = arith.constant 0 : i32
    %c0_i32_1 = arith.constant 0 : i32
    return %c0_i32, %c0_i32_0 : i32, i32
  }
  func.func @transform_2(%arg0: i32) -> (i32, i32) {
    %c0_i32 = arith.constant 0 : i32
    %c0_i32_0 = arith.constant 0 : i32
    %c0_i32_1 = arith.constant 0 : i32
    return %c0_i32, %c0_i32_0 : i32, i32
  }
  func.func @transform_3(%arg0: i32) -> (i32, i32) {
    %c0_i32 = arith.constant 0 : i32
    %c0_i32_0 = arith.constant 0 : i32
    return %arg0, %c0_i32 : i32, i32
  }
}

module attributes {stable_mosaic.version = 11 : i64} {
  func.func @_mm_bias_act_kernel_single(%arg0: i32, %arg1: memref<8x6xbf16, #tpu.memory_space<vmem>>, %arg2: memref<6x512xbf16, #tpu.memory_space<vmem>>, %arg3: memref<1x512xf32, #tpu.memory_space<vmem>>, %arg4: memref<8x512xbf16, #tpu.memory_space<vmem>>) attributes {dimension_semantics = [#tpu.dimension_semantics<parallel>], iteration_bounds = array<i64: 1>, scalar_prefetch = 0 : i64, scratch_operands = 0 : i64, tpu.core_type = #tpu.core_type<tc>, window_params = [{transform_indices = @transform_0, window_bounds = array<i64: 8, 6>}, {pipeline_mode = #tpu.pipeline_mode<synchronous>, transform_indices = @transform_1, window_bounds = array<i64: 6, 512>}, {pipeline_mode = #tpu.pipeline_mode<synchronous>, transform_indices = @transform_2, window_bounds = array<i64: 1, 512>}, {transform_indices = @transform_3, window_bounds = array<i64: 8, 512>}]} {
    %c0 = arith.constant 0 : index
    %c0_0 = arith.constant 0 : index
    %0 = vector.load %arg1[%c0, %c0_0] : memref<8x6xbf16, #tpu.memory_space<vmem>>, vector<8x6xbf16>
    %c0_1 = arith.constant 0 : index
    %c0_2 = arith.constant 0 : index
    %1 = vector.load %arg2[%c0_1, %c0_2] : memref<6x512xbf16, #tpu.memory_space<vmem>>, vector<6x512xbf16>
    %cst = arith.constant dense<0.000000e+00> : vector<8x512xf32>
    %2 = tpu.matmul %0, %1, %cst {dimension_numbers = #tpu.dot_dimension_numbers<[1], [0], [0], [1], [0, 0, 1, 1], [], []>} : vector<8x6xbf16>, vector<6x512xbf16>, vector<8x512xf32> -> vector<8x512xf32>
    %c0_3 = arith.constant 0 : index
    %c0_4 = arith.constant 0 : index
    %3 = vector.load %arg3[%c0_3, %c0_4] : memref<1x512xf32, #tpu.memory_space<vmem>>, vector<1x512xf32>
    %4 = vector.broadcast %3 : vector<1x512xf32> to vector<8x512xf32>
    %5 = arith.addf %2, %4 : vector<8x512xf32>
    %6 = arith.truncf %5 : vector<8x512xf32> to vector<8x512xbf16>
    %c0_5 = arith.constant 0 : index
    %c0_6 = arith.constant 0 : index
    %7 = vector.load %arg4[%c0_5, %c0_6] : memref<8x512xbf16, #tpu.memory_space<vmem>>, vector<8x512xbf16>
    tpu.vector_store %arg4[%c0_5, %c0_6], %6 {strides = array<i32>} : memref<8x512xbf16, #tpu.memory_space<vmem>>, vector<8x512xbf16>,
    return
  }
  func.func @transform_0(%arg0: i32) -> (i32, i32) {
    %c0_i32 = arith.constant 0 : i32
    %c0_i32_0 = arith.constant 0 : i32
    return %arg0, %c0_i32 : i32, i32
  }
  func.func @transform_1(%arg0: i32) -> (i32, i32) {
    %c0_i32 = arith.constant 0 : i32
    %c0_i32_0 = arith.constant 0 : i32
    %c0_i32_1 = arith.constant 0 : i32
    return %c0_i32, %c0_i32_0 : i32, i32
  }
  func.func @transform_2(%arg0: i32) -> (i32, i32) {
    %c0_i32 = arith.constant 0 : i32
    %c0_i32_0 = arith.constant 0 : i32
    %c0_i32_1 = arith.constant 0 : i32
    return %c0_i32, %c0_i32_0 : i32, i32
  }
  func.func @transform_3(%arg0: i32) -> (i32, i32) {
    %c0_i32 = arith.constant 0 : i32
    %c0_i32_0 = arith.constant 0 : i32
    return %arg0, %c0_i32 : i32, i32
  }
}

module attributes {stable_mosaic.version = 11 : i64} {
  func.func @_mm_bias_act_kernel_single(%arg0: i32, %arg1: memref<8x512xbf16, #tpu.memory_space<vmem>>, %arg2: memref<512x256xbf16, #tpu.memory_space<vmem>>, %arg3: memref<1x256xf32, #tpu.memory_space<vmem>>, %arg4: memref<8x256xbf16, #tpu.memory_space<vmem>>) attributes {dimension_semantics = [#tpu.dimension_semantics<parallel>], iteration_bounds = array<i64: 1>, scalar_prefetch = 0 : i64, scratch_operands = 0 : i64, tpu.core_type = #tpu.core_type<tc>, window_params = [{transform_indices = @transform_0, window_bounds = array<i64: 8, 512>}, {pipeline_mode = #tpu.pipeline_mode<synchronous>, transform_indices = @transform_1, window_bounds = array<i64: 512, 256>}, {pipeline_mode = #tpu.pipeline_mode<synchronous>, transform_indices = @transform_2, window_bounds = array<i64: 1, 256>}, {transform_indices = @transform_3, window_bounds = array<i64: 8, 256>}]} {
    %c0 = arith.constant 0 : index
    %c0_0 = arith.constant 0 : index
    %0 = vector.load %arg1[%c0, %c0_0] : memref<8x512xbf16, #tpu.memory_space<vmem>>, vector<8x512xbf16>
    %c0_1 = arith.constant 0 : index
    %c0_2 = arith.constant 0 : index
    %1 = vector.load %arg2[%c0_1, %c0_2] : memref<512x256xbf16, #tpu.memory_space<vmem>>, vector<512x256xbf16>
    %cst = arith.constant dense<0.000000e+00> : vector<8x256xf32>
    %2 = tpu.matmul %0, %1, %cst {dimension_numbers = #tpu.dot_dimension_numbers<[1], [0], [0], [1], [0, 0, 1, 1], [], []>} : vector<8x512xbf16>, vector<512x256xbf16>, vector<8x256xf32> -> vector<8x256xf32>
    %c0_3 = arith.constant 0 : index
    %c0_4 = arith.constant 0 : index
    %3 = vector.load %arg3[%c0_3, %c0_4] : memref<1x256xf32, #tpu.memory_space<vmem>>, vector<1x256xf32>
    %4 = vector.broadcast %3 : vector<1x256xf32> to vector<8x256xf32>
    %5 = arith.addf %2, %4 : vector<8x256xf32>
    %cst_5 = arith.constant 0.000000e+00 : f32
    %6 = vector.broadcast %cst_5 : f32 to vector<8x256xf32>
    %7 = arith.maximumf %5, %6 : vector<8x256xf32>
    %8 = arith.truncf %7 : vector<8x256xf32> to vector<8x256xbf16>
    %c0_6 = arith.constant 0 : index
    %c0_7 = arith.constant 0 : index
    %9 = vector.load %arg4[%c0_6, %c0_7] : memref<8x256xbf16, #tpu.memory_space<vmem>>, vector<8x256xbf16>
    tpu.vector_store %arg4[%c0_6, %c0_7], %8 {strides = array<i32>} : memref<8x256xbf16, #tpu.memory_space<vmem>>, vector<8x256xbf16>,
    return
  }
  func.func @transform_0(%arg0: i32) -> (i32, i32) {
    %c0_i32 = arith.constant 0 : i32
    %c0_i32_0 = arith.constant 0 : i32
    return %arg0, %c0_i32 : i32, i32
  }
  func.func @transform_1(%arg0: i32) -> (i32, i32) {
    %c0_i32 = arith.constant 0 : i32
    %c0_i32_0 = arith.constant 0 : i32
    %c0_i32_1 = arith.constant 0 : i32
    return %c0_i32, %c0_i32_0 : i32, i32
  }
  func.func @transform_2(%arg0: i32) -> (i32, i32) {
    %c0_i32 = arith.constant 0 : i32
    %c0_i32_0 = arith.constant 0 : i32
    %c0_i32_1 = arith.constant 0 : i32
    return %c0_i32, %c0_i32_0 : i32, i32
  }
  func.func @transform_3(%arg0: i32) -> (i32, i32) {
    %c0_i32 = arith.constant 0 : i32
    %c0_i32_0 = arith.constant 0 : i32
    return %arg0, %c0_i32 : i32, i32
  }
}

module attributes {stable_mosaic.version = 11 : i64} {
  func.func @_mm_bias_act_kernel_single(%arg0: i32, %arg1: memref<32x256xbf16, #tpu.memory_space<vmem>>, %arg2: memref<256x128xbf16, #tpu.memory_space<vmem>>, %arg3: memref<1x128xf32, #tpu.memory_space<vmem>>, %arg4: memref<32x128xbf16, #tpu.memory_space<vmem>>) attributes {dimension_semantics = [#tpu.dimension_semantics<parallel>], iteration_bounds = array<i64: 1>, scalar_prefetch = 0 : i64, scratch_operands = 0 : i64, tpu.core_type = #tpu.core_type<tc>, window_params = [{transform_indices = @transform_0, window_bounds = array<i64: 32, 256>}, {pipeline_mode = #tpu.pipeline_mode<synchronous>, transform_indices = @transform_1, window_bounds = array<i64: 256, 128>}, {pipeline_mode = #tpu.pipeline_mode<synchronous>, transform_indices = @transform_2, window_bounds = array<i64: 1, 128>}, {transform_indices = @transform_3, window_bounds = array<i64: 32, 128>}]} {
    %c0 = arith.constant 0 : index
    %c0_0 = arith.constant 0 : index
    %0 = vector.load %arg1[%c0, %c0_0] : memref<32x256xbf16, #tpu.memory_space<vmem>>, vector<32x256xbf16>
    %c0_1 = arith.constant 0 : index
    %c0_2 = arith.constant 0 : index
    %1 = vector.load %arg2[%c0_1, %c0_2] : memref<256x128xbf16, #tpu.memory_space<vmem>>, vector<256x128xbf16>
    %cst = arith.constant dense<0.000000e+00> : vector<32x128xf32>
    %2 = tpu.matmul %0, %1, %cst {dimension_numbers = #tpu.dot_dimension_numbers<[1], [0], [0], [1], [0, 0, 1, 1], [], []>} : vector<32x256xbf16>, vector<256x128xbf16>, vector<32x128xf32> -> vector<32x128xf32>
    %c0_3 = arith.constant 0 : index
    %c0_4 = arith.constant 0 : index
    %3 = vector.load %arg3[%c0_3, %c0_4] : memref<1x128xf32, #tpu.memory_space<vmem>>, vector<1x128xf32>
    %4 = vector.broadcast %3 : vector<1x128xf32> to vector<32x128xf32>
    %5 = arith.addf %2, %4 : vector<32x128xf32>
    %cst_5 = arith.constant 0.000000e+00 : f32
    %6 = vector.broadcast %cst_5 : f32 to vector<32x128xf32>
    %7 = arith.maximumf %5, %6 : vector<32x128xf32>
    %8 = arith.truncf %7 : vector<32x128xf32> to vector<32x128xbf16>
    %c0_6 = arith.constant 0 : index
    %c0_7 = arith.constant 0 : index
    %9 = vector.load %arg4[%c0_6, %c0_7] : memref<32x128xbf16, #tpu.memory_space<vmem>>, vector<32x128xbf16>
    tpu.vector_store %arg4[%c0_6, %c0_7], %8 {strides = array<i32>} : memref<32x128xbf16, #tpu.memory_space<vmem>>, vector<32x128xbf16>,
    return
  }
  func.func @transform_0(%arg0: i32) -> (i32, i32) {
    %c0_i32 = arith.constant 0 : i32
    %c0_i32_0 = arith.constant 0 : i32
    return %arg0, %c0_i32 : i32, i32
  }
  func.func @transform_1(%arg0: i32) -> (i32, i32) {
    %c0_i32 = arith.constant 0 : i32
    %c0_i32_0 = arith.constant 0 : i32
    %c0_i32_1 = arith.constant 0 : i32
    return %c0_i32, %c0_i32_0 : i32, i32
  }
  func.func @transform_2(%arg0: i32) -> (i32, i32) {
    %c0_i32 = arith.constant 0 : i32
    %c0_i32_0 = arith.constant 0 : i32
    %c0_i32_1 = arith.constant 0 : i32
    return %c0_i32, %c0_i32_0 : i32, i32
  }
  func.func @transform_3(%arg0: i32) -> (i32, i32) {
    %c0_i32 = arith.constant 0 : i32
    %c0_i32_0 = arith.constant 0 : i32
    return %arg0, %c0_i32 : i32, i32
  }
}

module attributes {stable_mosaic.version = 11 : i64} {
  func.func @_mm_bias_act_kernel_single(%arg0: i32, %arg1: memref<128x128xbf16, #tpu.memory_space<vmem>>, %arg2: memref<128x64xbf16, #tpu.memory_space<vmem>>, %arg3: memref<1x64xf32, #tpu.memory_space<vmem>>, %arg4: memref<128x64xbf16, #tpu.memory_space<vmem>>) attributes {dimension_semantics = [#tpu.dimension_semantics<parallel>], iteration_bounds = array<i64: 1>, scalar_prefetch = 0 : i64, scratch_operands = 0 : i64, tpu.core_type = #tpu.core_type<tc>, window_params = [{transform_indices = @transform_0, window_bounds = array<i64: 128, 128>}, {pipeline_mode = #tpu.pipeline_mode<synchronous>, transform_indices = @transform_1, window_bounds = array<i64: 128, 64>}, {pipeline_mode = #tpu.pipeline_mode<synchronous>, transform_indices = @transform_2, window_bounds = array<i64: 1, 64>}, {transform_indices = @transform_3, window_bounds = array<i64: 128, 64>}]} {
    %c0 = arith.constant 0 : index
    %c0_0 = arith.constant 0 : index
    %0 = vector.load %arg1[%c0, %c0_0] : memref<128x128xbf16, #tpu.memory_space<vmem>>, vector<128x128xbf16>
    %c0_1 = arith.constant 0 : index
    %c0_2 = arith.constant 0 : index
    %1 = vector.load %arg2[%c0_1, %c0_2] : memref<128x64xbf16, #tpu.memory_space<vmem>>, vector<128x64xbf16>
    %cst = arith.constant dense<0.000000e+00> : vector<128x64xf32>
    %2 = tpu.matmul %0, %1, %cst {dimension_numbers = #tpu.dot_dimension_numbers<[1], [0], [0], [1], [0, 0, 1, 1], [], []>} : vector<128x128xbf16>, vector<128x64xbf16>, vector<128x64xf32> -> vector<128x64xf32>
    %c0_3 = arith.constant 0 : index
    %c0_4 = arith.constant 0 : index
    %3 = vector.load %arg3[%c0_3, %c0_4] : memref<1x64xf32, #tpu.memory_space<vmem>>, vector<1x64xf32>
    %4 = vector.broadcast %3 : vector<1x64xf32> to vector<128x64xf32>
    %5 = arith.addf %2, %4 : vector<128x64xf32>
    %cst_5 = arith.constant 0.000000e+00 : f32
    %6 = vector.broadcast %cst_5 : f32 to vector<128x64xf32>
    %7 = arith.maximumf %5, %6 : vector<128x64xf32>
    %8 = arith.truncf %7 : vector<128x64xf32> to vector<128x64xbf16>
    %c0_6 = arith.constant 0 : index
    %c0_7 = arith.constant 0 : index
    %9 = vector.load %arg4[%c0_6, %c0_7] : memref<128x64xbf16, #tpu.memory_space<vmem>>, vector<128x64xbf16>
    tpu.vector_store %arg4[%c0_6, %c0_7], %8 {strides = array<i32>} : memref<128x64xbf16, #tpu.memory_space<vmem>>, vector<128x64xbf16>,
    return
  }
  func.func @transform_0(%arg0: i32) -> (i32, i32) {
    %c0_i32 = arith.constant 0 : i32
    %c0_i32_0 = arith.constant 0 : i32
    return %arg0, %c0_i32 : i32, i32
  }
  func.func @transform_1(%arg0: i32) -> (i32, i32) {
    %c0_i32 = arith.constant 0 : i32
    %c0_i32_0 = arith.constant 0 : i32
    %c0_i32_1 = arith.constant 0 : i32
    return %c0_i32, %c0_i32_0 : i32, i32
  }
  func.func @transform_2(%arg0: i32) -> (i32, i32) {
    %c0_i32 = arith.constant 0 : i32
    %c0_i32_0 = arith.constant 0 : i32
    %c0_i32_1 = arith.constant 0 : i32
    return %c0_i32, %c0_i32_0 : i32, i32
  }
  func.func @transform_3(%arg0: i32) -> (i32, i32) {
    %c0_i32 = arith.constant 0 : i32
    %c0_i32_0 = arith.constant 0 : i32
    return %arg0, %c0_i32 : i32, i32
  }
}

module attributes {stable_mosaic.version = 11 : i64} {
  func.func @_mm_bias_act_kernel_single(%arg0: i32, %arg1: memref<512x64xbf16, #tpu.memory_space<vmem>>, %arg2: memref<64x12xbf16, #tpu.memory_space<vmem>>, %arg3: memref<1x12xf32, #tpu.memory_space<vmem>>, %arg4: memref<512x12xbf16, #tpu.memory_space<vmem>>) attributes {dimension_semantics = [#tpu.dimension_semantics<parallel>], iteration_bounds = array<i64: 1>, scalar_prefetch = 0 : i64, scratch_operands = 0 : i64, tpu.core_type = #tpu.core_type<tc>, window_params = [{transform_indices = @transform_0, window_bounds = array<i64: 512, 64>}, {pipeline_mode = #tpu.pipeline_mode<synchronous>, transform_indices = @transform_1, window_bounds = array<i64: 64, 12>}, {pipeline_mode = #tpu.pipeline_mode<synchronous>, transform_indices = @transform_2, window_bounds = array<i64: 1, 12>}, {transform_indices = @transform_3, window_bounds = array<i64: 512, 12>}]} {
    %c0 = arith.constant 0 : index
    %c0_0 = arith.constant 0 : index
    %0 = vector.load %arg1[%c0, %c0_0] : memref<512x64xbf16, #tpu.memory_space<vmem>>, vector<512x64xbf16>
    %c0_1 = arith.constant 0 : index
    %c0_2 = arith.constant 0 : index
    %1 = vector.load %arg2[%c0_1, %c0_2] : memref<64x12xbf16, #tpu.memory_space<vmem>>, vector<64x12xbf16>
    %cst = arith.constant dense<0.000000e+00> : vector<512x12xf32>
    %2 = tpu.matmul %0, %1, %cst {dimension_numbers = #tpu.dot_dimension_numbers<[1], [0], [0], [1], [0, 0, 1, 1], [], []>} : vector<512x64xbf16>, vector<64x12xbf16>, vector<512x12xf32> -> vector<512x12xf32>
    %c0_3 = arith.constant 0 : index
    %c0_4 = arith.constant 0 : index
    %3 = vector.load %arg3[%c0_3, %c0_4] : memref<1x12xf32, #tpu.memory_space<vmem>>, vector<1x12xf32>
    %4 = vector.broadcast %3 : vector<1x12xf32> to vector<512x12xf32>
    %5 = arith.addf %2, %4 : vector<512x12xf32>
    %6 = arith.negf %5 : vector<512x12xf32>
    %7 = math.exp %6 : vector<512x12xf32>
    %cst_5 = arith.constant 1.000000e+00 : f32
    %8 = vector.broadcast %cst_5 : f32 to vector<512x12xf32>
    %9 = arith.addf %8, %7 : vector<512x12xf32>
    %10 = arith.divf %8, %9 : vector<512x12xf32>
    %11 = arith.truncf %10 : vector<512x12xf32> to vector<512x12xbf16>
    %c0_6 = arith.constant 0 : index
    %c0_7 = arith.constant 0 : index
    %12 = vector.load %arg4[%c0_6, %c0_7] : memref<512x12xbf16, #tpu.memory_space<vmem>>, vector<512x12xbf16>
    tpu.vector_store %arg4[%c0_6, %c0_7], %11 {strides = array<i32>} : memref<512x12xbf16, #tpu.memory_space<vmem>>, vector<512x12xbf16>,
    return
  }
  func.func @transform_0(%arg0: i32) -> (i32, i32) {
    %c0_i32 = arith.constant 0 : i32
    %c0_i32_0 = arith.constant 0 : i32
    return %arg0, %c0_i32 : i32, i32
  }
  func.func @transform_1(%arg0: i32) -> (i32, i32) {
    %c0_i32 = arith.constant 0 : i32
    %c0_i32_0 = arith.constant 0 : i32
    %c0_i32_1 = arith.constant 0 : i32
    return %c0_i32, %c0_i32_0 : i32, i32
  }
  func.func @transform_2(%arg0: i32) -> (i32, i32) {
    %c0_i32 = arith.constant 0 : i32
    %c0_i32_0 = arith.constant 0 : i32
    %c0_i32_1 = arith.constant 0 : i32
    return %c0_i32, %c0_i32_0 : i32, i32
  }
  func.func @transform_3(%arg0: i32) -> (i32, i32) {
    %c0_i32 = arith.constant 0 : i32
    %c0_i32_0 = arith.constant 0 : i32
    return %arg0, %c0_i32 : i32, i32
  }
}

</mosaic_0001>

<bundles_post_ra>
// kernel: tile.24
= control target key start
LH: loop header
LB: loop body
LE: loop exit
PB: predicated region body
PF: predicated region fallthrough
CT: control target
= control target key end

     0   :  { %s6_s8 = smov 3  ;;  %vm8_vm0 = vcmask 523264   ;;  %s30_s9 = smov 64   ;;  %vm15_vm1 = vcmask 1048064   ;;  %s50_s0 = inlined_call_operand.vmem [shape: f32[4,64], index: 0, kind: input, shape index: {}]   ;;  %s51_s1 = inlined_call_operand.vmem [shape: f32[1,256], index: 1, kind: output, shape index: {}]  }
   0x1   :  { %v4_v0 = vld [vmem:[%s50_s0] sm:$0xf]  ;;  %s11_s0 = smov 3 }
   0x2   :  { %5 = vst [vmem:[#allocation1] sm:$0xf] %v4_v0 }
   0x9   :  { %v12_v1 = vld [vmem:[#allocation1 + $0x1] ss:$2 sm:%s11_s0]   ;;  %v7_v2 = vld [vmem:[#allocation1] ss:$2 sm:%s6_s8]  }
   0xa   :  { %13 = vrot.lane.b32.xlu0 %v12_v1, %s30_s9  ;;  %9 = vst.msk [vmem:[#allocation0] ss:$8 sm:$0x3] %vm8_vm0, %v7_v2  }
  0x7c   :  { %v14_v3 = vpop.permute.xlu0 %13  }
  0x7d   :  { %16 = vst.msk [vmem:[#allocation0] ss:$8 sm:$0x3] %vm15_vm1, %v14_v3  }
  0x84   :  { %v20_v4 = vld [vmem:[#allocation0] sm:$0x1]  ;;  %v24_v5 = vld [vmem:[#allocation0 + $0x8] sm:$0x1] }
  0x85   :  { %22 = vst [vmem:[%s51_s1] sm:$0x1] %v20_v4  ;;  %28 = vst [vmem:[%s51_s1 + $0x1] sm:$0x1] %v24_v5 }

// kernel: tile.29
= control target key start
LH: loop header
LB: loop body
LE: loop exit
PB: predicated region body
PF: predicated region fallthrough
CT: control target
= control target key end

     0   :  { %vm7_vm0 = vcmask 261120   ;;  %s37_s8 = smov 32   ;;  %s38_s9 = smov 64   ;;  %vm13_vm1 = vcmask 1048320   ;;  %vm19_vm2 = vcmask 785920   ;;  %vm25_vm3 = vcmask 523520   ;;  %s55_s0 = inlined_call_operand.vmem [shape: f32[4,32], index: 0, kind: input, shape index: {}]   ;;  %s56_s1 = inlined_call_operand.vmem [shape: f32[1,128], index: 1, kind: output, shape index: {}]  }
   0x1   :  { %v4_v0 = vld [vmem:[%s55_s0] sm:$0xf]  ;;  %s36_s0 = smov 96  }
   0x2   :  { %5 = vst [vmem:[#allocation1] sm:$0xf] %v4_v0 }
   0x9   :  { %v10_v1 = vld [vmem:[#allocation1 + $0x3] sm:$0x1]   ;;  %v22_v2 = vld [vmem:[#allocation1 + $0x1] sm:$0x1]   ;;  %v6_v3 = vld [vmem:[#allocation1] sm:$0x1]  }
   0xa   :  { %11 = vrot.lane.b32.xlu0 %v10_v1, %s36_s0  ;;  %23 = vrot.lane.b32.xlu1 %v22_v2, %s37_s8  ;;  %v16_v4 = vld [vmem:[#allocation1 + $0x2] sm:$0x1]   ;;  %8 = vst.msk [vmem:[#allocation0] sm:$0x1] %vm7_vm0, %v6_v3  }
   0xe   :  { %17 = vrot.lane.b32.xlu0 %v16_v4, %s38_s9 }
  0x7c   :  { %v12_v5 = vpop.permute.xlu0 %11   ;;  %v24_v6 = vpop.permute.xlu1 %23  }
  0x7d   :  { %14 = vst.msk [vmem:[#allocation0] sm:$0x1] %vm13_vm1, %v12_v5  }
  0x80   :  { %v18_v7 = vpop.permute.xlu0 %17  }
  0x81   :  { %20 = vst.msk [vmem:[#allocation0] sm:$0x1] %vm19_vm2, %v18_v7  }
  0x82   :  { %26 = vst.msk [vmem:[#allocation0] sm:$0x1] %vm25_vm3, %v24_v6  }
  0x89   :  { %v30_v8 = vld [vmem:[#allocation0] sm:$0x1] }
  0x8a   :  { %32 = vst [vmem:[%s56_s1] sm:$0x1] %v30_v8 }

// kernel: tile.23
= control target key start
LH: loop header
LB: loop body
LE: loop exit
PB: predicated region body
PF: predicated region fallthrough
CT: control target
= control target key end

     0   :  { %2 = vsyncpa [#allocation1], 0  ;;  %s44_s6 = smov [#allocation0]   ;;  %s70_s0 = inlined_call_operand.hbm [shape: f32[64], index: 0, kind: input, shape index: {}]   ;;  %s71_s1 = inlined_call_operand.vmem [shape: f32[4,64], index: 1, kind: output, shape index: {}]  }
   0x1   :  { %s9_s7 = sshll.u32 %s44_s6, 4  ;;  %s20_s10 = scalar_lea.hbm %s70_s0, 16  ;;  %s10_s7 = int_to_ptr.vmem [resolvable:$true] %s9_s7 }
   0x2   :  { %p21_p0 = scmp.ne.s32.totalorder %s70_s0, %s20_s10  ;;  %p24_p1 = scmp.lt.u32.totalorder %s20_s10, %s70_s0 }
   0x4   :  { %p26_p2 = pnand %p24_p1, %p21_p0 }
   0x6   :  { %29 = shalt.err (!%p26_p2)
}
   0x7   :  { %s30_s15 = scalar_lea.vmem %s10_s7, 16  ;;  %s34_s16 = scalar_lea.vmem %s10_s7, 32 }
   0x8   :  { %p31_p3 = scmp.ne.s32.totalorder %s10_s7, %s30_s15  ;;  %p35_p4 = scmp.lt.s32.totalorder %s10_s7, %s10_s7 }
   0x9   :  { %p36_p5 = scmp.lt.s32.totalorder %s34_s16, %s30_s15 }
   0xb   :  { %p37_p6 = por %p36_p5, %p35_p4 }
   0xd   :  { %p38_p7 = pnand %p37_p6, %p31_p3 }
   0xf   :  { %41 = shalt.err (!%p38_p7)
}
  0x10   :  { %12 = dma.hbm_to_vmem [thread:$0]  %s70_s0, 16, %s10_s7, [#allocation1]  }
  0x11   :  { %42 = dma.done.wait [#allocation1], 16  }
  0x12   :  { %43 = vsyncadd [#allocation1], 4294967280  ;;  %v16_v0 = vld [vmem:[#allocation0] ss:$0 sm:$0xff] }
  0x13   :  { %17 = vst [vmem:[%s71_s1] sm:$0xf] %v16_v0 }
  0x14   :  { %18 = vsyncpa [#allocation1], 1 }

// kernel: tile.28
= control target key start
LH: loop header
LB: loop body
LE: loop exit
PB: predicated region body
PF: predicated region fallthrough
CT: control target
= control target key end

     0   :  { %2 = vsyncpa [#allocation1], 0  ;;  %s44_s6 = smov [#allocation0]   ;;  %s70_s0 = inlined_call_operand.hbm [shape: f32[32], index: 0, kind: input, shape index: {}]   ;;  %s71_s1 = inlined_call_operand.vmem [shape: f32[4,32], index: 1, kind: output, shape index: {}]  }
   0x1   :  { %s9_s7 = sshll.u32 %s44_s6, 4  ;;  %s20_s10 = scalar_lea.hbm %s70_s0, 16  ;;  %s10_s7 = int_to_ptr.vmem [resolvable:$true] %s9_s7 }
   0x2   :  { %p21_p0 = scmp.ne.s32.totalorder %s70_s0, %s20_s10  ;;  %p24_p1 = scmp.lt.u32.totalorder %s20_s10, %s70_s0 }
   0x4   :  { %p26_p2 = pnand %p24_p1, %p21_p0 }
   0x6   :  { %29 = shalt.err (!%p26_p2)
}
   0x7   :  { %s30_s15 = scalar_lea.vmem %s10_s7, 16  ;;  %s34_s16 = scalar_lea.vmem %s10_s7, 32 }
   0x8   :  { %p31_p3 = scmp.ne.s32.totalorder %s10_s7, %s30_s15  ;;  %p35_p4 = scmp.lt.s32.totalorder %s10_s7, %s10_s7 }
   0x9   :  { %p36_p5 = scmp.lt.s32.totalorder %s34_s16, %s30_s15 }
   0xb   :  { %p37_p6 = por %p36_p5, %p35_p4 }
   0xd   :  { %p38_p7 = pnand %p37_p6, %p31_p3 }
   0xf   :  { %41 = shalt.err (!%p38_p7)
}
  0x10   :  { %12 = dma.hbm_to_vmem [thread:$0]  %s70_s0, 16, %s10_s7, [#allocation1]  }
  0x11   :  { %42 = dma.done.wait [#allocation1], 16  }
  0x12   :  { %43 = vsyncadd [#allocation1], 4294967280  ;;  %v16_v0 = vld [vmem:[#allocation0] ss:$0 sm:$0xff] }
  0x13   :  { %17 = vst [vmem:[%s71_s1] sm:$0xf] %v16_v0 }
  0x14   :  { %18 = vsyncpa [#allocation1], 1 }

// kernel: tile.34
= control target key start
LH: loop header
LB: loop body
LE: loop exit
PB: predicated region body
PF: predicated region fallthrough
CT: control target
= control target key end

     0   :  { %vm7_vm0 = vcmask 130048   ;;  %s37_s8 = smov 16   ;;  %s38_s9 = smov 32   ;;  %vm13_vm1 = vcmask 523648   ;;  %vm19_vm2 = vcmask 392448   ;;  %vm25_vm3 = vcmask 261248   ;;  %s55_s0 = inlined_call_operand.vmem [shape: f32[4,16], index: 0, kind: input, shape index: {}]   ;;  %s56_s1 = inlined_call_operand.vmem [shape: f32[1,64], index: 1, kind: output, shape index: {}]  }
   0x1   :  { %v4_v0 = vld [vmem:[%s55_s0] sm:$0xf]  ;;  %s36_s0 = smov 48  }
   0x2   :  { %5 = vst [vmem:[#allocation1] sm:$0xf] %v4_v0 }
   0x9   :  { %v10_v1 = vld [vmem:[#allocation1 + $0x3] sm:$0x1]   ;;  %v22_v2 = vld [vmem:[#allocation1 + $0x1] sm:$0x1]   ;;  %v6_v3 = vld [vmem:[#allocation1] sm:$0x1]  }
   0xa   :  { %11 = vrot.lane.b32.xlu0 %v10_v1, %s36_s0  ;;  %23 = vrot.lane.b32.xlu1 %v22_v2, %s37_s8  ;;  %v16_v4 = vld [vmem:[#allocation1 + $0x2] sm:$0x1]   ;;  %8 = vst.msk [vmem:[#allocation0] sm:$0x1] %vm7_vm0, %v6_v3  }
   0xe   :  { %17 = vrot.lane.b32.xlu0 %v16_v4, %s38_s9 }
  0x7c   :  { %v12_v5 = vpop.permute.xlu0 %11   ;;  %v24_v6 = vpop.permute.xlu1 %23  }
  0x7d   :  { %14 = vst.msk [vmem:[#allocation0] sm:$0x1] %vm13_vm1, %v12_v5  }
  0x80   :  { %v18_v7 = vpop.permute.xlu0 %17  }
  0x81   :  { %20 = vst.msk [vmem:[#allocation0] sm:$0x1] %vm19_vm2, %v18_v7  }
  0x82   :  { %26 = vst.msk [vmem:[#allocation0] sm:$0x1] %vm25_vm3, %v24_v6  }
  0x89   :  { %v30_v8 = vld [vmem:[#allocation0] sm:$0x1] }
  0x8a   :  { %32 = vst [vmem:[%s56_s1] sm:$0x1] %v30_v8 }

// kernel: tile.33
= control target key start
LH: loop header
LB: loop body
LE: loop exit
PB: predicated region body
PF: predicated region fallthrough
CT: control target
= control target key end

     0   :  { %2 = vsyncpa [#allocation1], 0  ;;  %s44_s6 = smov [#allocation0]   ;;  %s70_s0 = inlined_call_operand.hbm [shape: f32[16], index: 0, kind: input, shape index: {}]   ;;  %s71_s1 = inlined_call_operand.vmem [shape: f32[4,16], index: 1, kind: output, shape index: {}]  }
   0x1   :  { %s9_s7 = sshll.u32 %s44_s6, 4  ;;  %s20_s10 = scalar_lea.hbm %s70_s0, 16  ;;  %s10_s7 = int_to_ptr.vmem [resolvable:$true] %s9_s7 }
   0x2   :  { %p21_p0 = scmp.ne.s32.totalorder %s70_s0, %s20_s10  ;;  %p24_p1 = scmp.lt.u32.totalorder %s20_s10, %s70_s0 }
   0x4   :  { %p26_p2 = pnand %p24_p1, %p21_p0 }
   0x6   :  { %29 = shalt.err (!%p26_p2)
}
   0x7   :  { %s30_s15 = scalar_lea.vmem %s10_s7, 16  ;;  %s34_s16 = scalar_lea.vmem %s10_s7, 32 }
   0x8   :  { %p31_p3 = scmp.ne.s32.totalorder %s10_s7, %s30_s15  ;;  %p35_p4 = scmp.lt.s32.totalorder %s10_s7, %s10_s7 }
   0x9   :  { %p36_p5 = scmp.lt.s32.totalorder %s34_s16, %s30_s15 }
   0xb   :  { %p37_p6 = por %p36_p5, %p35_p4 }
   0xd   :  { %p38_p7 = pnand %p37_p6, %p31_p3 }
   0xf   :  { %41 = shalt.err (!%p38_p7)
}
  0x10   :  { %12 = dma.hbm_to_vmem [thread:$0]  %s70_s0, 16, %s10_s7, [#allocation1]  }
  0x11   :  { %42 = dma.done.wait [#allocation1], 16  }
  0x12   :  { %43 = vsyncadd [#allocation1], 4294967280  ;;  %v16_v0 = vld [vmem:[#allocation0] ss:$0 sm:$0xff] }
  0x13   :  { %17 = vst [vmem:[%s71_s1] sm:$0xf] %v16_v0 }
  0x14   :  { %18 = vsyncpa [#allocation1], 1 }

// kernel: tile.38
= control target key start
LH: loop header
LB: loop body
LE: loop exit
PB: predicated region body
PF: predicated region fallthrough
CT: control target
= control target key end

     0   :  { %2 = vsyncpa [#allocation1], 0  ;;  %s44_s6 = smov [#allocation0]   ;;  %s70_s0 = inlined_call_operand.hbm [shape: f32[3], index: 0, kind: input, shape index: {}]   ;;  %s71_s1 = inlined_call_operand.vmem [shape: f32[4,3], index: 1, kind: output, shape index: {}]  }
   0x1   :  { %s9_s7 = sshll.u32 %s44_s6, 4  ;;  %s20_s10 = scalar_lea.hbm %s70_s0, 16  ;;  %s10_s7 = int_to_ptr.vmem [resolvable:$true] %s9_s7 }
   0x2   :  { %p21_p0 = scmp.ne.s32.totalorder %s70_s0, %s20_s10  ;;  %p24_p1 = scmp.lt.u32.totalorder %s20_s10, %s70_s0 }
   0x4   :  { %p26_p2 = pnand %p24_p1, %p21_p0 }
   0x6   :  { %29 = shalt.err (!%p26_p2)
}
   0x7   :  { %s30_s15 = scalar_lea.vmem %s10_s7, 16  ;;  %s34_s16 = scalar_lea.vmem %s10_s7, 32 }
   0x8   :  { %p31_p3 = scmp.ne.s32.totalorder %s10_s7, %s30_s15  ;;  %p35_p4 = scmp.lt.s32.totalorder %s10_s7, %s10_s7 }
   0x9   :  { %p36_p5 = scmp.lt.s32.totalorder %s34_s16, %s30_s15 }
   0xb   :  { %p37_p6 = por %p36_p5, %p35_p4 }
   0xd   :  { %p38_p7 = pnand %p37_p6, %p31_p3 }
   0xf   :  { %41 = shalt.err (!%p38_p7)
}
  0x10   :  { %12 = dma.hbm_to_vmem [thread:$0]  %s70_s0, 16, %s10_s7, [#allocation1]  }
  0x11   :  { %42 = dma.done.wait [#allocation1], 16  }
  0x12   :  { %43 = vsyncadd [#allocation1], 4294967280  ;;  %v16_v0 = vld [vmem:[#allocation0] ss:$0 sm:$0xff] }
  0x13   :  { %17 = vst [vmem:[%s71_s1] sm:$0xf] %v16_v0 }
  0x14   :  { %18 = vsyncpa [#allocation1], 1 }

// kernel: tile.39
= control target key start
LH: loop header
LB: loop body
LE: loop exit
PB: predicated region body
PF: predicated region fallthrough
CT: control target
= control target key end

     0   :  { %vm7_vm0 = vcmask 23552   ;;  %s37_s8 = smov 3   ;;  %s38_s9 = smov 6   ;;  %vm13_vm1 = vcmask 97352   ;;  %vm19_vm2 = vcmask 72752   ;;  %vm25_vm3 = vcmask 48152   ;;  %s55_s0 = inlined_call_operand.vmem [shape: f32[4,3], index: 0, kind: input, shape index: {}]   ;;  %s56_s1 = inlined_call_operand.vmem [shape: f32[1,12], index: 1, kind: output, shape index: {}]  }
   0x1   :  { %v4_v0 = vld [vmem:[%s55_s0] sm:$0xf]  ;;  %s36_s0 = smov 9  }
   0x2   :  { %5 = vst [vmem:[#allocation1] sm:$0xf] %v4_v0 }
   0x9   :  { %v10_v1 = vld [vmem:[#allocation1 + $0x3] sm:$0x1]   ;;  %v22_v2 = vld [vmem:[#allocation1 + $0x1] sm:$0x1]   ;;  %v6_v3 = vld [vmem:[#allocation1] sm:$0x1]  }
   0xa   :  { %11 = vrot.lane.b32.xlu0 %v10_v1, %s36_s0  ;;  %23 = vrot.lane.b32.xlu1 %v22_v2, %s37_s8  ;;  %v16_v4 = vld [vmem:[#allocation1 + $0x2] sm:$0x1]   ;;  %8 = vst.msk [vmem:[#allocation0] sm:$0x1] %vm7_vm0, %v6_v3  }
   0xe   :  { %17 = vrot.lane.b32.xlu0 %v16_v4, %s38_s9 }
  0x7c   :  { %v12_v5 = vpop.permute.xlu0 %11   ;;  %v24_v6 = vpop.permute.xlu1 %23  }
  0x7d   :  { %14 = vst.msk [vmem:[#allocation0] sm:$0x1] %vm13_vm1, %v12_v5  }
  0x80   :  { %v18_v7 = vpop.permute.xlu0 %17  }
  0x81   :  { %20 = vst.msk [vmem:[#allocation0] sm:$0x1] %vm19_vm2, %v18_v7  }
  0x82   :  { %26 = vst.msk [vmem:[#allocation0] sm:$0x1] %vm25_vm3, %v24_v6  }
  0x89   :  { %v30_v8 = vld [vmem:[#allocation0] sm:$0x1] }
  0x8a   :  { %32 = vst [vmem:[%s56_s1] sm:$0x1] %v30_v8 }

// kernel: autoencoder_forward.10
= control target key start
LH: loop header
LB: loop body
LE: loop exit
PB: predicated region body
PF: predicated region fallthrough
CT: control target
= control target key end

     0   :  { %vm358_vm0 = vcmask 1044480   ;;  %vm359_vm1 = vcmask 1045504   ;;  %vm261_vm2 = vcmask 220160   ;;  %v1379_v1 = vmov 65535   ;;  %s1859_s1 = inlined_call_operand.vmem [shape: bf16[27,16], index: 1, kind: input, shape index: {}]   ;;  %s1860_s0 = inlined_call_operand.vmem [shape: bf16[512,27], index: 0, kind: input, shape index: {}]   ;;  %s1861_s2 = inlined_call_operand.vmem [shape: f32[1,16], index: 2, kind: input, shape index: {}]   ;;  %s1862_s3 = inlined_call_operand.vmem [shape: bf16[512,16], index: 3, kind: output, shape index: {}]  }
   0x1   :  { %v1345_v0 = vld [vmem:[%s1859_s1] sm:$0xff]   ;;  %v360_v2 = vsel %vm358_vm0, 4294967295, %v1379_v1  ;;  %v1346_v3 = vld [vmem:[%s1859_s1 + $0x8] sm:$0x3f]   ;;  %v1351_v10 = vld [vmem:[%s1860_s0 + $0x10] sm:$0xff]   ;;  %vm974_vm3 = vcmask 125952  }
   0x2   :  { %1272 = vmatprep.subr.bf16.mxu0 %v1345_v0  ;;  %1340 = vmatprep.subr.bf16.mxu1 %v1345_v0  ;;  %v361_v4 = vsel %vm359_vm1, %v360_v2, 0  ;;  %v1347_v5 = vld [vmem:[%s1860_s0] sm:$0xff]   ;;  %v1349_v8 = vld [vmem:[%s1860_s0 + $0x8] sm:$0xff]   ;;  %v1352_v11 = vld [vmem:[%s1860_s0 + $0x90] sm:$0xff]  }
   0x3   :  { %1273 = vmatpush3.bf16.msra.mxu0 %v1345_v0  ;;  %1342 = vmatpush3.bf16.msra.mxu1 %v1345_v0  ;;  %v363_v6 = vand.u32 %v1346_v3, %v361_v4  ;;  %v1348_v7 = vld [vmem:[%s1860_s0 + $0x80] sm:$0xff]   ;;  %v1350_v9 = vld [vmem:[%s1860_s0 + $0x88] sm:$0xff]   ;;  %v1353_v12 = vld [vmem:[%s1860_s0 + $0x18] sm:$0xff]  }
   0x4   :  { %1276 = vmatprep.mubr.msk.bf16.mxu0 %vm261_vm2, %v1347_v5  ;;  %1308 = vmatprep.mubr.msk.bf16.mxu1 %vm261_vm2, %v1348_v7  ;;  %v1354_v13 = vld [vmem:[%s1860_s0 + $0x98] sm:$0xff]   ;;  %v1355_v14 = vld [vmem:[%s1860_s0 + $0x20] sm:$0xff]   ;;  %v1357_v16 = vld [vmem:[%s1860_s0 + $0x28] sm:$0xff]  }
   0x5   :  { %1274 = vmatprep.subr.bf16.mxu0 %v363_v6  ;;  %1341 = vmatprep.subr.bf16.mxu1 %v363_v6  ;;  %v1356_v15 = vld [vmem:[%s1860_s0 + $0xa0] sm:$0xff]   ;;  %v1358_v17 = vld [vmem:[%s1860_s0 + $0xa8] sm:$0xff]   ;;  %v1359_v18 = vld [vmem:[%s1860_s0 + $0x30] sm:$0xff]  }
   0x6   :  { %v1360_v19 = vld [vmem:[%s1860_s0 + $0xb0] sm:$0xff]   ;;  %v1361_v20 = vld [vmem:[%s1860_s0 + $0x38] sm:$0xff]   ;;  %v1363_v22 = vld [vmem:[%s1860_s0 + $0x40] sm:$0xff]  }
   0x7   :  { %1275 = vmatpush3.bf16.msra.mxu0 %v363_v6  ;;  %1343 = vmatpush3.bf16.msra.mxu1 %v363_v6  ;;  %v1362_v21 = vld [vmem:[%s1860_s0 + $0xb8] sm:$0xff]   ;;  %v1364_v23 = vld [vmem:[%s1860_s0 + $0xc0] sm:$0xff]   ;;  %v1365_v24 = vld [vmem:[%s1860_s0 + $0x48] sm:$0xff]  }
   0x8   :  { %v1366_v25 = vld [vmem:[%s1860_s0 + $0xc8] sm:$0xff]   ;;  %v1367_v26 = vld [vmem:[%s1860_s0 + $0x50] sm:$0xff]   ;;  %v1369_v28 = vld [vmem:[%s1860_s0 + $0x58] sm:$0xff]  }
   0x9   :  { %v1368_v27 = vld [vmem:[%s1860_s0 + $0xd0] sm:$0xff]   ;;  %v1370_v29 = vld [vmem:[%s1860_s0 + $0xd8] sm:$0xff]   ;;  %v1371_v30 = vld [vmem:[%s1860_s0 + $0x60] sm:$0xff]  }
   0xa   :  { %1277 = vmatmul.mubr.msk.bf16.vlgmr.msra.gmra.mrb[0].mxu0 %vm261_vm2, %v1349_v8  ;;  %1309 = vmatmul.mubr.msk.bf16.vlgmr.msra.gmra.mrb[0].mxu1 %vm261_vm2, %v1350_v9  ;;  %v1372_v31 = vld [vmem:[%s1860_s0 + $0xe0] sm:$0xff]   ;;  %v1373_v32 = vld [vmem:[%s1860_s0 + $0x68] sm:$0xff]   ;;  %v1375_v34 = vld [vmem:[%s1860_s0 + $0x70] sm:$0xff]  }
   0xb   :  { %1280 = vmatprep.mubr.msk.bf16.mxu0 %vm261_vm2, %v1351_v10  ;;  %1312 = vmatprep.mubr.msk.bf16.mxu1 %vm261_vm2, %v1352_v11  ;;  %v1374_v33 = vld [vmem:[%s1860_s0 + $0xe8] sm:$0xff]   ;;  %v1376_v35 = vld [vmem:[%s1860_s0 + $0xf0] sm:$0xff]   ;;  %v1377_v36 = vld [vmem:[%s1860_s0 + $0x78] sm:$0xff]  }
   0xc   :  { %v1378_v37 = vld [vmem:[%s1860_s0 + $0xf8] sm:$0xff]   ;;  %v1537_v38 = vld [vmem:[%s1861_s2] ss:$0 sm:$0xff] }
  0x12   :  { %1281 = vmatmul.mubr.msk.bf16.gmra.mrb[4].mxu0 %vm261_vm2, %v1353_v12  ;;  %1313 = vmatmul.mubr.msk.bf16.gmra.mrb[4].mxu1 %vm261_vm2, %v1354_v13 }
  0x13   :  { %1284 = vmatprep.mubr.msk.bf16.mxu0 %vm261_vm2, %v1355_v14  ;;  %1316 = vmatprep.mubr.msk.bf16.mxu1 %vm261_vm2, %v1356_v15 }
  0x1a   :  { %1285 = vmatmul.mubr.msk.bf16.gmra.mrb[8].mxu0 %vm261_vm2, %v1357_v16  ;;  %1317 = vmatmul.mubr.msk.bf16.gmra.mrb[8].mxu1 %vm261_vm2, %v1358_v17 }
  0x1b   :  { %1288 = vmatprep.mubr.msk.bf16.mxu0 %vm261_vm2, %v1359_v18  ;;  %1320 = vmatprep.mubr.msk.bf16.mxu1 %vm261_vm2, %v1360_v19 }
  0x22   :  { %1289 = vmatmul.mubr.msk.bf16.gmra.mrb[12].mxu0 %vm261_vm2, %v1361_v20  ;;  %1321 = vmatmul.mubr.msk.bf16.gmra.mrb[12].mxu1 %vm261_vm2, %v1362_v21 }
  0x23   :  { %1292 = vmatprep.mubr.msk.bf16.mxu0 %vm261_vm2, %v1363_v22  ;;  %1324 = vmatprep.mubr.msk.bf16.mxu1 %vm261_vm2, %v1364_v23 }
  0x2a   :  { %1293 = vmatmul.mubr.msk.bf16.gmra.mrb[16].mxu0 %vm261_vm2, %v1365_v24  ;;  %1325 = vmatmul.mubr.msk.bf16.gmra.mrb[16].mxu1 %vm261_vm2, %v1366_v25 }
  0x2b   :  { %1296 = vmatprep.mubr.msk.bf16.mxu0 %vm261_vm2, %v1367_v26  ;;  %1328 = vmatprep.mubr.msk.bf16.mxu1 %vm261_vm2, %v1368_v27 }
  0x32   :  { %1297 = vmatmul.mubr.msk.bf16.gmra.mrb[20].mxu0 %vm261_vm2, %v1369_v28  ;;  %1329 = vmatmul.mubr.msk.bf16.gmra.mrb[20].mxu1 %vm261_vm2, %v1370_v29 }
  0x33   :  { %1300 = vmatprep.mubr.msk.bf16.mxu0 %vm261_vm2, %v1371_v30  ;;  %1332 = vmatprep.mubr.msk.bf16.mxu1 %vm261_vm2, %v1372_v31 }
  0x3a   :  { %1301 = vmatmul.mubr.msk.bf16.gmra.mrb[24].mxu0 %vm261_vm2, %v1373_v32  ;;  %1333 = vmatmul.mubr.msk.bf16.gmra.mrb[24].mxu1 %vm261_vm2, %v1374_v33 }
  0x3b   :  { %1304 = vmatprep.mubr.msk.bf16.mxu0 %vm261_vm2, %v1375_v34  ;;  %1336 = vmatprep.mubr.msk.bf16.mxu1 %vm261_vm2, %v1376_v35 }
  0x42   :  { %1305 = vmatmul.mubr.msk.bf16.gmra.mrb[28].mxu0 %vm261_vm2, %v1377_v36  ;;  %1337 = vmatmul.mubr.msk.bf16.gmra.mrb[28].mxu1 %vm261_vm2, %v1378_v37 }
  0xdd   :  { %v1278_v39 = vpop.f32.mrb[0].mxu0  ;;  %v1310_v40 = vpop.f32.mrb[0].mxu1 }
  0xde   :  { %v408_v41 = vadd.f32 %v1278_v39, %v1537_v38  ;;  %v536_v42 = vadd.f32 %v1310_v40, %v1537_v38  ;;  %v399_v43 = vpop.f32.mrb[1].mxu0  ;;  %v527_v44 = vpop.f32.mrb[1].mxu1 }
  0xdf   :  { %v400_v45 = vadd.f32 %v1537_v38, %v399_v43  ;;  %v528_v46 = vadd.f32 %v1537_v38, %v527_v44  ;;  %v1279_v47 = vpop.f32.mrb[2].mxu0  ;;  %v1311_v48 = vpop.f32.mrb[2].mxu1 }
  0xe0   :  { %v656_v49 = vmax.f32 %v408_v41, 0.0  ;;  %v688_v50 = vmax.f32 %v536_v42, 0.0  ;;  %v411_v51 = vadd.f32 %v1279_v47, %v1537_v38  ;;  %v539_v52 = vadd.f32 %v1311_v48, %v1537_v38  ;;  %v402_v53 = vpop.f32.mrb[3].mxu0  ;;  %v530_v54 = vpop.f32.mrb[3].mxu1 }
  0xe1   :  { %v654_v55 = vmax.f32 %v400_v45, 0.0  ;;  %v686_v56 = vmax.f32 %v528_v46, 0.0  ;;  %v403_v57 = vadd.f32 %v1537_v38, %v402_v53  ;;  %v531_v58 = vadd.f32 %v1537_v38, %v530_v54 }
  0xe2   :  { %v1176_v59 = vpack.c.bf16 %v656_v49, %v656_v49  ;;  %v1208_v60 = vpack.c.bf16 %v688_v50, %v688_v50  ;;  %v657_v61 = vmax.f32 %v411_v51, 0.0  ;;  %v689_v62 = vmax.f32 %v539_v52, 0.0 }
  0xe3   :  { %v1174_v63 = vpack.c.bf16 %v654_v55, %v654_v55  ;;  %v1206_v0 = vpack.c.bf16 %v686_v56, %v686_v56  ;;  %v655_v1 = vmax.f32 %v403_v57, 0.0  ;;  %v687_v2 = vmax.f32 %v531_v58, 0.0 }
  0xe4   :  { %977 = vst.msk [vmem:[%s1862_s3 + $0x8] sm:$0xf] %vm974_vm3, %v1176_v59  ;;  %1009 = vst.msk [vmem:[%s1862_s3 + $0x88] sm:$0xf] %vm974_vm3, %v1208_v60  ;;  %v1177_v3 = vpack.c.bf16 %v657_v61, %v657_v61  ;;  %v1209_v4 = vpack.c.bf16 %v689_v62, %v689_v62 }
  0xe5   :  { %975 = vst.msk [vmem:[%s1862_s3] sm:$0xf] %vm974_vm3, %v1174_v63  ;;  %1007 = vst.msk [vmem:[%s1862_s3 + $0x80] sm:$0xf] %vm974_vm3, %v1206_v0  ;;  %v1175_v5 = vpack.c.bf16 %v655_v1, %v655_v1  ;;  %v1207_v6 = vpack.c.bf16 %v687_v2, %v687_v2  ;;  %v1282_v7 = vpop.f32.mrb[4].mxu0  ;;  %v1314_v8 = vpop.f32.mrb[4].mxu1 }
  0xe6   :  { %978 = vst.msk [vmem:[%s1862_s3 + $0xc] sm:$0xf] %vm974_vm3, %v1177_v3  ;;  %1010 = vst.msk [vmem:[%s1862_s3 + $0x8c] sm:$0xf] %vm974_vm3, %v1209_v4  ;;  %v424_v9 = vadd.f32 %v1282_v7, %v1537_v38  ;;  %v552_v10 = vadd.f32 %v1314_v8, %v1537_v38  ;;  %v415_v11 = vpop.f32.mrb[5].mxu0  ;;  %v543_v12 = vpop.f32.mrb[5].mxu1 }
  0xe7   :  { %976 = vst.msk [vmem:[%s1862_s3 + $0x4] sm:$0xf] %vm974_vm3, %v1175_v5  ;;  %1008 = vst.msk [vmem:[%s1862_s3 + $0x84] sm:$0xf] %vm974_vm3, %v1207_v6  ;;  %v416_v13 = vadd.f32 %v1537_v38, %v415_v11  ;;  %v544_v14 = vadd.f32 %v1537_v38, %v543_v12  ;;  %v1283_v15 = vpop.f32.mrb[6].mxu0  ;;  %v1315_v16 = vpop.f32.mrb[6].mxu1 }
  0xe8   :  { %v660_v17 = vmax.f32 %v424_v9, 0.0  ;;  %v692_v18 = vmax.f32 %v552_v10, 0.0  ;;  %v427_v19 = vadd.f32 %v1283_v15, %v1537_v38  ;;  %v555_v20 = vadd.f32 %v1315_v16, %v1537_v38  ;;  %v418_v21 = vpop.f32.mrb[7].mxu0  ;;  %v546_v22 = vpop.f32.mrb[7].mxu1 }
  0xe9   :  { %v658_v23 = vmax.f32 %v416_v13, 0.0  ;;  %v690_v24 = vmax.f32 %v544_v14, 0.0  ;;  %v419_v25 = vadd.f32 %v1537_v38, %v418_v21  ;;  %v547_v26 = vadd.f32 %v1537_v38, %v546_v22 }
  0xea   :  { %v1180_v27 = vpack.c.bf16 %v660_v17, %v660_v17  ;;  %v1212_v28 = vpack.c.bf16 %v692_v18, %v692_v18  ;;  %v661_v29 = vmax.f32 %v427_v19, 0.0  ;;  %v693_v30 = vmax.f32 %v555_v20, 0.0 }
  0xeb   :  { %v1178_v31 = vpack.c.bf16 %v658_v23, %v658_v23  ;;  %v1210_v32 = vpack.c.bf16 %v690_v24, %v690_v24  ;;  %v659_v33 = vmax.f32 %v419_v25, 0.0  ;;  %v691_v34 = vmax.f32 %v547_v26, 0.0 }
  0xec   :  { %981 = vst.msk [vmem:[%s1862_s3 + $0x18] sm:$0xf] %vm974_vm3, %v1180_v27  ;;  %1013 = vst.msk [vmem:[%s1862_s3 + $0x98] sm:$0xf] %vm974_vm3, %v1212_v28  ;;  %v1181_v35 = vpack.c.bf16 %v661_v29, %v661_v29  ;;  %v1213_v36 = vpack.c.bf16 %v693_v30, %v693_v30 }
  0xed   :  { %979 = vst.msk [vmem:[%s1862_s3 + $0x10] sm:$0xf] %vm974_vm3, %v1178_v31  ;;  %1011 = vst.msk [vmem:[%s1862_s3 + $0x90] sm:$0xf] %vm974_vm3, %v1210_v32  ;;  %v1179_v37 = vpack.c.bf16 %v659_v33, %v659_v33  ;;  %v1211_v39 = vpack.c.bf16 %v691_v34, %v691_v34  ;;  %v1286_v40 = vpop.f32.mrb[8].mxu0  ;;  %v1318_v41 = vpop.f32.mrb[8].mxu1 }
  0xee   :  { %982 = vst.msk [vmem:[%s1862_s3 + $0x1c] sm:$0xf] %vm974_vm3, %v1181_v35  ;;  %1014 = vst.msk [vmem:[%s1862_s3 + $0x9c] sm:$0xf] %vm974_vm3, %v1213_v36  ;;  %v440_v42 = vadd.f32 %v1286_v40, %v1537_v38  ;;  %v568_v43 = vadd.f32 %v1318_v41, %v1537_v38  ;;  %v431_v44 = vpop.f32.mrb[9].mxu0  ;;  %v559_v45 = vpop.f32.mrb[9].mxu1 }
  0xef   :  { %980 = vst.msk [vmem:[%s1862_s3 + $0x14] sm:$0xf] %vm974_vm3, %v1179_v37  ;;  %1012 = vst.msk [vmem:[%s1862_s3 + $0x94] sm:$0xf] %vm974_vm3, %v1211_v39  ;;  %v432_v46 = vadd.f32 %v1537_v38, %v431_v44  ;;  %v560_v47 = vadd.f32 %v1537_v38, %v559_v45  ;;  %v1287_v48 = vpop.f32.mrb[10].mxu0  ;;  %v1319_v49 = vpop.f32.mrb[10].mxu1 }
  0xf0   :  { %v664_v50 = vmax.f32 %v440_v42, 0.0  ;;  %v696_v51 = vmax.f32 %v568_v43, 0.0  ;;  %v443_v52 = vadd.f32 %v1287_v48, %v1537_v38  ;;  %v571_v53 = vadd.f32 %v1319_v49, %v1537_v38  ;;  %v434_v54 = vpop.f32.mrb[11].mxu0  ;;  %v562_v55 = vpop.f32.mrb[11].mxu1 }
  0xf1   :  { %v662_v56 = vmax.f32 %v432_v46, 0.0  ;;  %v694_v57 = vmax.f32 %v560_v47, 0.0  ;;  %v435_v58 = vadd.f32 %v1537_v38, %v434_v54  ;;  %v563_v59 = vadd.f32 %v1537_v38, %v562_v55 }
  0xf2   :  { %v1184_v60 = vpack.c.bf16 %v664_v50, %v664_v50  ;;  %v1216_v61 = vpack.c.bf16 %v696_v51, %v696_v51  ;;  %v665_v62 = vmax.f32 %v443_v52, 0.0  ;;  %v697_v63 = vmax.f32 %v571_v53, 0.0 }
  0xf3   :  { %v1182_v0 = vpack.c.bf16 %v662_v56, %v662_v56  ;;  %v1214_v1 = vpack.c.bf16 %v694_v57, %v694_v57  ;;  %v663_v2 = vmax.f32 %v435_v58, 0.0  ;;  %v695_v3 = vmax.f32 %v563_v59, 0.0 }
  0xf4   :  { %985 = vst.msk [vmem:[%s1862_s3 + $0x28] sm:$0xf] %vm974_vm3, %v1184_v60  ;;  %1017 = vst.msk [vmem:[%s1862_s3 + $0xa8] sm:$0xf] %vm974_vm3, %v1216_v61  ;;  %v1185_v4 = vpack.c.bf16 %v665_v62, %v665_v62  ;;  %v1217_v5 = vpack.c.bf16 %v697_v63, %v697_v63 }
  0xf5   :  { %983 = vst.msk [vmem:[%s1862_s3 + $0x20] sm:$0xf] %vm974_vm3, %v1182_v0  ;;  %1015 = vst.msk [vmem:[%s1862_s3 + $0xa0] sm:$0xf] %vm974_vm3, %v1214_v1  ;;  %v1183_v6 = vpack.c.bf16 %v663_v2, %v663_v2  ;;  %v1215_v7 = vpack.c.bf16 %v695_v3, %v695_v3  ;;  %v1290_v8 = vpop.f32.mrb[12].mxu0  ;;  %v1322_v9 = vpop.f32.mrb[12].mxu1 }
  0xf6   :  { %986 = vst.msk [vmem:[%s1862_s3 + $0x2c] sm:$0xf] %vm974_vm3, %v1185_v4  ;;  %1018 = vst.msk [vmem:[%s1862_s3 + $0xac] sm:$0xf] %vm974_vm3, %v1217_v5  ;;  %v456_v10 = vadd.f32 %v1290_v8, %v1537_v38  ;;  %v584_v11 = vadd.f32 %v1322_v9, %v1537_v38  ;;  %v447_v12 = vpop.f32.mrb[13].mxu0  ;;  %v575_v13 = vpop.f32.mrb[13].mxu1 }
  0xf7   :  { %984 = vst.msk [vmem:[%s1862_s3 + $0x24] sm:$0xf] %vm974_vm3, %v1183_v6  ;;  %1016 = vst.msk [vmem:[%s1862_s3 + $0xa4] sm:$0xf] %vm974_vm3, %v1215_v7  ;;  %v448_v14 = vadd.f32 %v1537_v38, %v447_v12  ;;  %v576_v15 = vadd.f32 %v1537_v38, %v575_v13  ;;  %v1291_v16 = vpop.f32.mrb[14].mxu0  ;;  %v1323_v17 = vpop.f32.mrb[14].mxu1 }
  0xf8   :  { %v668_v18 = vmax.f32 %v456_v10, 0.0  ;;  %v700_v19 = vmax.f32 %v584_v11, 0.0  ;;  %v459_v20 = vadd.f32 %v1291_v16, %v1537_v38  ;;  %v587_v21 = vadd.f32 %v1323_v17, %v1537_v38  ;;  %v450_v22 = vpop.f32.mrb[15].mxu0  ;;  %v578_v23 = vpop.f32.mrb[15].mxu1 }
  0xf9   :  { %v666_v24 = vmax.f32 %v448_v14, 0.0  ;;  %v698_v25 = vmax.f32 %v576_v15, 0.0  ;;  %v451_v26 = vadd.f32 %v1537_v38, %v450_v22  ;;  %v579_v27 = vadd.f32 %v1537_v38, %v578_v23 }
  0xfa   :  { %v1188_v28 = vpack.c.bf16 %v668_v18, %v668_v18  ;;  %v1220_v29 = vpack.c.bf16 %v700_v19, %v700_v19  ;;  %v669_v30 = vmax.f32 %v459_v20, 0.0  ;;  %v701_v31 = vmax.f32 %v587_v21, 0.0 }
  0xfb   :  { %v1186_v32 = vpack.c.bf16 %v666_v24, %v666_v24  ;;  %v1218_v33 = vpack.c.bf16 %v698_v25, %v698_v25  ;;  %v667_v34 = vmax.f32 %v451_v26, 0.0  ;;  %v699_v35 = vmax.f32 %v579_v27, 0.0 }
  0xfc   :  { %989 = vst.msk [vmem:[%s1862_s3 + $0x38] sm:$0xf] %vm974_vm3, %v1188_v28  ;;  %1021 = vst.msk [vmem:[%s1862_s3 + $0xb8] sm:$0xf] %vm974_vm3, %v1220_v29  ;;  %v1189_v36 = vpack.c.bf16 %v669_v30, %v669_v30  ;;  %v1221_v37 = vpack.c.bf16 %v701_v31, %v701_v31 }
  0xfd   :  { %987 = vst.msk [vmem:[%s1862_s3 + $0x30] sm:$0xf] %vm974_vm3, %v1186_v32  ;;  %1019 = vst.msk [vmem:[%s1862_s3 + $0xb0] sm:$0xf] %vm974_vm3, %v1218_v33  ;;  %v1187_v39 = vpack.c.bf16 %v667_v34, %v667_v34  ;;  %v1219_v40 = vpack.c.bf16 %v699_v35, %v699_v35  ;;  %v1294_v41 = vpop.f32.mrb[16].mxu0  ;;  %v1326_v42 = vpop.f32.mrb[16].mxu1 }
  0xfe   :  { %990 = vst.msk [vmem:[%s1862_s3 + $0x3c] sm:$0xf] %vm974_vm3, %v1189_v36  ;;  %1022 = vst.msk [vmem:[%s1862_s3 + $0xbc] sm:$0xf] %vm974_vm3, %v1221_v37  ;;  %v472_v43 = vadd.f32 %v1294_v41, %v1537_v38  ;;  %v600_v44 = vadd.f32 %v1326_v42, %v1537_v38  ;;  %v463_v45 = vpop.f32.mrb[17].mxu0  ;;  %v591_v46 = vpop.f32.mrb[17].mxu1 }
  0xff   :  { %988 = vst.msk [vmem:[%s1862_s3 + $0x34] sm:$0xf] %vm974_vm3, %v1187_v39  ;;  %1020 = vst.msk [vmem:[%s1862_s3 + $0xb4] sm:$0xf] %vm974_vm3, %v1219_v40  ;;  %v464_v47 = vadd.f32 %v1537_v38, %v463_v45  ;;  %v592_v48 = vadd.f32 %v1537_v38, %v591_v46  ;;  %v1295_v49 = vpop.f32.mrb[18].mxu0  ;;  %v1327_v50 = vpop.f32.mrb[18].mxu1 }
 0x100   :  { %v672_v51 = vmax.f32 %v472_v43, 0.0  ;;  %v704_v52 = vmax.f32 %v600_v44, 0.0  ;;  %v475_v53 = vadd.f32 %v1295_v49, %v1537_v38  ;;  %v603_v54 = vadd.f32 %v1327_v50, %v1537_v38  ;;  %v466_v55 = vpop.f32.mrb[19].mxu0  ;;  %v594_v56 = vpop.f32.mrb[19].mxu1 }
 0x101   :  { %v670_v57 = vmax.f32 %v464_v47, 0.0  ;;  %v702_v58 = vmax.f32 %v592_v48, 0.0  ;;  %v467_v59 = vadd.f32 %v1537_v38, %v466_v55  ;;  %v595_v60 = vadd.f32 %v1537_v38, %v594_v56 }
 0x102   :  { %v1192_v61 = vpack.c.bf16 %v672_v51, %v672_v51  ;;  %v1224_v62 = vpack.c.bf16 %v704_v52, %v704_v52  ;;  %v673_v63 = vmax.f32 %v475_v53, 0.0  ;;  %v705_v0 = vmax.f32 %v603_v54, 0.0 }
 0x103   :  { %v1190_v1 = vpack.c.bf16 %v670_v57, %v670_v57  ;;  %v1222_v2 = vpack.c.bf16 %v702_v58, %v702_v58  ;;  %v671_v3 = vmax.f32 %v467_v59, 0.0  ;;  %v703_v4 = vmax.f32 %v595_v60, 0.0 }
 0x104   :  { %993 = vst.msk [vmem:[%s1862_s3 + $0x48] sm:$0xf] %vm974_vm3, %v1192_v61  ;;  %1025 = vst.msk [vmem:[%s1862_s3 + $0xc8] sm:$0xf] %vm974_vm3, %v1224_v62  ;;  %v1193_v5 = vpack.c.bf16 %v673_v63, %v673_v63  ;;  %v1225_v6 = vpack.c.bf16 %v705_v0, %v705_v0 }
 0x105   :  { %991 = vst.msk [vmem:[%s1862_s3 + $0x40] sm:$0xf] %vm974_vm3, %v1190_v1  ;;  %1023 = vst.msk [vmem:[%s1862_s3 + $0xc0] sm:$0xf] %vm974_vm3, %v1222_v2  ;;  %v1191_v7 = vpack.c.bf16 %v671_v3, %v671_v3  ;;  %v1223_v8 = vpack.c.bf16 %v703_v4, %v703_v4  ;;  %v1298_v9 = vpop.f32.mrb[20].mxu0  ;;  %v1330_v10 = vpop.f32.mrb[20].mxu1 }
 0x106   :  { %994 = vst.msk [vmem:[%s1862_s3 + $0x4c] sm:$0xf] %vm974_vm3, %v1193_v5  ;;  %1026 = vst.msk [vmem:[%s1862_s3 + $0xcc] sm:$0xf] %vm974_vm3, %v1225_v6  ;;  %v488_v11 = vadd.f32 %v1298_v9, %v1537_v38  ;;  %v616_v12 = vadd.f32 %v1330_v10, %v1537_v38  ;;  %v479_v13 = vpop.f32.mrb[21].mxu0  ;;  %v607_v14 = vpop.f32.mrb[21].mxu1 }
 0x107   :  { %992 = vst.msk [vmem:[%s1862_s3 + $0x44] sm:$0xf] %vm974_vm3, %v1191_v7  ;;  %1024 = vst.msk [vmem:[%s1862_s3 + $0xc4] sm:$0xf] %vm974_vm3, %v1223_v8  ;;  %v480_v15 = vadd.f32 %v1537_v38, %v479_v13  ;;  %v608_v16 = vadd.f32 %v1537_v38, %v607_v14  ;;  %v1299_v17 = vpop.f32.mrb[22].mxu0  ;;  %v1331_v18 = vpop.f32.mrb[22].mxu1 }
 0x108   :  { %v676_v19 = vmax.f32 %v488_v11, 0.0  ;;  %v708_v20 = vmax.f32 %v616_v12, 0.0  ;;  %v491_v21 = vadd.f32 %v1299_v17, %v1537_v38  ;;  %v619_v22 = vadd.f32 %v1331_v18, %v1537_v38  ;;  %v482_v23 = vpop.f32.mrb[23].mxu0  ;;  %v610_v24 = vpop.f32.mrb[23].mxu1 }
 0x109   :  { %v674_v25 = vmax.f32 %v480_v15, 0.0  ;;  %v706_v26 = vmax.f32 %v608_v16, 0.0  ;;  %v483_v27 = vadd.f32 %v1537_v38, %v482_v23  ;;  %v611_v28 = vadd.f32 %v1537_v38, %v610_v24 }
 0x10a   :  { %v1196_v29 = vpack.c.bf16 %v676_v19, %v676_v19  ;;  %v1228_v30 = vpack.c.bf16 %v708_v20, %v708_v20  ;;  %v677_v31 = vmax.f32 %v491_v21, 0.0  ;;  %v709_v32 = vmax.f32 %v619_v22, 0.0 }
 0x10b   :  { %v1194_v33 = vpack.c.bf16 %v674_v25, %v674_v25  ;;  %v1226_v34 = vpack.c.bf16 %v706_v26, %v706_v26  ;;  %v675_v35 = vmax.f32 %v483_v27, 0.0  ;;  %v707_v36 = vmax.f32 %v611_v28, 0.0 }
 0x10c   :  { %997 = vst.msk [vmem:[%s1862_s3 + $0x58] sm:$0xf] %vm974_vm3, %v1196_v29  ;;  %1029 = vst.msk [vmem:[%s1862_s3 + $0xd8] sm:$0xf] %vm974_vm3, %v1228_v30  ;;  %v1197_v37 = vpack.c.bf16 %v677_v31, %v677_v31  ;;  %v1229_v39 = vpack.c.bf16 %v709_v32, %v709_v32 }
 0x10d   :  { %995 = vst.msk [vmem:[%s1862_s3 + $0x50] sm:$0xf] %vm974_vm3, %v1194_v33  ;;  %1027 = vst.msk [vmem:[%s1862_s3 + $0xd0] sm:$0xf] %vm974_vm3, %v1226_v34  ;;  %v1195_v40 = vpack.c.bf16 %v675_v35, %v675_v35  ;;  %v1227_v41 = vpack.c.bf16 %v707_v36, %v707_v36  ;;  %v1302_v42 = vpop.f32.mrb[24].mxu0  ;;  %v1334_v43 = vpop.f32.mrb[24].mxu1 }
 0x10e   :  { %998 = vst.msk [vmem:[%s1862_s3 + $0x5c] sm:$0xf] %vm974_vm3, %v1197_v37  ;;  %1030 = vst.msk [vmem:[%s1862_s3 + $0xdc] sm:$0xf] %vm974_vm3, %v1229_v39  ;;  %v504_v44 = vadd.f32 %v1302_v42, %v1537_v38  ;;  %v632_v45 = vadd.f32 %v1334_v43, %v1537_v38  ;;  %v495_v46 = vpop.f32.mrb[25].mxu0  ;;  %v623_v47 = vpop.f32.mrb[25].mxu1 }
 0x10f   :  { %996 = vst.msk [vmem:[%s1862_s3 + $0x54] sm:$0xf] %vm974_vm3, %v1195_v40  ;;  %1028 = vst.msk [vmem:[%s1862_s3 + $0xd4] sm:$0xf] %vm974_vm3, %v1227_v41  ;;  %v496_v48 = vadd.f32 %v1537_v38, %v495_v46  ;;  %v624_v49 = vadd.f32 %v1537_v38, %v623_v47  ;;  %v1303_v50 = vpop.f32.mrb[26].mxu0  ;;  %v1335_v51 = vpop.f32.mrb[26].mxu1 }
 0x110   :  { %v680_v52 = vmax.f32 %v504_v44, 0.0  ;;  %v712_v53 = vmax.f32 %v632_v45, 0.0  ;;  %v507_v54 = vadd.f32 %v1303_v50, %v1537_v38  ;;  %v635_v55 = vadd.f32 %v1335_v51, %v1537_v38  ;;  %v498_v56 = vpop.f32.mrb[27].mxu0  ;;  %v626_v57 = vpop.f32.mrb[27].mxu1 }
 0x111   :  { %v678_v58 = vmax.f32 %v496_v48, 0.0  ;;  %v710_v59 = vmax.f32 %v624_v49, 0.0  ;;  %v499_v60 = vadd.f32 %v1537_v38, %v498_v56  ;;  %v627_v61 = vadd.f32 %v1537_v38, %v626_v57 }
 0x112   :  { %v1200_v62 = vpack.c.bf16 %v680_v52, %v680_v52  ;;  %v1232_v63 = vpack.c.bf16 %v712_v53, %v712_v53  ;;  %v681_v0 = vmax.f32 %v507_v54, 0.0  ;;  %v713_v1 = vmax.f32 %v635_v55, 0.0 }
 0x113   :  { %v1198_v2 = vpack.c.bf16 %v678_v58, %v678_v58  ;;  %v1230_v3 = vpack.c.bf16 %v710_v59, %v710_v59  ;;  %v679_v4 = vmax.f32 %v499_v60, 0.0  ;;  %v711_v5 = vmax.f32 %v627_v61, 0.0 }
 0x114   :  { %1001 = vst.msk [vmem:[%s1862_s3 + $0x68] sm:$0xf] %vm974_vm3, %v1200_v62  ;;  %1033 = vst.msk [vmem:[%s1862_s3 + $0xe8] sm:$0xf] %vm974_vm3, %v1232_v63  ;;  %v1201_v6 = vpack.c.bf16 %v681_v0, %v681_v0  ;;  %v1233_v7 = vpack.c.bf16 %v713_v1, %v713_v1 }
 0x115   :  { %999 = vst.msk [vmem:[%s1862_s3 + $0x60] sm:$0xf] %vm974_vm3, %v1198_v2  ;;  %1031 = vst.msk [vmem:[%s1862_s3 + $0xe0] sm:$0xf] %vm974_vm3, %v1230_v3  ;;  %v1199_v8 = vpack.c.bf16 %v679_v4, %v679_v4  ;;  %v1231_v9 = vpack.c.bf16 %v711_v5, %v711_v5  ;;  %v1306_v10 = vpop.f32.mrb[28].mxu0  ;;  %v1338_v11 = vpop.f32.mrb[28].mxu1 }
 0x116   :  { %1002 = vst.msk [vmem:[%s1862_s3 + $0x6c] sm:$0xf] %vm974_vm3, %v1201_v6  ;;  %1034 = vst.msk [vmem:[%s1862_s3 + $0xec] sm:$0xf] %vm974_vm3, %v1233_v7  ;;  %v520_v12 = vadd.f32 %v1306_v10, %v1537_v38  ;;  %v648_v13 = vadd.f32 %v1338_v11, %v1537_v38  ;;  %v511_v14 = vpop.f32.mrb[29].mxu0  ;;  %v639_v15 = vpop.f32.mrb[29].mxu1 }
 0x117   :  { %1000 = vst.msk [vmem:[%s1862_s3 + $0x64] sm:$0xf] %vm974_vm3, %v1199_v8  ;;  %1032 = vst.msk [vmem:[%s1862_s3 + $0xe4] sm:$0xf] %vm974_vm3, %v1231_v9  ;;  %v512_v16 = vadd.f32 %v1537_v38, %v511_v14  ;;  %v640_v17 = vadd.f32 %v1537_v38, %v639_v15  ;;  %v1307_v18 = vpop.f32.mrb[30].mxu0  ;;  %v1339_v19 = vpop.f32.mrb[30].mxu1 }
 0x118   :  { %v684_v20 = vmax.f32 %v520_v12, 0.0  ;;  %v716_v21 = vmax.f32 %v648_v13, 0.0  ;;  %v523_v22 = vadd.f32 %v1307_v18, %v1537_v38  ;;  %v651_v23 = vadd.f32 %v1339_v19, %v1537_v38  ;;  %v514_v24 = vpop.f32.mrb[31].mxu0  ;;  %v642_v25 = vpop.f32.mrb[31].mxu1 }
 0x119   :  { %v682_v26 = vmax.f32 %v512_v16, 0.0  ;;  %v714_v27 = vmax.f32 %v640_v17, 0.0  ;;  %v515_v28 = vadd.f32 %v1537_v38, %v514_v24  ;;  %v643_v29 = vadd.f32 %v1537_v38, %v642_v25 }
 0x11a   :  { %v1204_v30 = vpack.c.bf16 %v684_v20, %v684_v20  ;;  %v1236_v31 = vpack.c.bf16 %v716_v21, %v716_v21  ;;  %v685_v32 = vmax.f32 %v523_v22, 0.0  ;;  %v717_v33 = vmax.f32 %v651_v23, 0.0 }
 0x11b   :  { %v1202_v34 = vpack.c.bf16 %v682_v26, %v682_v26  ;;  %v1234_v35 = vpack.c.bf16 %v714_v27, %v714_v27  ;;  %v683_v36 = vmax.f32 %v515_v28, 0.0  ;;  %v715_v37 = vmax.f32 %v643_v29, 0.0 }
 0x11c   :  { %1005 = vst.msk [vmem:[%s1862_s3 + $0x78] sm:$0xf] %vm974_vm3, %v1204_v30  ;;  %1037 = vst.msk [vmem:[%s1862_s3 + $0xf8] sm:$0xf] %vm974_vm3, %v1236_v31  ;;  %v1205_v39 = vpack.c.bf16 %v685_v32, %v685_v32  ;;  %v1237_v38 = vpack.c.bf16 %v717_v33, %v717_v33 }
 0x11d   :  { %1003 = vst.msk [vmem:[%s1862_s3 + $0x70] sm:$0xf] %vm974_vm3, %v1202_v34  ;;  %1035 = vst.msk [vmem:[%s1862_s3 + $0xf0] sm:$0xf] %vm974_vm3, %v1234_v35  ;;  %v1203_v40 = vpack.c.bf16 %v683_v36, %v683_v36  ;;  %v1235_v41 = vpack.c.bf16 %v715_v37, %v715_v37 }
 0x11e   :  { %1006 = vst.msk [vmem:[%s1862_s3 + $0x7c] sm:$0xf] %vm974_vm3, %v1205_v39  ;;  %1038 = vst.msk [vmem:[%s1862_s3 + $0xfc] sm:$0xf] %vm974_vm3, %v1237_v38 }
 0x11f   :  { %1004 = vst.msk [vmem:[%s1862_s3 + $0x74] sm:$0xf] %vm974_vm3, %v1203_v40  ;;  %1036 = vst.msk [vmem:[%s1862_s3 + $0xf4] sm:$0xf] %vm974_vm3, %v1235_v41 }

// kernel: autoencoder_forward.11
= control target key start
LH: loop header
LB: loop body
LE: loop exit
PB: predicated region body
PF: predicated region fallthrough
CT: control target
= control target key end

     0   :  { %v523_v0 = vmov 0   ;;  %vm182_vm0 = vcmask 130048   ;;  %vm384_vm1 = vcmask 257024   ;;  %s712_s1 = inlined_call_operand.vmem [shape: bf16[144,32], index: 1, kind: input, shape index: {}]   ;;  %s713_s0 = inlined_call_operand.vmem [shape: bf16[128,144], index: 0, kind: input, shape index: {}]   ;;  %s714_s2 = inlined_call_operand.vmem [shape: f32[1,32], index: 2, kind: input, shape index: {}]   ;;  %s715_s3 = inlined_call_operand.vmem [shape: bf16[128,32], index: 3, kind: output, shape index: {}]  }
   0x1   :  { %207 = vmatprep.subr.bf16.mxu0 %v523_v0  ;;  %471 = vmatprep.subr.bf16.mxu1 %v523_v0  ;;  %v490_v1 = vld [vmem:[%s712_s1] sm:$0xff]   ;;  %v491_v2 = vld [vmem:[%s712_s1 + $0x8] sm:$0xff]   ;;  %v492_v3 = vld [vmem:[%s712_s1 + $0x10] sm:$0xff]  }
   0x2   :  { %208 = vmatpush1.bf16.msra.mxu0 %v490_v1  ;;  %480 = vmatpush1.bf16.msra.mxu1 %v490_v1  ;;  %v493_v4 = vld [vmem:[%s712_s1 + $0x18] sm:$0xff]   ;;  %v501_v5 = vld [vmem:[%s713_s0 + $0x4] ss:$8 sps:$4 sm:$0xff]   ;;  %v496_v9 = vld [vmem:[%s712_s1 + $0x30] sm:$0xff]  }
   0x3   :  { %209 = vmatprep.subr.bf16.mxu0 %v523_v0  ;;  %472 = vmatprep.subr.bf16.mxu1 %v523_v0  ;;  %v504_v6 = vld [vmem:[%s713_s0 + $0x44] ss:$8 sps:$4 sm:$0xff]   ;;  %v497_v10 = vld [vmem:[%s712_s1 + $0x38] sm:$0xff]   ;;  %v499_v12 = vld [vmem:[%s713_s0] ss:$8 sps:$4 sm:$0xff]  }
   0x4   :  { %431 = vmatprep.mubr.msk.bf16.mxu0 %vm182_vm0, %v501_v5  ;;  %435 = vmatprep.mubr.msk.bf16.mxu1 %vm182_vm0, %v504_v6  ;;  %v494_v7 = vld [vmem:[%s712_s1 + $0x20] sm:$0xff]   ;;  %v495_v8 = vld [vmem:[%s712_s1 + $0x28] sm:$0xff]   ;;  %v505_v14 = vld [vmem:[%s713_s0 + $0x14] ss:$8 sps:$4 sm:$0xff]  }
   0x5   :  { %v498_v11 = vld [vmem:[%s712_s1 + $0x40] sm:$0xff]   ;;  %v507_v15 = vld [vmem:[%s713_s0 + $0x54] ss:$8 sps:$4 sm:$0xff]   ;;  %v509_v16 = vld [vmem:[%s713_s0 + $0x10] ss:$8 sps:$4 sm:$0xff]  }
   0x6   :  { %210 = vmatpush1.bf16.msra.mxu0 %v491_v2  ;;  %481 = vmatpush1.bf16.msra.mxu1 %v491_v2  ;;  %v502_v13 = vld [vmem:[%s713_s0 + $0x40] ss:$8 sps:$4 sm:$0xff]   ;;  %v510_v17 = vld [vmem:[%s713_s0 + $0x50] ss:$8 sps:$4 sm:$0xff]   ;;  %v511_v18 = vld [vmem:[%s713_s0 + $0x24] ss:$8 sps:$4 sm:$0xff]  }
   0x7   :  { %211 = vmatprep.subr.bf16.mxu0 %v523_v0  ;;  %473 = vmatprep.subr.bf16.mxu1 %v523_v0  ;;  %v513_v19 = vld [vmem:[%s713_s0 + $0x64] ss:$8 sps:$4 sm:$0xff]   ;;  %v515_v20 = vld [vmem:[%s713_s0 + $0x20] ss:$8 sps:$4 sm:$0xff]   ;;  %v517_v22 = vld [vmem:[%s713_s0 + $0x34] ss:$8 sps:$4 sm:$0xff]  }
   0x8   :  { %v516_v21 = vld [vmem:[%s713_s0 + $0x60] ss:$8 sps:$4 sm:$0xff]   ;;  %v519_v23 = vld [vmem:[%s713_s0 + $0x74] ss:$8 sps:$4 sm:$0xff]   ;;  %v521_v24 = vld [vmem:[%s713_s0 + $0x30] ss:$8 sps:$4 sm:$0xff]  }
   0x9   :  { %v522_v25 = vld [vmem:[%s713_s0 + $0x70] ss:$8 sps:$4 sm:$0xff]   ;;  %v630_v26 = vld [vmem:[%s714_s2] ss:$0 sm:$0xff] }
   0xa   :  { %212 = vmatpush1.bf16.msra.mxu0 %v492_v3  ;;  %482 = vmatpush1.bf16.msra.mxu1 %v492_v3 }
   0xb   :  { %213 = vmatprep.subr.bf16.mxu0 %v523_v0  ;;  %474 = vmatprep.subr.bf16.mxu1 %v523_v0 }
   0xe   :  { %214 = vmatpush1.bf16.msra.mxu0 %v493_v4  ;;  %483 = vmatpush1.bf16.msra.mxu1 %v493_v4 }
   0xf   :  { %215 = vmatprep.subr.bf16.mxu0 %v523_v0  ;;  %475 = vmatprep.subr.bf16.mxu1 %v523_v0 }
  0x12   :  { %216 = vmatpush1.bf16.msra.mxu0 %v494_v7  ;;  %484 = vmatpush1.bf16.msra.mxu1 %v494_v7 }
  0x13   :  { %217 = vmatprep.subr.bf16.mxu0 %v523_v0  ;;  %476 = vmatprep.subr.bf16.mxu1 %v523_v0 }
  0x16   :  { %218 = vmatpush1.bf16.msra.mxu0 %v495_v8  ;;  %485 = vmatpush1.bf16.msra.mxu1 %v495_v8 }
  0x17   :  { %219 = vmatprep.subr.bf16.mxu0 %v523_v0  ;;  %477 = vmatprep.subr.bf16.mxu1 %v523_v0 }
  0x1a   :  { %220 = vmatpush1.bf16.msra.mxu0 %v496_v9  ;;  %486 = vmatpush1.bf16.msra.mxu1 %v496_v9 }
  0x1b   :  { %221 = vmatprep.subr.bf16.mxu0 %v523_v0  ;;  %478 = vmatprep.subr.bf16.mxu1 %v523_v0 }
  0x1e   :  { %222 = vmatpush1.bf16.msra.mxu0 %v497_v10  ;;  %487 = vmatpush1.bf16.msra.mxu1 %v497_v10 }
  0x1f   :  { %223 = vmatprep.subr.bf16.mxu0 %v523_v0  ;;  %479 = vmatprep.subr.bf16.mxu1 %v523_v0 }
  0x22   :  { %224 = vmatpush1.bf16.msra.mxu0 %v498_v11  ;;  %488 = vmatpush1.bf16.msra.mxu1 %v498_v11 }
  0x25   :  { %240 = vmatmul.mubr.bf16.vlgmr.msra.gmra.mrb[0].mxu0 %v499_v12  ;;  %272 = vmatmul.mubr.bf16.vlgmr.msra.gmra.mrb[0].mxu1 %v502_v13 }
  0x26   :  { %432 = vmatprep.mubr.msk.bf16.mxu0 %vm182_vm0, %v505_v14  ;;  %436 = vmatprep.mubr.msk.bf16.mxu1 %vm182_vm0, %v507_v15 }
  0x2d   :  { %248 = vmatmul.mubr.bf16.gmra.mrb[4].mxu0 %v509_v16  ;;  %280 = vmatmul.mubr.bf16.gmra.mrb[4].mxu1 %v510_v17 }
  0x2e   :  { %433 = vmatprep.mubr.msk.bf16.mxu0 %vm182_vm0, %v511_v18  ;;  %437 = vmatprep.mubr.msk.bf16.mxu1 %vm182_vm0, %v513_v19 }
  0x35   :  { %256 = vmatmul.mubr.bf16.gmra.mrb[8].mxu0 %v515_v20  ;;  %288 = vmatmul.mubr.bf16.gmra.mrb[8].mxu1 %v516_v21 }
  0x36   :  { %434 = vmatprep.mubr.msk.bf16.mxu0 %vm182_vm0, %v517_v22  ;;  %438 = vmatprep.mubr.msk.bf16.mxu1 %vm182_vm0, %v519_v23 }
  0x3d   :  { %264 = vmatmul.mubr.bf16.gmra.mrb[12].mxu0 %v521_v24  ;;  %296 = vmatmul.mubr.bf16.gmra.mrb[12].mxu1 %v522_v25 }
  0xf8   :  { %v241_v27 = vpop.f32.mrb[0].mxu0  ;;  %v273_v28 = vpop.f32.mrb[0].mxu1 }
  0xf9   :  { %v242_v29 = vadd.f32 %v630_v26, %v241_v27  ;;  %v274_v30 = vadd.f32 %v630_v26, %v273_v28  ;;  %v243_v31 = vpop.f32.mrb[1].mxu0  ;;  %v275_v32 = vpop.f32.mrb[1].mxu1 }
  0xfa   :  { %v244_v33 = vpop.f32.mrb[2].mxu0  ;;  %v276_v34 = vpop.f32.mrb[2].mxu1 }
  0xfb   :  { %v304_v35 = vmax.f32 %v242_v29, 0.0  ;;  %v312_v36 = vmax.f32 %v274_v30, 0.0  ;;  %v245_v37 = vadd.f32 %v630_v26, %v244_v33  ;;  %v277_v38 = vadd.f32 %v630_v26, %v276_v34  ;;  %v246_v39 = vpop.f32.mrb[3].mxu0  ;;  %v278_v40 = vpop.f32.mrb[3].mxu1 }
  0xfd   :  { %v455_v41 = vpack.c.bf16 %v304_v35, %v304_v35  ;;  %v463_v42 = vpack.c.bf16 %v312_v36, %v312_v36  ;;  %v305_v43 = vmax.f32 %v245_v37, 0.0  ;;  %v313_v44 = vmax.f32 %v277_v38, 0.0 }
  0xff   :  { %385 = vst.msk [vmem:[%s715_s3] sm:$0xf] %vm384_vm1, %v455_v41  ;;  %393 = vst.msk [vmem:[%s715_s3 + $0x20] sm:$0xf] %vm384_vm1, %v463_v42  ;;  %v456_v45 = vpack.c.bf16 %v305_v43, %v305_v43  ;;  %v464_v46 = vpack.c.bf16 %v313_v44, %v313_v44 }
 0x100   :  { %v249_v47 = vpop.f32.mrb[4].mxu0  ;;  %v281_v48 = vpop.f32.mrb[4].mxu1 }
 0x101   :  { %386 = vst.msk [vmem:[%s715_s3 + $0x4] sm:$0xf] %vm384_vm1, %v456_v45  ;;  %394 = vst.msk [vmem:[%s715_s3 + $0x24] sm:$0xf] %vm384_vm1, %v464_v46  ;;  %v250_v49 = vadd.f32 %v630_v26, %v249_v47  ;;  %v282_v50 = vadd.f32 %v630_v26, %v281_v48  ;;  %v251_v51 = vpop.f32.mrb[5].mxu0  ;;  %v283_v52 = vpop.f32.mrb[5].mxu1 }
 0x102   :  { %v252_v53 = vpop.f32.mrb[6].mxu0  ;;  %v284_v54 = vpop.f32.mrb[6].mxu1 }
 0x103   :  { %v306_v55 = vmax.f32 %v250_v49, 0.0  ;;  %v314_v56 = vmax.f32 %v282_v50, 0.0  ;;  %v253_v57 = vadd.f32 %v630_v26, %v252_v53  ;;  %v285_v58 = vadd.f32 %v630_v26, %v284_v54  ;;  %v254_v59 = vpop.f32.mrb[7].mxu0  ;;  %v286_v60 = vpop.f32.mrb[7].mxu1 }
 0x105   :  { %v457_v61 = vpack.c.bf16 %v306_v55, %v306_v55  ;;  %v465_v62 = vpack.c.bf16 %v314_v56, %v314_v56  ;;  %v307_v63 = vmax.f32 %v253_v57, 0.0  ;;  %v315_v0 = vmax.f32 %v285_v58, 0.0 }
 0x107   :  { %387 = vst.msk [vmem:[%s715_s3 + $0x8] sm:$0xf] %vm384_vm1, %v457_v61  ;;  %395 = vst.msk [vmem:[%s715_s3 + $0x28] sm:$0xf] %vm384_vm1, %v465_v62  ;;  %v458_v1 = vpack.c.bf16 %v307_v63, %v307_v63  ;;  %v466_v2 = vpack.c.bf16 %v315_v0, %v315_v0 }
 0x108   :  { %v257_v3 = vpop.f32.mrb[8].mxu0  ;;  %v289_v4 = vpop.f32.mrb[8].mxu1 }
 0x109   :  { %388 = vst.msk [vmem:[%s715_s3 + $0xc] sm:$0xf] %vm384_vm1, %v458_v1  ;;  %396 = vst.msk [vmem:[%s715_s3 + $0x2c] sm:$0xf] %vm384_vm1, %v466_v2  ;;  %v258_v5 = vadd.f32 %v630_v26, %v257_v3  ;;  %v290_v6 = vadd.f32 %v630_v26, %v289_v4  ;;  %v259_v7 = vpop.f32.mrb[9].mxu0  ;;  %v291_v8 = vpop.f32.mrb[9].mxu1 }
 0x10a   :  { %v260_v9 = vpop.f32.mrb[10].mxu0  ;;  %v292_v10 = vpop.f32.mrb[10].mxu1 }
 0x10b   :  { %v308_v11 = vmax.f32 %v258_v5, 0.0  ;;  %v316_v12 = vmax.f32 %v290_v6, 0.0  ;;  %v261_v13 = vadd.f32 %v630_v26, %v260_v9  ;;  %v293_v14 = vadd.f32 %v630_v26, %v292_v10  ;;  %v262_v15 = vpop.f32.mrb[11].mxu0  ;;  %v294_v16 = vpop.f32.mrb[11].mxu1 }
 0x10d   :  { %v459_v17 = vpack.c.bf16 %v308_v11, %v308_v11  ;;  %v467_v18 = vpack.c.bf16 %v316_v12, %v316_v12  ;;  %v309_v19 = vmax.f32 %v261_v13, 0.0  ;;  %v317_v20 = vmax.f32 %v293_v14, 0.0 }
 0x10f   :  { %389 = vst.msk [vmem:[%s715_s3 + $0x10] sm:$0xf] %vm384_vm1, %v459_v17  ;;  %397 = vst.msk [vmem:[%s715_s3 + $0x30] sm:$0xf] %vm384_vm1, %v467_v18  ;;  %v460_v21 = vpack.c.bf16 %v309_v19, %v309_v19  ;;  %v468_v22 = vpack.c.bf16 %v317_v20, %v317_v20 }
 0x110   :  { %v265_v23 = vpop.f32.mrb[12].mxu0  ;;  %v297_v24 = vpop.f32.mrb[12].mxu1 }
 0x111   :  { %390 = vst.msk [vmem:[%s715_s3 + $0x14] sm:$0xf] %vm384_vm1, %v460_v21  ;;  %398 = vst.msk [vmem:[%s715_s3 + $0x34] sm:$0xf] %vm384_vm1, %v468_v22  ;;  %v266_v25 = vadd.f32 %v630_v26, %v265_v23  ;;  %v298_v27 = vadd.f32 %v630_v26, %v297_v24  ;;  %v267_v28 = vpop.f32.mrb[13].mxu0  ;;  %v299_v29 = vpop.f32.mrb[13].mxu1 }
 0x112   :  { %v268_v30 = vpop.f32.mrb[14].mxu0  ;;  %v300_v31 = vpop.f32.mrb[14].mxu1 }
 0x113   :  { %v310_v32 = vmax.f32 %v266_v25, 0.0  ;;  %v318_v33 = vmax.f32 %v298_v27, 0.0  ;;  %v269_v34 = vadd.f32 %v630_v26, %v268_v30  ;;  %v301_v35 = vadd.f32 %v630_v26, %v300_v31  ;;  %v270_v36 = vpop.f32.mrb[15].mxu0  ;;  %v302_v37 = vpop.f32.mrb[15].mxu1 }
 0x115   :  { %v461_v38 = vpack.c.bf16 %v310_v32, %v310_v32  ;;  %v469_v39 = vpack.c.bf16 %v318_v33, %v318_v33  ;;  %v311_v40 = vmax.f32 %v269_v34, 0.0  ;;  %v319_v41 = vmax.f32 %v301_v35, 0.0 }
 0x117   :  { %391 = vst.msk [vmem:[%s715_s3 + $0x18] sm:$0xf] %vm384_vm1, %v461_v38  ;;  %399 = vst.msk [vmem:[%s715_s3 + $0x38] sm:$0xf] %vm384_vm1, %v469_v39  ;;  %v462_v42 = vpack.c.bf16 %v311_v40, %v311_v40  ;;  %v470_v43 = vpack.c.bf16 %v319_v41, %v319_v41 }
 0x119   :  { %392 = vst.msk [vmem:[%s715_s3 + $0x1c] sm:$0xf] %vm384_vm1, %v462_v42  ;;  %400 = vst.msk [vmem:[%s715_s3 + $0x3c] sm:$0xf] %vm384_vm1, %v470_v43 }

// kernel: autoencoder_forward.12
= control target key start
LH: loop header
LB: loop body
LE: loop exit
PB: predicated region body
PF: predicated region fallthrough
CT: control target
= control target key end

     0   :  { %vm204_vm0 = vcmask 261120   ;;  %vm329_vm1 = vcmask 519168   ;;  %s550_s1 = inlined_call_operand.vmem [shape: bf16[288,64], index: 1, kind: input, shape index: {}]   ;;  %s551_s0 = inlined_call_operand.vmem [shape: bf16[32,288], index: 0, kind: input, shape index: {}]   ;;  %s552_s2 = inlined_call_operand.vmem [shape: f32[1,64], index: 2, kind: input, shape index: {}]   ;;  %s553_s3 = inlined_call_operand.vmem [shape: bf16[32,64], index: 3, kind: output, shape index: {}]  }
   0x1   :  { %v413_v0 = vld [vmem:[%s550_s1 + $0x40] sm:$0xff]   ;;  %v415_v2 = vld [vmem:[%s550_s1 + $0x48] sm:$0xff]   ;;  %v417_v4 = vld [vmem:[%s550_s1 + $0x50] sm:$0xff]  }
   0x2   :  { %v414_v1 = vld [vmem:[%s550_s1] sm:$0xff]   ;;  %373 = vmatprep.subr.bf16.mxu0 %v413_v0  ;;  %v416_v3 = vld [vmem:[%s550_s1 + $0x8] sm:$0xff]   ;;  %v418_v5 = vld [vmem:[%s550_s1 + $0x10] sm:$0xff]  }
   0x3   :  { %374 = vmatpush3.bf16.msra.mxu0 %v414_v1  ;;  %v419_v6 = vld [vmem:[%s550_s1 + $0x58] sm:$0xff]   ;;  %v421_v8 = vld [vmem:[%s550_s1 + $0x60] sm:$0xff]   ;;  %v423_v11 = vld [vmem:[%s550_s1 + $0x68] sm:$0xff]  }
   0x4   :  { %375 = vmatprep.subr.bf16.mxu0 %v415_v2  ;;  %v420_v7 = vld [vmem:[%s550_s1 + $0x18] sm:$0xff]   ;;  %v422_v9 = vld [vmem:[%s550_s1 + $0x20] sm:$0xff]   ;;  %v424_v12 = vld [vmem:[%s550_s1 + $0x28] sm:$0xff]  }
   0x5   :  { %v428_v10 = vld [vmem:[%s550_s1 + $0x80] sm:$0xff]   ;;  %v425_v13 = vld [vmem:[%s550_s1 + $0x70] sm:$0xff]   ;;  %v433_v15 = vld [vmem:[%s550_s1 + $0x88] sm:$0xff]  }
   0x6   :  { %405 = vmatprep.subr.bf16.mxu1 %v428_v10  ;;  %v432_v14 = vld [vmem:[%s551_s0 + $0x4] ss:$12 sps:$4 sm:$0xff]   ;;  %v434_v16 = vld [vmem:[%s551_s0 + $0x8] ss:$12 sps:$4 sm:$0xff]   ;;  %v435_v17 = vld [vmem:[%s551_s0 + $0x20] ss:$12 sps:$4 sm:$0xff]  }
   0x7   :  { %376 = vmatpush3.bf16.msra.mxu0 %v416_v3  ;;  %406 = vmatpush3.bf16.msra.mxu1 %v428_v10  ;;  %v426_v18 = vld [vmem:[%s550_s1 + $0x30] sm:$0xff]   ;;  %v427_v19 = vld [vmem:[%s550_s1 + $0x78] sm:$0xff]   ;;  %v430_v21 = vld [vmem:[%s551_s0] ss:$12 sps:$4 sm:$0xff]  }
   0x8   :  { %377 = vmatprep.subr.bf16.mxu0 %v417_v4  ;;  %243 = vmatprep.mubr.bf16.mxu0 %v432_v14  ;;  %v429_v20 = vld [vmem:[%s550_s1 + $0x38] sm:$0xff]   ;;  %v338_v30 = vld [vmem:[%s552_s2] ss:$0 sm:$0xff] }
   0x9   :  { %407 = vmatprep.subr.bf16.mxu1 %v433_v15  ;;  %409 = vmatprep.mubr.msk.bf16.mxu1 %vm204_vm0, %v434_v16  ;;  %v436_v22 = vld [vmem:[%s551_s0 + $0x1c] ss:$12 sps:$4 sm:$0xff]   ;;  %v438_v23 = vld [vmem:[%s551_s0 + $0x18] ss:$12 sps:$4 sm:$0xff]  }
   0xb   :  { %378 = vmatpush3.bf16.msra.mxu0 %v418_v5  ;;  %408 = vmatpush3.bf16.msra.mxu1 %v433_v15 }
   0xc   :  { %379 = vmatprep.subr.bf16.mxu0 %v419_v6 }
   0xe   :  { %410 = vmatmul.mubr.msk.bf16.vlgmr.msra.gmra.mrb[0].mxu1 %vm204_vm0, %v435_v17 }
   0xf   :  { %380 = vmatpush3.bf16.msra.mxu0 %v420_v7 }
  0x10   :  { %381 = vmatprep.subr.bf16.mxu0 %v421_v8 }
  0x13   :  { %382 = vmatpush3.bf16.msra.mxu0 %v422_v9 }
  0x14   :  { %383 = vmatprep.subr.bf16.mxu0 %v423_v11 }
  0x17   :  { %384 = vmatpush3.bf16.msra.mxu0 %v424_v12 }
  0x18   :  { %385 = vmatprep.subr.bf16.mxu0 %v425_v13 }
  0x1b   :  { %386 = vmatpush3.bf16.msra.mxu0 %v426_v18 }
  0x1c   :  { %387 = vmatprep.subr.bf16.mxu0 %v427_v19 }
  0x1f   :  { %388 = vmatpush3.bf16.msra.mxu0 %v429_v20 }
  0x22   :  { %244 = vmatmul.mubr.bf16.vlgmr.msra.gmra.mrb[0].mxu0 %v430_v21 }
  0x23   :  { %251 = vmatprep.mubr.bf16.mxu0 %v436_v22 }
  0x2a   :  { %252 = vmatmul.mubr.bf16.gmra.mrb[4].mxu0 %v438_v23 }
  0xe1   :  { %v411_v24 = vpop.f32.mrb[0].mxu1 }
  0xe2   :  { %v294_v25 = vpop.f32.mrb[1].mxu1 }
  0xe3   :  { %v412_v26 = vpop.f32.mrb[2].mxu1 }
  0xe4   :  { %v297_v27 = vpop.f32.mrb[3].mxu1 }
  0xf5   :  { %v389_v28 = vpop.f32.mrb[0].mxu0 }
  0xf6   :  { %v390_v29 = vpop.f32.mrb[1].mxu0 }
  0xf7   :  { %v391_v31 = vadd.f32 %v390_v29, %v389_v28  ;;  %v392_v32 = vpop.f32.mrb[2].mxu0 }
  0xf8   :  { %v393_v33 = vpop.f32.mrb[3].mxu0 }
  0xf9   :  { %v394_v34 = vadd.f32 %v393_v33, %v392_v32  ;;  %v246_v35 = vadd.f32 %v391_v31, %v338_v30 }
  0xfb   :  { %v295_v36 = vadd.f32 %v294_v25, %v246_v35  ;;  %v249_v37 = vadd.f32 %v394_v34, %v338_v30 }
  0xfd   :  { %v309_v38 = vmax.f32 %v295_v36, 0.0  ;;  %v298_v39 = vadd.f32 %v297_v27, %v249_v37  ;;  %v395_v40 = vpop.f32.mrb[4].mxu0 }
  0xfe   :  { %v396_v41 = vpop.f32.mrb[5].mxu0 }
  0xff   :  { %v369_v42 = vpack.c.bf16 %v309_v38, %v309_v38  ;;  %v310_v43 = vmax.f32 %v298_v39, 0.0  ;;  %v397_v44 = vadd.f32 %v396_v41, %v395_v40  ;;  %v398_v45 = vpop.f32.mrb[6].mxu0 }
 0x100   :  { %v399_v46 = vpop.f32.mrb[7].mxu0 }
 0x101   :  { %330 = vst.msk [vmem:[%s553_s3] sm:$0xf] %vm329_vm1, %v369_v42  ;;  %v370_v47 = vpack.c.bf16 %v310_v43, %v310_v43  ;;  %v254_v48 = vadd.f32 %v397_v44, %v338_v30  ;;  %v400_v49 = vadd.f32 %v399_v46, %v398_v45 }
 0x103   :  { %331 = vst.msk [vmem:[%s553_s3 + $0x4] sm:$0xf] %vm329_vm1, %v370_v47  ;;  %v303_v50 = vadd.f32 %v411_v24, %v254_v48  ;;  %v257_v51 = vadd.f32 %v400_v49, %v338_v30 }
 0x105   :  { %v311_v52 = vmax.f32 %v303_v50, 0.0  ;;  %v306_v53 = vadd.f32 %v412_v26, %v257_v51 }
 0x107   :  { %v371_v54 = vpack.c.bf16 %v311_v52, %v311_v52  ;;  %v312_v55 = vmax.f32 %v306_v53, 0.0 }
 0x109   :  { %332 = vst.msk [vmem:[%s553_s3 + $0x8] sm:$0xf] %vm329_vm1, %v371_v54  ;;  %v372_v56 = vpack.c.bf16 %v312_v55, %v312_v55 }
 0x10b   :  { %333 = vst.msk [vmem:[%s553_s3 + $0xc] sm:$0xf] %vm329_vm1, %v372_v56 }

// kernel: autoencoder_forward.13
= control target key start
LH: loop header
LB: loop body
LE: loop exit
PB: predicated region body
PF: predicated region fallthrough
CT: control target
= control target key end

     0   :  { %v608_v35 = vmov 0.0   ;;  %vm609_vm0 = vmmov 0   ;;  %vm330_vm1 = vcmask 523264   ;;  %s753_s1 = inlined_call_operand.vmem [shape: bf16[576,128], index: 1, kind: input, shape index: {}]   ;;  %s754_s0 = inlined_call_operand.vmem [shape: bf16[8,576], index: 0, kind: input, shape index: {}]   ;;  %s755_s2 = inlined_call_operand.vmem [shape: f32[1,128], index: 2, kind: input, shape index: {}]   ;;  %s756_s3 = inlined_call_operand.vmem [shape: bf16[8,128], index: 3, kind: output, shape index: {}]  }
   0x1   :  { %v567_v0 = vld [vmem:[%s753_s1 + $0x40] sm:$0xff]   ;;  %v571_v4 = vld [vmem:[%s753_s1 + $0x48] sm:$0xff]   ;;  %v575_v8 = vld [vmem:[%s753_s1 + $0x50] sm:$0xff]  }
   0x2   :  { %v568_v1 = vld [vmem:[%s753_s1] sm:$0xff]   ;;  %504 = vmatprep.subr.bf16.mxu0 %v567_v0  ;;  %v572_v5 = vld [vmem:[%s753_s1 + $0x8] sm:$0xff]   ;;  %v576_v9 = vld [vmem:[%s753_s1 + $0x10] sm:$0xff]  }
   0x3   :  { %v569_v2 = vld [vmem:[%s753_s1 + $0xc0] sm:$0xff]   ;;  %505 = vmatpush3.bf16.msra.mxu0 %v568_v1  ;;  %v573_v6 = vld [vmem:[%s753_s1 + $0xc8] sm:$0xff]   ;;  %v577_v10 = vld [vmem:[%s753_s1 + $0xd0] sm:$0xff]  }
   0x4   :  { %v570_v3 = vld [vmem:[%s753_s1 + $0x80] sm:$0xff]   ;;  %526 = vmatprep.subr.bf16.mxu1 %v569_v2  ;;  %506 = vmatprep.subr.bf16.mxu0 %v571_v4  ;;  %v574_v7 = vld [vmem:[%s753_s1 + $0x88] sm:$0xff]   ;;  %v578_v11 = vld [vmem:[%s753_s1 + $0x90] sm:$0xff]  }
   0x5   :  { %527 = vmatpush3.bf16.msra.mxu1 %v570_v3  ;;  %v579_v12 = vld [vmem:[%s753_s1 + $0x58] sm:$0xff]   ;;  %v583_v16 = vld [vmem:[%s753_s1 + $0x60] sm:$0xff]   ;;  %v587_v20 = vld [vmem:[%s753_s1 + $0x68] sm:$0xff]  }
   0x6   :  { %528 = vmatprep.subr.bf16.mxu1 %v573_v6  ;;  %v580_v13 = vld [vmem:[%s753_s1 + $0x18] sm:$0xff]   ;;  %v584_v17 = vld [vmem:[%s753_s1 + $0x20] sm:$0xff]   ;;  %v588_v21 = vld [vmem:[%s753_s1 + $0x28] sm:$0xff]  }
   0x7   :  { %507 = vmatpush3.bf16.msra.mxu0 %v572_v5  ;;  %v581_v14 = vld [vmem:[%s753_s1 + $0xd8] sm:$0xff]   ;;  %v585_v18 = vld [vmem:[%s753_s1 + $0xe0] sm:$0xff]   ;;  %v589_v22 = vld [vmem:[%s753_s1 + $0xe8] sm:$0xff]  }
   0x8   :  { %508 = vmatprep.subr.bf16.mxu0 %v575_v8  ;;  %v582_v15 = vld [vmem:[%s753_s1 + $0x98] sm:$0xff]   ;;  %v586_v19 = vld [vmem:[%s753_s1 + $0xa0] sm:$0xff]   ;;  %v590_v23 = vld [vmem:[%s753_s1 + $0xa8] sm:$0xff]  }
   0x9   :  { %529 = vmatpush3.bf16.msra.mxu1 %v574_v7  ;;  %v591_v24 = vld [vmem:[%s753_s1 + $0x70] sm:$0xff]   ;;  %v595_v28 = vld [vmem:[%s753_s1 + $0x78] sm:$0xff]   ;;  %v15_v31 = vld [vmem:[%s754_s0] sm:$0xff] }
   0xa   :  { %530 = vmatprep.subr.bf16.mxu1 %v577_v10  ;;  %v592_v25 = vld [vmem:[%s753_s1 + $0x30] sm:$0xff]   ;;  %v596_v29 = vld [vmem:[%s753_s1 + $0x38] sm:$0xff]   ;;  %v462_v32 = vcombine.low %v15_v31, %v15_v31  ;;  %v463_v33 = vcombine.high %v15_v31, %v15_v31  ;;  %v16_v36 = vld [vmem:[%s754_s0 + $0x8] sm:$0xff] }
   0xb   :  { %509 = vmatpush3.bf16.msra.mxu0 %v576_v9  ;;  %v593_v26 = vld [vmem:[%s753_s1 + $0xf0] sm:$0xff]   ;;  %v597_v30 = vld [vmem:[%s753_s1 + $0xf8] sm:$0xff]   ;;  %v464_v37 = vcombine.low %v16_v36, %v16_v36  ;;  %v465_v38 = vcombine.high %v16_v36, %v16_v36  ;;  %v604_v39 = vld [vmem:[%s753_s1 + $0x100] sm:$0xff]  }
   0xc   :  { %510 = vmatprep.subr.bf16.mxu0 %v579_v12  ;;  %v594_v27 = vld [vmem:[%s753_s1 + $0xb0] sm:$0xff]   ;;  %v601_v34 = vld [vmem:[%s753_s1 + $0xb8] sm:$0xff]   ;;  %366 = vmatprep.mubr.bf16.mxu0 %v463_v33  ;;  %v605_v40 = vld [vmem:[%s753_s1 + $0x108] sm:$0xff]  }
   0xd   :  { %531 = vmatpush3.bf16.msra.mxu1 %v578_v11  ;;  %406 = vmatprep.mubr.bf16.mxu1 %v465_v38  ;;  %v606_v41 = vld [vmem:[%s753_s1 + $0x110] sm:$0xff]   ;;  %v607_v42 = vld [vmem:[%s753_s1 + $0x118] sm:$0xff]   ;;  %v461_v45 = vld [vmem:[%s755_s2] ss:$0 sm:$0xff] }
   0xe   :  { %532 = vmatprep.subr.bf16.mxu1 %v581_v14  ;;  %v600_v43 = vld [vmem:[%s754_s0 + $0x10] ss:$0 sps:$4 sm:$0xff]  }
   0xf   :  { %511 = vmatpush3.bf16.msra.mxu0 %v580_v13 }
  0x10   :  { %512 = vmatprep.subr.bf16.mxu0 %v583_v16 }
  0x11   :  { %533 = vmatpush3.bf16.msra.mxu1 %v582_v15 }
  0x12   :  { %534 = vmatprep.subr.bf16.mxu1 %v585_v18 }
  0x13   :  { %513 = vmatpush3.bf16.msra.mxu0 %v584_v17 }
  0x14   :  { %514 = vmatprep.subr.bf16.mxu0 %v587_v20 }
  0x15   :  { %535 = vmatpush3.bf16.msra.mxu1 %v586_v19 }
  0x16   :  { %536 = vmatprep.subr.bf16.mxu1 %v589_v22 }
  0x17   :  { %515 = vmatpush3.bf16.msra.mxu0 %v588_v21 }
  0x18   :  { %516 = vmatprep.subr.bf16.mxu0 %v591_v24 }
  0x19   :  { %537 = vmatpush3.bf16.msra.mxu1 %v590_v23 }
  0x1a   :  { %538 = vmatprep.subr.bf16.mxu1 %v593_v26 }
  0x1b   :  { %517 = vmatpush3.bf16.msra.mxu0 %v592_v25 }
  0x1c   :  { %518 = vmatprep.subr.bf16.mxu0 %v595_v28 }
  0x1d   :  { %539 = vmatpush3.bf16.msra.mxu1 %v594_v27 }
  0x1e   :  { %540 = vmatprep.subr.bf16.mxu1 %v597_v30 }
  0x1f   :  { %519 = vmatpush3.bf16.msra.mxu0 %v596_v29 }
  0x20   :  { %553 = vmatprep.subr.bf16.mxu0 %v608_v35 }
  0x21   :  { %541 = vmatpush3.bf16.msra.mxu1 %v601_v34 }
  0x22   :  { %367 = vmatmul.mubr.bf16.vlgmr.msra.gmra.mrb[0].mxu0 %v462_v32 }
  0x23   :  { %554 = vmatpush3.bf16.msra.mxu0 %v604_v39  ;;  %561 = vmatprep.mubr.msk.bf16.mxu0 %vm609_vm0, %v608_v35 }
  0x24   :  { %407 = vmatmul.mubr.bf16.vlgmr.msra.gmra.mrb[0].mxu1 %v464_v37  ;;  %555 = vmatprep.subr.bf16.mxu0 %v608_v35 }
  0x27   :  { %556 = vmatpush3.bf16.msra.mxu0 %v605_v40 }
  0x28   :  { %557 = vmatprep.subr.bf16.mxu0 %v608_v35 }
  0x2b   :  { %558 = vmatpush3.bf16.msra.mxu0 %v606_v41 }
  0x2c   :  { %559 = vmatprep.subr.bf16.mxu0 %v608_v35 }
  0x2f   :  { %560 = vmatpush3.bf16.msra.mxu0 %v607_v42 }
  0x32   :  { %562 = vmatmul.mubr.msk.bf16.vlgmr.msra.gmra.mrb[4].mxu0 %vm330_vm1, %v600_v43 }
  0xf5   :  { %v520_v44 = vpop.f32.mrb[0].mxu0 }
  0xf6   :  { %v521_v46 = vpop.f32.mrb[1].mxu0 }
  0xf7   :  { %v522_v47 = vadd.f32 %v521_v46, %v520_v44  ;;  %v523_v48 = vpop.f32.mrb[2].mxu0  ;;  %v542_v49 = vpop.f32.mrb[0].mxu1 }
  0xf8   :  { %v524_v50 = vpop.f32.mrb[3].mxu0  ;;  %v543_v51 = vpop.f32.mrb[1].mxu1 }
  0xf9   :  { %v369_v52 = vadd.f32 %v522_v47, %v461_v45  ;;  %v544_v53 = vadd.f32 %v543_v51, %v542_v49  ;;  %v545_v54 = vpop.f32.mrb[2].mxu1 }
  0xfa   :  { %v546_v55 = vpop.f32.mrb[3].mxu1 }
  0xfb   :  { %v409_v56 = vadd.f32 %v544_v53, %v369_v52 }
 0x105   :  { %v448_v57 = vpop.f32.mrb[4].mxu0 }
 0x106   :  { %v449_v58 = vadd.f32 %v448_v57, %v409_v56  ;;  %v563_v59 = vpop.f32.mrb[5].mxu0 }
 0x107   :  { %v451_v60 = vpop.f32.mrb[6].mxu0 }
 0x108   :  { %v454_v61 = vmax.f32 %v449_v58, 0.0  ;;  %v564_v62 = vpop.f32.mrb[7].mxu0 }
 0x10a   :  { %v455_v63 = vpack.c.bf16 %v454_v61, %v454_v61 }
 0x10c   :  { %456 = vst [vmem:[%s756_s3] sm:$0xf] %v455_v63 }

// kernel: autoencoder_forward.14
= control target key start
LH: loop header
LB: loop body
LE: loop exit
PB: predicated region body
PF: predicated region fallthrough
CT: control target
= control target key end

     0   :  { %vm375_vm0 = vcmask 44032   ;;  %s626_s1 = inlined_call_operand.vmem [shape: bf16[512,6], index: 1, kind: input, shape index: {}]   ;;  %s627_s0 = inlined_call_operand.vmem [shape: bf16[8,512], index: 0, kind: input, shape index: {}]   ;;  %s628_s2 = inlined_call_operand.vmem [shape: f32[1,6], index: 2, kind: input, shape index: {}]   ;;  %s629_s3 = inlined_call_operand.vmem [shape: bf16[8,6], index: 3, kind: output, shape index: {}]  }
   0x1   :  { %v462_v0 = vld [vmem:[%s626_s1 + $0x40] sm:$0xff]   ;;  %v466_v4 = vld [vmem:[%s626_s1 + $0x48] sm:$0xff]   ;;  %v470_v8 = vld [vmem:[%s626_s1 + $0x50] sm:$0xff]  }
   0x2   :  { %v463_v1 = vld [vmem:[%s626_s1 + $0xc0] sm:$0xff]   ;;  %418 = vmatprep.subr.bf16.mxu0 %v462_v0  ;;  %v467_v5 = vld [vmem:[%s626_s1 + $0xc8] sm:$0xff]   ;;  %v471_v9 = vld [vmem:[%s626_s1 + $0xd0] sm:$0xff]  }
   0x3   :  { %v464_v2 = vld [vmem:[%s626_s1] sm:$0xff]   ;;  %440 = vmatprep.subr.bf16.mxu1 %v463_v1  ;;  %v468_v6 = vld [vmem:[%s626_s1 + $0x8] sm:$0xff]   ;;  %v472_v10 = vld [vmem:[%s626_s1 + $0x10] sm:$0xff]  }
   0x4   :  { %v465_v3 = vld [vmem:[%s626_s1 + $0x80] sm:$0xff]   ;;  %419 = vmatpush3.bf16.msra.mxu0 %v464_v2  ;;  %v469_v7 = vld [vmem:[%s626_s1 + $0x88] sm:$0xff]   ;;  %v473_v11 = vld [vmem:[%s626_s1 + $0x90] sm:$0xff]  }
   0x5   :  { %441 = vmatpush3.bf16.msra.mxu1 %v465_v3  ;;  %420 = vmatprep.subr.bf16.mxu0 %v466_v4  ;;  %v474_v12 = vld [vmem:[%s626_s1 + $0x58] sm:$0xff]   ;;  %v478_v16 = vld [vmem:[%s626_s1 + $0x60] sm:$0xff]   ;;  %v482_v20 = vld [vmem:[%s626_s1 + $0x68] sm:$0xff]  }
   0x6   :  { %442 = vmatprep.subr.bf16.mxu1 %v467_v5  ;;  %v475_v13 = vld [vmem:[%s626_s1 + $0xd8] sm:$0xff]   ;;  %v479_v17 = vld [vmem:[%s626_s1 + $0xe0] sm:$0xff]   ;;  %v483_v21 = vld [vmem:[%s626_s1 + $0xe8] sm:$0xff]  }
   0x7   :  { %v476_v14 = vld [vmem:[%s626_s1 + $0x18] sm:$0xff]   ;;  %v480_v18 = vld [vmem:[%s626_s1 + $0x20] sm:$0xff]   ;;  %v484_v22 = vld [vmem:[%s626_s1 + $0x28] sm:$0xff]  }
   0x8   :  { %421 = vmatpush3.bf16.msra.mxu0 %v468_v6  ;;  %v477_v15 = vld [vmem:[%s626_s1 + $0x98] sm:$0xff]   ;;  %v481_v19 = vld [vmem:[%s626_s1 + $0xa0] sm:$0xff]   ;;  %v485_v23 = vld [vmem:[%s626_s1 + $0xa8] sm:$0xff]  }
   0x9   :  { %443 = vmatpush3.bf16.msra.mxu1 %v469_v7  ;;  %422 = vmatprep.subr.bf16.mxu0 %v470_v8  ;;  %v486_v24 = vld [vmem:[%s626_s1 + $0x70] sm:$0xff]   ;;  %v490_v28 = vld [vmem:[%s626_s1 + $0x78] sm:$0xff]   ;;  %v15_v32 = vld [vmem:[%s627_s0] sm:$0xff] }
   0xa   :  { %444 = vmatprep.subr.bf16.mxu1 %v471_v9  ;;  %v487_v25 = vld [vmem:[%s626_s1 + $0xf0] sm:$0xff]   ;;  %v491_v29 = vld [vmem:[%s626_s1 + $0xf8] sm:$0xff]   ;;  %v16_v33 = vld [vmem:[%s627_s0 + $0x8] sm:$0xff]  ;;  %v382_v34 = vcombine.low %v15_v32, %v15_v32  ;;  %v383_v35 = vcombine.high %v15_v32, %v15_v32 }
   0xb   :  { %v488_v26 = vld [vmem:[%s626_s1 + $0x30] sm:$0xff]   ;;  %v492_v30 = vld [vmem:[%s626_s1 + $0x38] sm:$0xff]   ;;  %v384_v36 = vcombine.low %v16_v33, %v16_v33  ;;  %v385_v37 = vcombine.high %v16_v33, %v16_v33  ;;  %v381_v40 = vld [vmem:[%s628_s2] ss:$0 sm:$0xff] }
   0xc   :  { %423 = vmatpush3.bf16.msra.mxu0 %v472_v10  ;;  %v489_v27 = vld [vmem:[%s626_s1 + $0xb0] sm:$0xff]   ;;  %v493_v31 = vld [vmem:[%s626_s1 + $0xb8] sm:$0xff]   ;;  %326 = vmatprep.mubr.bf16.mxu0 %v383_v35 }
   0xd   :  { %445 = vmatpush3.bf16.msra.mxu1 %v473_v11  ;;  %424 = vmatprep.subr.bf16.mxu0 %v474_v12 }
   0xe   :  { %446 = vmatprep.subr.bf16.mxu1 %v475_v13  ;;  %366 = vmatprep.mubr.bf16.mxu1 %v385_v37 }
  0x10   :  { %425 = vmatpush3.bf16.msra.mxu0 %v476_v14 }
  0x11   :  { %447 = vmatpush3.bf16.msra.mxu1 %v477_v15  ;;  %426 = vmatprep.subr.bf16.mxu0 %v478_v16 }
  0x12   :  { %448 = vmatprep.subr.bf16.mxu1 %v479_v17 }
  0x14   :  { %427 = vmatpush3.bf16.msra.mxu0 %v480_v18 }
  0x15   :  { %449 = vmatpush3.bf16.msra.mxu1 %v481_v19  ;;  %428 = vmatprep.subr.bf16.mxu0 %v482_v20 }
  0x16   :  { %450 = vmatprep.subr.bf16.mxu1 %v483_v21 }
  0x18   :  { %429 = vmatpush3.bf16.msra.mxu0 %v484_v22 }
  0x19   :  { %451 = vmatpush3.bf16.msra.mxu1 %v485_v23  ;;  %430 = vmatprep.subr.bf16.mxu0 %v486_v24 }
  0x1a   :  { %452 = vmatprep.subr.bf16.mxu1 %v487_v25 }
  0x1c   :  { %431 = vmatpush3.bf16.msra.mxu0 %v488_v26 }
  0x1d   :  { %453 = vmatpush3.bf16.msra.mxu1 %v489_v27  ;;  %432 = vmatprep.subr.bf16.mxu0 %v490_v28 }
  0x1e   :  { %454 = vmatprep.subr.bf16.mxu1 %v491_v29 }
  0x20   :  { %433 = vmatpush3.bf16.msra.mxu0 %v492_v30 }
  0x21   :  { %455 = vmatpush3.bf16.msra.mxu1 %v493_v31 }
  0x23   :  { %327 = vmatmul.mubr.bf16.vlgmr.msra.gmra.mrb[0].mxu0 %v382_v34 }
  0x24   :  { %367 = vmatmul.mubr.bf16.vlgmr.msra.gmra.mrb[0].mxu1 %v384_v36 }
  0xf6   :  { %v434_v38 = vpop.f32.mrb[0].mxu0 }
  0xf7   :  { %v456_v39 = vpop.f32.mrb[0].mxu1  ;;  %v435_v41 = vpop.f32.mrb[1].mxu0 }
  0xf8   :  { %v457_v42 = vpop.f32.mrb[1].mxu1  ;;  %v436_v43 = vadd.f32 %v435_v41, %v434_v38  ;;  %v437_v45 = vpop.f32.mrb[2].mxu0 }
  0xf9   :  { %v458_v44 = vadd.f32 %v457_v42, %v456_v39  ;;  %v459_v46 = vpop.f32.mrb[2].mxu1  ;;  %v438_v47 = vpop.f32.mrb[3].mxu0 }
  0xfa   :  { %v460_v48 = vpop.f32.mrb[3].mxu1  ;;  %v329_v49 = vadd.f32 %v436_v43, %v381_v40 }
  0xfc   :  { %v369_v50 = vadd.f32 %v458_v44, %v329_v49 }
  0xfe   :  { %v374_v51 = vpack.c.bf16 %v369_v50, %v369_v50 }
 0x100   :  { %376 = vst.msk [vmem:[%s629_s3] sm:$0xf] %vm375_vm0, %v374_v51 }

// kernel: autoencoder_forward.15
= control target key start
LH: loop header
LB: loop body
LE: loop exit
PB: predicated region body
PF: predicated region fallthrough
CT: control target
= control target key end

     0   :  { %vm54_vm0 = vcmask 1042432   ;;  %v188_v2 = vmov 0   ;;  %vm50_vm1 = vcmask 48128   ;;  %v20_v10 = vlaneseq  ;;  %s227_s1 = inlined_call_operand.vmem [shape: bf16[6,512], index: 1, kind: input, shape index: {}]   ;;  %s228_s0 = inlined_call_operand.vmem [shape: bf16[8,6], index: 0, kind: input, shape index: {}]   ;;  %s229_s2 = inlined_call_operand.vmem [shape: f32[1,512], index: 2, kind: input, shape index: {}]   ;;  %s230_s3 = inlined_call_operand.vmem [shape: bf16[8,512], index: 3, kind: output, shape index: {}]  }
   0x1   :  { %v16_v0 = vld [vmem:[%s227_s1] sm:$0x77]  ;;  %v17_v1 = vld [vmem:[%s227_s1 + $0x8] sm:$0x77]  ;;  %99 = vmatprep.mubr.bf16.mxu0 %v188_v2  ;;  %140 = vmatprep.mubr.bf16.mxu1 %v188_v2 }
   0x2   :  { %v172_v3 = vcombine.high %v16_v0, %v16_v0  ;;  %v174_v4 = vcombine.high %v17_v1, %v17_v1  ;;  %v171_v5 = vcombine.low %v16_v0, %v16_v0  ;;  %v173_v6 = vcombine.low %v17_v1, %v17_v1  ;;  %v15_v9 = vld [vmem:[%s228_s0] sm:$0xf] }
   0x3   :  { %v21_v11 = vshrl.u32 %v20_v10, 7  ;;  %v18_v14 = vld [vmem:[%s229_s2] sm:$0xf] }
   0x4   :  { %175 = vmatprep.subr.msk.bf16.mxu0 %vm54_vm0, %v172_v3  ;;  %177 = vmatprep.subr.msk.bf16.mxu1 %vm54_vm0, %v174_v4  ;;  %v56_v7 = vsel %vm54_vm0, %v171_v5, 0  ;;  %v62_v8 = vsel %vm54_vm0, %v173_v6, 0 }
   0x5   :  { %68 = vmatpush1.bf16.msra.mxu0 %v56_v7  ;;  %109 = vmatpush1.bf16.msra.mxu1 %v62_v8  ;;  %v22_v12 = vsub.s32 0, %v21_v11  ;;  %v30_v13 = vsub.s32 2, %v21_v11  ;;  %v26_v15 = vsub.s32 1, %v21_v11  ;;  %v34_v16 = vsub.s32 3, %v21_v11 }
   0x7   :  { %v23_v17 = vrot.slane %v18_v14, %v22_v12  ;;  %v31_v18 = vrot.slane %v18_v14, %v30_v13  ;;  %v27_v19 = vrot.slane %v18_v14, %v26_v15  ;;  %v35_v20 = vrot.slane %v18_v14, %v34_v16 }
   0x8   :  { %176 = vmatmul.mubr.msk.bf16.vlgmr.msra.gmra.mrb[0].mxu0 %vm50_vm1, %v15_v9  ;;  %178 = vmatmul.mubr.msk.bf16.vlgmr.msra.gmra.mrb[0].mxu1 %vm50_vm1, %v15_v9 }
  0xdb   :  { %v101_v21 = vpop.f32.mrb[0].mxu0  ;;  %v142_v22 = vpop.f32.mrb[0].mxu1 }
  0xdc   :  { %v102_v23 = vadd.f32 %v101_v21, %v23_v17  ;;  %v143_v24 = vadd.f32 %v142_v22, %v31_v18  ;;  %v103_v25 = vpop.f32.mrb[1].mxu0  ;;  %v144_v26 = vpop.f32.mrb[1].mxu1 }
  0xdd   :  { %v104_v27 = vadd.f32 %v103_v25, %v27_v19  ;;  %v145_v28 = vadd.f32 %v144_v26, %v35_v20  ;;  %v105_v29 = vpop.f32.mrb[2].mxu0  ;;  %v146_v30 = vpop.f32.mrb[2].mxu1 }
  0xde   :  { %v106_v31 = vpop.f32.mrb[3].mxu0  ;;  %v147_v32 = vpop.f32.mrb[3].mxu1 }
  0xdf   :  { %v181_v33 = vpack.c.bf16 %v104_v27, %v102_v23  ;;  %v182_v34 = vpack.c.bf16 %v145_v28, %v143_v24 }
  0xe1   :  { %165 = vst [vmem:[%s230_s3] sm:$0xff] %v181_v33  ;;  %166 = vst [vmem:[%s230_s3 + $0x8] sm:$0xff] %v182_v34 }

// kernel: autoencoder_forward.16
= control target key start
LH: loop header
LB: loop body
LE: loop exit
PB: predicated region body
PF: predicated region fallthrough
CT: control target
= control target key end

     0   :  { %s921_s1 = inlined_call_operand.vmem [shape: bf16[512,256], index: 1, kind: input, shape index: {}]   ;;  %s922_s0 = inlined_call_operand.vmem [shape: bf16[8,512], index: 0, kind: input, shape index: {}]   ;;  %s923_s2 = inlined_call_operand.vmem [shape: f32[1,256], index: 2, kind: input, shape index: {}]   ;;  %s924_s3 = inlined_call_operand.vmem [shape: bf16[8,256], index: 3, kind: output, shape index: {}]  }
   0x1   :  { %v597_v0 = vld [vmem:[%s921_s1 + $0x4] ss:$8 sps:$4 sm:$0xff]   ;;  %v601_v2 = vld [vmem:[%s921_s1] ss:$8 sps:$4 sm:$0xff]   ;;  %v603_v4 = vld [vmem:[%s921_s1 + $0x14] ss:$8 sps:$4 sm:$0xff]  }
   0x2   :  { %v599_v1 = vld [vmem:[%s921_s1 + $0x104] ss:$8 sps:$4 sm:$0xff]   ;;  %426 = vmatprep.subr.bf16.mxu1 %v597_v0  ;;  %v602_v3 = vld [vmem:[%s921_s1 + $0x100] ss:$8 sps:$4 sm:$0xff]   ;;  %v605_v5 = vld [vmem:[%s921_s1 + $0x114] ss:$8 sps:$4 sm:$0xff]  }
   0x3   :  { %467 = vmatprep.subr.bf16.mxu0 %v599_v1  ;;  %427 = vmatpush1.bf16.msra.mxu1 %v601_v2  ;;  %v607_v6 = vld [vmem:[%s921_s1 + $0x10] ss:$8 sps:$4 sm:$0xff]   ;;  %v609_v8 = vld [vmem:[%s921_s1 + $0x24] ss:$8 sps:$4 sm:$0xff]   ;;  %v613_v10 = vld [vmem:[%s921_s1 + $0x20] ss:$8 sps:$4 sm:$0xff]  }
   0x4   :  { %468 = vmatpush1.bf16.msra.mxu0 %v602_v3  ;;  %428 = vmatprep.subr.bf16.mxu1 %v603_v4  ;;  %v608_v7 = vld [vmem:[%s921_s1 + $0x110] ss:$8 sps:$4 sm:$0xff]   ;;  %v611_v9 = vld [vmem:[%s921_s1 + $0x124] ss:$8 sps:$4 sm:$0xff]   ;;  %v614_v11 = vld [vmem:[%s921_s1 + $0x120] ss:$8 sps:$4 sm:$0xff]  }
   0x5   :  { %469 = vmatprep.subr.bf16.mxu0 %v605_v5  ;;  %v615_v12 = vld [vmem:[%s921_s1 + $0x34] ss:$8 sps:$4 sm:$0xff]   ;;  %v619_v14 = vld [vmem:[%s921_s1 + $0x30] ss:$8 sps:$4 sm:$0xff]   ;;  %v621_v16 = vld [vmem:[%s921_s1 + $0x44] ss:$8 sps:$4 sm:$0xff]  }
   0x6   :  { %v617_v13 = vld [vmem:[%s921_s1 + $0x134] ss:$8 sps:$4 sm:$0xff]   ;;  %v620_v15 = vld [vmem:[%s921_s1 + $0x130] ss:$8 sps:$4 sm:$0xff]   ;;  %v623_v17 = vld [vmem:[%s921_s1 + $0x144] ss:$8 sps:$4 sm:$0xff]  }
   0x7   :  { %429 = vmatpush1.bf16.msra.mxu1 %v607_v6  ;;  %v625_v18 = vld [vmem:[%s921_s1 + $0x40] ss:$8 sps:$4 sm:$0xff]   ;;  %v627_v20 = vld [vmem:[%s921_s1 + $0x54] ss:$8 sps:$4 sm:$0xff]   ;;  %v631_v22 = vld [vmem:[%s921_s1 + $0x50] ss:$8 sps:$4 sm:$0xff]   ;;  %v82_v6 = vlaneseq }
   0x8   :  { %470 = vmatpush1.bf16.msra.mxu0 %v608_v7  ;;  %430 = vmatprep.subr.bf16.mxu1 %v609_v8  ;;  %v626_v19 = vld [vmem:[%s921_s1 + $0x140] ss:$8 sps:$4 sm:$0xff]   ;;  %v629_v21 = vld [vmem:[%s921_s1 + $0x154] ss:$8 sps:$4 sm:$0xff]   ;;  %v632_v23 = vld [vmem:[%s921_s1 + $0x150] ss:$8 sps:$4 sm:$0xff]  }
   0x9   :  { %471 = vmatprep.subr.bf16.mxu0 %v611_v9  ;;  %v633_v24 = vld [vmem:[%s921_s1 + $0x64] ss:$8 sps:$4 sm:$0xff]   ;;  %v637_v26 = vld [vmem:[%s921_s1 + $0x60] ss:$8 sps:$4 sm:$0xff]   ;;  %v639_v28 = vld [vmem:[%s921_s1 + $0x74] ss:$8 sps:$4 sm:$0xff]  }
   0xa   :  { %v635_v25 = vld [vmem:[%s921_s1 + $0x164] ss:$8 sps:$4 sm:$0xff]   ;;  %v638_v27 = vld [vmem:[%s921_s1 + $0x160] ss:$8 sps:$4 sm:$0xff]   ;;  %v641_v29 = vld [vmem:[%s921_s1 + $0x174] ss:$8 sps:$4 sm:$0xff]  }
   0xb   :  { %431 = vmatpush1.bf16.msra.mxu1 %v613_v10  ;;  %v643_v30 = vld [vmem:[%s921_s1 + $0x70] ss:$8 sps:$4 sm:$0xff]   ;;  %v645_v32 = vld [vmem:[%s921_s1 + $0x84] ss:$8 sps:$4 sm:$0xff]   ;;  %v649_v34 = vld [vmem:[%s921_s1 + $0x80] ss:$8 sps:$4 sm:$0xff]  }
   0xc   :  { %472 = vmatpush1.bf16.msra.mxu0 %v614_v11  ;;  %432 = vmatprep.subr.bf16.mxu1 %v615_v12  ;;  %v644_v31 = vld [vmem:[%s921_s1 + $0x170] ss:$8 sps:$4 sm:$0xff]   ;;  %v647_v33 = vld [vmem:[%s921_s1 + $0x184] ss:$8 sps:$4 sm:$0xff]   ;;  %v650_v35 = vld [vmem:[%s921_s1 + $0x180] ss:$8 sps:$4 sm:$0xff]  }
   0xd   :  { %473 = vmatprep.subr.bf16.mxu0 %v617_v13  ;;  %v651_v36 = vld [vmem:[%s921_s1 + $0x94] ss:$8 sps:$4 sm:$0xff]   ;;  %v655_v38 = vld [vmem:[%s921_s1 + $0x90] ss:$8 sps:$4 sm:$0xff]   ;;  %v657_v40 = vld [vmem:[%s921_s1 + $0xa4] ss:$8 sps:$4 sm:$0xff]  }
   0xe   :  { %v653_v37 = vld [vmem:[%s921_s1 + $0x194] ss:$8 sps:$4 sm:$0xff]   ;;  %v656_v39 = vld [vmem:[%s921_s1 + $0x190] ss:$8 sps:$4 sm:$0xff]   ;;  %v659_v41 = vld [vmem:[%s921_s1 + $0x1a4] ss:$8 sps:$4 sm:$0xff]  }
   0xf   :  { %433 = vmatpush1.bf16.msra.mxu1 %v619_v14  ;;  %v661_v42 = vld [vmem:[%s921_s1 + $0xa0] ss:$8 sps:$4 sm:$0xff]   ;;  %v663_v44 = vld [vmem:[%s921_s1 + $0xb4] ss:$8 sps:$4 sm:$0xff]   ;;  %v667_v49 = vld [vmem:[%s921_s1 + $0xb0] ss:$8 sps:$4 sm:$0xff]  }
  0x10   :  { %474 = vmatpush1.bf16.msra.mxu0 %v620_v15  ;;  %434 = vmatprep.subr.bf16.mxu1 %v621_v16  ;;  %v662_v43 = vld [vmem:[%s921_s1 + $0x1a0] ss:$8 sps:$4 sm:$0xff]   ;;  %v665_v45 = vld [vmem:[%s921_s1 + $0x1b4] ss:$8 sps:$4 sm:$0xff]   ;;  %v668_v50 = vld [vmem:[%s921_s1 + $0x1b0] ss:$8 sps:$4 sm:$0xff]  }
  0x11   :  { %475 = vmatprep.subr.bf16.mxu0 %v623_v17  ;;  %v14_v46 = vld [vmem:[%s922_s0] sm:$0xff]  ;;  %v15_v48 = vld [vmem:[%s922_s0 + $0x8] sm:$0xff]  ;;  %v675_v56 = vld [vmem:[%s921_s1 + $0xd4] ss:$8 sps:$4 sm:$0xff]   ;;  %v83_v7 = vshrl.u32 %v82_v6, 7 }
  0x12   :  { %v524_v47 = vcombine.high %v14_v46, %v14_v46  ;;  %v526_v51 = vcombine.high %v15_v48, %v15_v48  ;;  %v669_v52 = vld [vmem:[%s921_s1 + $0xc4] ss:$8 sps:$4 sm:$0xff]   ;;  %v673_v54 = vld [vmem:[%s921_s1 + $0xc0] ss:$8 sps:$4 sm:$0xff]   ;;  %v677_v57 = vld [vmem:[%s921_s1 + $0x1d4] ss:$8 sps:$4 sm:$0xff]   ;;  %v523_v4 = vcombine.low %v14_v46, %v14_v46  ;;  %v525_v5 = vcombine.low %v15_v48, %v15_v48 }
  0x13   :  { %435 = vmatpush1.bf16.msra.mxu1 %v625_v18  ;;  %v671_v53 = vld [vmem:[%s921_s1 + $0x1c4] ss:$8 sps:$4 sm:$0xff]   ;;  %v674_v55 = vld [vmem:[%s921_s1 + $0x1c0] ss:$8 sps:$4 sm:$0xff]   ;;  %v679_v58 = vld [vmem:[%s921_s1 + $0xd0] ss:$8 sps:$4 sm:$0xff]  }
  0x14   :  { %476 = vmatpush1.bf16.msra.mxu0 %v626_v19  ;;  %436 = vmatprep.subr.bf16.mxu1 %v627_v20  ;;  %v680_v59 = vld [vmem:[%s921_s1 + $0x1d0] ss:$8 sps:$4 sm:$0xff]   ;;  %v681_v60 = vld [vmem:[%s921_s1 + $0xe4] ss:$8 sps:$4 sm:$0xff]   ;;  %v685_v62 = vld [vmem:[%s921_s1 + $0xe0] ss:$8 sps:$4 sm:$0xff]  }
  0x15   :  { %477 = vmatprep.subr.bf16.mxu0 %v629_v21  ;;  %458 = vmatprep.mubr.bf16.mxu1 %v524_v47  ;;  %v683_v61 = vld [vmem:[%s921_s1 + $0x1e4] ss:$8 sps:$4 sm:$0xff]   ;;  %v686_v63 = vld [vmem:[%s921_s1 + $0x1e0] ss:$8 sps:$4 sm:$0xff]   ;;  %v687_v0 = vld [vmem:[%s921_s1 + $0xf4] ss:$8 sps:$4 sm:$0xff]  }
  0x16   :  { %499 = vmatprep.mubr.bf16.mxu0 %v526_v51  ;;  %v689_v1 = vld [vmem:[%s921_s1 + $0x1f4] ss:$8 sps:$4 sm:$0xff]   ;;  %v691_v2 = vld [vmem:[%s921_s1 + $0xf0] ss:$8 sps:$4 sm:$0xff]   ;;  %v84_v8 = vsub.s32 0, %v83_v7  ;;  %v88_v10 = vsub.s32 1, %v83_v7 }
  0x17   :  { %437 = vmatpush1.bf16.msra.mxu1 %v631_v22  ;;  %v692_v3 = vld [vmem:[%s921_s1 + $0x1f0] ss:$8 sps:$4 sm:$0xff]   ;;  %v80_v9 = vld [vmem:[%s923_s2] sm:$0x3] }
  0x18   :  { %478 = vmatpush1.bf16.msra.mxu0 %v632_v23  ;;  %438 = vmatprep.subr.bf16.mxu1 %v633_v24  ;;  %v85_v11 = vrot.slane %v80_v9, %v84_v8  ;;  %v89_v12 = vrot.slane %v80_v9, %v88_v10 }
  0x19   :  { %479 = vmatprep.subr.bf16.mxu0 %v635_v25 }
  0x1b   :  { %439 = vmatpush1.bf16.msra.mxu1 %v637_v26 }
  0x1c   :  { %480 = vmatpush1.bf16.msra.mxu0 %v638_v27  ;;  %440 = vmatprep.subr.bf16.mxu1 %v639_v28 }
  0x1d   :  { %481 = vmatprep.subr.bf16.mxu0 %v641_v29 }
  0x1f   :  { %441 = vmatpush1.bf16.msra.mxu1 %v643_v30 }
  0x20   :  { %482 = vmatpush1.bf16.msra.mxu0 %v644_v31  ;;  %442 = vmatprep.subr.bf16.mxu1 %v645_v32 }
  0x21   :  { %483 = vmatprep.subr.bf16.mxu0 %v647_v33 }
  0x23   :  { %443 = vmatpush1.bf16.msra.mxu1 %v649_v34 }
  0x24   :  { %484 = vmatpush1.bf16.msra.mxu0 %v650_v35  ;;  %444 = vmatprep.subr.bf16.mxu1 %v651_v36 }
  0x25   :  { %485 = vmatprep.subr.bf16.mxu0 %v653_v37 }
  0x27   :  { %445 = vmatpush1.bf16.msra.mxu1 %v655_v38 }
  0x28   :  { %486 = vmatpush1.bf16.msra.mxu0 %v656_v39  ;;  %446 = vmatprep.subr.bf16.mxu1 %v657_v40 }
  0x29   :  { %487 = vmatprep.subr.bf16.mxu0 %v659_v41 }
  0x2b   :  { %447 = vmatpush1.bf16.msra.mxu1 %v661_v42 }
  0x2c   :  { %488 = vmatpush1.bf16.msra.mxu0 %v662_v43  ;;  %448 = vmatprep.subr.bf16.mxu1 %v663_v44 }
  0x2d   :  { %489 = vmatprep.subr.bf16.mxu0 %v665_v45 }
  0x2f   :  { %449 = vmatpush1.bf16.msra.mxu1 %v667_v49 }
  0x30   :  { %490 = vmatpush1.bf16.msra.mxu0 %v668_v50  ;;  %450 = vmatprep.subr.bf16.mxu1 %v669_v52 }
  0x31   :  { %491 = vmatprep.subr.bf16.mxu0 %v671_v53 }
  0x33   :  { %451 = vmatpush1.bf16.msra.mxu1 %v673_v54 }
  0x34   :  { %492 = vmatpush1.bf16.msra.mxu0 %v674_v55  ;;  %452 = vmatprep.subr.bf16.mxu1 %v675_v56 }
  0x35   :  { %493 = vmatprep.subr.bf16.mxu0 %v677_v57 }
  0x37   :  { %453 = vmatpush1.bf16.msra.mxu1 %v679_v58 }
  0x38   :  { %494 = vmatpush1.bf16.msra.mxu0 %v680_v59  ;;  %454 = vmatprep.subr.bf16.mxu1 %v681_v60 }
  0x39   :  { %495 = vmatprep.subr.bf16.mxu0 %v683_v61 }
  0x3b   :  { %455 = vmatpush1.bf16.msra.mxu1 %v685_v62 }
  0x3c   :  { %496 = vmatpush1.bf16.msra.mxu0 %v686_v63  ;;  %456 = vmatprep.subr.bf16.mxu1 %v687_v0 }
  0x3d   :  { %497 = vmatprep.subr.bf16.mxu0 %v689_v1 }
  0x3f   :  { %457 = vmatpush1.bf16.msra.mxu1 %v691_v2 }
  0x40   :  { %498 = vmatpush1.bf16.msra.mxu0 %v692_v3 }
  0x42   :  { %459 = vmatmul.mubr.bf16.vlgmr.msra.gmra.mrb[0].mxu1 %v523_v4 }
  0x43   :  { %500 = vmatmul.mubr.bf16.vlgmr.msra.gmra.mrb[0].mxu0 %v525_v5 }
 0x115   :  { %v460_v13 = vpop.f32.mrb[0].mxu1 }
 0x116   :  { %v501_v14 = vpop.f32.mrb[0].mxu0  ;;  %v461_v15 = vadd.f32 %v460_v13, %v85_v11  ;;  %v462_v16 = vpop.f32.mrb[1].mxu1 }
 0x117   :  { %v503_v17 = vpop.f32.mrb[1].mxu0  ;;  %v463_v18 = vadd.f32 %v462_v16, %v89_v12  ;;  %v464_v19 = vpop.f32.mrb[2].mxu1 }
 0x118   :  { %v505_v20 = vpop.f32.mrb[2].mxu0  ;;  %v502_v21 = vadd.f32 %v501_v14, %v461_v15  ;;  %v465_v22 = vpop.f32.mrb[3].mxu1 }
 0x119   :  { %v506_v23 = vpop.f32.mrb[3].mxu0  ;;  %v504_v24 = vadd.f32 %v503_v17, %v463_v18 }
 0x11a   :  { %v508_v25 = vmax.f32 %v502_v21, 0.0 }
 0x11b   :  { %v509_v26 = vmax.f32 %v504_v24, 0.0 }
 0x11d   :  { %v592_v27 = vpack.c.bf16 %v509_v26, %v508_v25 }
 0x11f   :  { %518 = vst [vmem:[%s924_s3] sm:$0xff] %v592_v27 }

// kernel: autoencoder_forward.17
= control target key start
LH: loop header
LB: loop body
LE: loop exit
PB: predicated region body
PF: predicated region fallthrough
CT: control target
= control target key end

     0   :  { %s446_s1 = inlined_call_operand.vmem [shape: bf16[256,128], index: 1, kind: input, shape index: {}]   ;;  %s447_s0 = inlined_call_operand.vmem [shape: bf16[32,256], index: 0, kind: input, shape index: {}]   ;;  %s448_s2 = inlined_call_operand.vmem [shape: f32[1,128], index: 2, kind: input, shape index: {}]   ;;  %s449_s3 = inlined_call_operand.vmem [shape: bf16[32,128], index: 3, kind: output, shape index: {}]  }
   0x1   :  { %v335_v0 = vld [vmem:[%s446_s1 + $0x40] sm:$0xff]   ;;  %v337_v2 = vld [vmem:[%s446_s1 + $0x48] sm:$0xff]   ;;  %v339_v4 = vld [vmem:[%s446_s1 + $0x50] sm:$0xff]  }
   0x2   :  { %v336_v1 = vld [vmem:[%s446_s1] sm:$0xff]   ;;  %291 = vmatprep.subr.bf16.mxu0 %v335_v0  ;;  %319 = vmatprep.subr.bf16.mxu1 %v335_v0  ;;  %v338_v3 = vld [vmem:[%s446_s1 + $0x8] sm:$0xff]   ;;  %v340_v5 = vld [vmem:[%s446_s1 + $0x10] sm:$0xff]  }
   0x3   :  { %292 = vmatpush3.bf16.msra.mxu0 %v336_v1  ;;  %327 = vmatpush3.bf16.msra.mxu1 %v336_v1  ;;  %v341_v6 = vld [vmem:[%s446_s1 + $0x58] sm:$0xff]   ;;  %v343_v8 = vld [vmem:[%s446_s1 + $0x60] sm:$0xff]   ;;  %v345_v10 = vld [vmem:[%s446_s1 + $0x68] sm:$0xff]  }
   0x4   :  { %293 = vmatprep.subr.bf16.mxu0 %v337_v2  ;;  %320 = vmatprep.subr.bf16.mxu1 %v337_v2  ;;  %v342_v7 = vld [vmem:[%s446_s1 + $0x18] sm:$0xff]   ;;  %v344_v9 = vld [vmem:[%s446_s1 + $0x20] sm:$0xff]   ;;  %v346_v13 = vld [vmem:[%s446_s1 + $0x28] sm:$0xff]  }
   0x5   :  { %v353_v11 = vld [vmem:[%s447_s0 + $0x4] ss:$8 sps:$4 sm:$0xff]   ;;  %v356_v12 = vld [vmem:[%s447_s0 + $0x14] ss:$8 sps:$4 sm:$0xff]   ;;  %v351_v18 = vld [vmem:[%s447_s0] ss:$8 sps:$4 sm:$0xff]  }
   0x6   :  { %v347_v14 = vld [vmem:[%s446_s1 + $0x70] sm:$0xff]   ;;  %206 = vmatprep.mubr.bf16.mxu0 %v353_v11  ;;  %214 = vmatprep.mubr.bf16.mxu1 %v356_v12  ;;  %v349_v16 = vld [vmem:[%s446_s1 + $0x78] sm:$0xff]   ;;  %v251_v22 = vld [vmem:[%s448_s2] ss:$0 sm:$0xff] }
   0x7   :  { %294 = vmatpush3.bf16.msra.mxu0 %v338_v3  ;;  %328 = vmatpush3.bf16.msra.mxu1 %v338_v3  ;;  %v348_v15 = vld [vmem:[%s446_s1 + $0x30] sm:$0xff]   ;;  %v350_v17 = vld [vmem:[%s446_s1 + $0x38] sm:$0xff]  }
   0x8   :  { %295 = vmatprep.subr.bf16.mxu0 %v339_v4  ;;  %321 = vmatprep.subr.bf16.mxu1 %v339_v4  ;;  %v354_v19 = vld [vmem:[%s447_s0 + $0x10] ss:$8 sps:$4 sm:$0xff]  }
   0xb   :  { %296 = vmatpush3.bf16.msra.mxu0 %v340_v5  ;;  %329 = vmatpush3.bf16.msra.mxu1 %v340_v5 }
   0xc   :  { %297 = vmatprep.subr.bf16.mxu0 %v341_v6  ;;  %322 = vmatprep.subr.bf16.mxu1 %v341_v6 }
   0xf   :  { %298 = vmatpush3.bf16.msra.mxu0 %v342_v7  ;;  %330 = vmatpush3.bf16.msra.mxu1 %v342_v7 }
  0x10   :  { %299 = vmatprep.subr.bf16.mxu0 %v343_v8  ;;  %323 = vmatprep.subr.bf16.mxu1 %v343_v8 }
  0x13   :  { %300 = vmatpush3.bf16.msra.mxu0 %v344_v9  ;;  %331 = vmatpush3.bf16.msra.mxu1 %v344_v9 }
  0x14   :  { %301 = vmatprep.subr.bf16.mxu0 %v345_v10  ;;  %324 = vmatprep.subr.bf16.mxu1 %v345_v10 }
  0x17   :  { %302 = vmatpush3.bf16.msra.mxu0 %v346_v13  ;;  %332 = vmatpush3.bf16.msra.mxu1 %v346_v13 }
  0x18   :  { %303 = vmatprep.subr.bf16.mxu0 %v347_v14  ;;  %325 = vmatprep.subr.bf16.mxu1 %v347_v14 }
  0x1b   :  { %304 = vmatpush3.bf16.msra.mxu0 %v348_v15  ;;  %333 = vmatpush3.bf16.msra.mxu1 %v348_v15 }
  0x1c   :  { %305 = vmatprep.subr.bf16.mxu0 %v349_v16  ;;  %326 = vmatprep.subr.bf16.mxu1 %v349_v16 }
  0x1f   :  { %306 = vmatpush3.bf16.msra.mxu0 %v350_v17  ;;  %334 = vmatpush3.bf16.msra.mxu1 %v350_v17 }
  0x22   :  { %207 = vmatmul.mubr.bf16.vlgmr.msra.gmra.mrb[0].mxu0 %v351_v18  ;;  %215 = vmatmul.mubr.bf16.vlgmr.msra.gmra.mrb[0].mxu1 %v354_v19 }
  0xf5   :  { %v307_v20 = vpop.f32.mrb[0].mxu0  ;;  %v313_v21 = vpop.f32.mrb[0].mxu1 }
  0xf6   :  { %v308_v23 = vpop.f32.mrb[1].mxu0  ;;  %v314_v24 = vpop.f32.mrb[1].mxu1 }
  0xf7   :  { %v309_v25 = vadd.f32 %v308_v23, %v307_v20  ;;  %v315_v26 = vadd.f32 %v314_v24, %v313_v21  ;;  %v310_v27 = vpop.f32.mrb[2].mxu0  ;;  %v316_v28 = vpop.f32.mrb[2].mxu1 }
  0xf8   :  { %v311_v29 = vpop.f32.mrb[3].mxu0  ;;  %v317_v30 = vpop.f32.mrb[3].mxu1 }
  0xf9   :  { %v209_v31 = vadd.f32 %v309_v25, %v251_v22  ;;  %v217_v32 = vadd.f32 %v315_v26, %v251_v22  ;;  %v312_v33 = vadd.f32 %v311_v29, %v310_v27  ;;  %v318_v34 = vadd.f32 %v317_v30, %v316_v28 }
  0xfb   :  { %v212_v35 = vadd.f32 %v312_v33, %v251_v22  ;;  %v220_v36 = vadd.f32 %v318_v34, %v251_v22  ;;  %v223_v37 = vmax.f32 %v209_v31, 0.0  ;;  %v225_v38 = vmax.f32 %v217_v32, 0.0 }
  0xfd   :  { %v224_v39 = vmax.f32 %v212_v35, 0.0  ;;  %v226_v40 = vmax.f32 %v220_v36, 0.0 }
  0xff   :  { %v283_v41 = vpack.c.bf16 %v224_v39, %v223_v37  ;;  %v288_v42 = vpack.c.bf16 %v226_v40, %v225_v38 }
 0x101   :  { %284 = vst [vmem:[%s449_s3] sm:$0xff] %v283_v41   ;;  %290 = vst [vmem:[%s449_s3 + $0x8] sm:$0xff] %v288_v42  }

// kernel: autoencoder_forward.18
= control target key start
LH: loop header
LB: loop body
LE: loop exit
PB: predicated region body
PF: predicated region fallthrough
CT: control target
= control target key end

     0   :  { %vm327_vm0 = vcmask 519168   ;;  %s612_s1 = inlined_call_operand.vmem [shape: bf16[128,64], index: 1, kind: input, shape index: {}]   ;;  %s613_s0 = inlined_call_operand.vmem [shape: bf16[128,128], index: 0, kind: input, shape index: {}]   ;;  %s614_s2 = inlined_call_operand.vmem [shape: f32[1,64], index: 2, kind: input, shape index: {}]   ;;  %s615_s3 = inlined_call_operand.vmem [shape: bf16[128,64], index: 3, kind: output, shape index: {}]  }
   0x1   :  { %v461_v0 = vld [vmem:[%s612_s1] sm:$0xff]   ;;  %v462_v1 = vld [vmem:[%s612_s1 + $0x8] sm:$0xff]   ;;  %v463_v2 = vld [vmem:[%s612_s1 + $0x10] sm:$0xff]  }
   0x2   :  { %413 = vmatprep.subr.bf16.mxu0 %v461_v0  ;;  %445 = vmatprep.subr.bf16.mxu1 %v461_v0  ;;  %v464_v3 = vld [vmem:[%s612_s1 + $0x18] sm:$0xff]   ;;  %v469_v4 = vld [vmem:[%s613_s0] sm:$0xff]   ;;  %v466_v7 = vld [vmem:[%s612_s1 + $0x28] sm:$0xff]  }
   0x3   :  { %414 = vmatpush3.bf16.msra.mxu0 %v461_v0  ;;  %453 = vmatpush3.bf16.msra.mxu1 %v461_v0  ;;  %v470_v5 = vld [vmem:[%s613_s0 + $0x20] sm:$0xff]   ;;  %v467_v8 = vld [vmem:[%s612_s1 + $0x30] sm:$0xff]   ;;  %v468_v9 = vld [vmem:[%s612_s1 + $0x38] sm:$0xff]  }
   0x4   :  { %415 = vmatprep.subr.bf16.mxu0 %v462_v1  ;;  %446 = vmatprep.subr.bf16.mxu1 %v462_v1  ;;  %v465_v6 = vld [vmem:[%s612_s1 + $0x20] sm:$0xff]   ;;  %v471_v10 = vld [vmem:[%s613_s0 + $0x8] sm:$0xff]   ;;  %v473_v12 = vld [vmem:[%s613_s0 + $0x10] sm:$0xff]  }
   0x5   :  { %429 = vmatprep.mubr.bf16.mxu0 %v469_v4  ;;  %437 = vmatprep.mubr.bf16.mxu1 %v470_v5  ;;  %v472_v11 = vld [vmem:[%s613_s0 + $0x28] sm:$0xff]   ;;  %v474_v13 = vld [vmem:[%s613_s0 + $0x30] sm:$0xff]   ;;  %v475_v14 = vld [vmem:[%s613_s0 + $0x18] sm:$0xff]  }
   0x6   :  { %v476_v15 = vld [vmem:[%s613_s0 + $0x38] sm:$0xff]   ;;  %v348_v16 = vld [vmem:[%s614_s2] ss:$0 sm:$0xff] }
   0x7   :  { %416 = vmatpush3.bf16.msra.mxu0 %v462_v1  ;;  %454 = vmatpush3.bf16.msra.mxu1 %v462_v1 }
   0x8   :  { %417 = vmatprep.subr.bf16.mxu0 %v463_v2  ;;  %447 = vmatprep.subr.bf16.mxu1 %v463_v2 }
   0xb   :  { %418 = vmatpush3.bf16.msra.mxu0 %v463_v2  ;;  %455 = vmatpush3.bf16.msra.mxu1 %v463_v2 }
   0xc   :  { %419 = vmatprep.subr.bf16.mxu0 %v464_v3  ;;  %448 = vmatprep.subr.bf16.mxu1 %v464_v3 }
   0xf   :  { %420 = vmatpush3.bf16.msra.mxu0 %v464_v3  ;;  %456 = vmatpush3.bf16.msra.mxu1 %v464_v3 }
  0x10   :  { %421 = vmatprep.subr.bf16.mxu0 %v465_v6  ;;  %449 = vmatprep.subr.bf16.mxu1 %v465_v6 }
  0x13   :  { %422 = vmatpush3.bf16.msra.mxu0 %v465_v6  ;;  %457 = vmatpush3.bf16.msra.mxu1 %v465_v6 }
  0x14   :  { %423 = vmatprep.subr.bf16.mxu0 %v466_v7  ;;  %450 = vmatprep.subr.bf16.mxu1 %v466_v7 }
  0x17   :  { %424 = vmatpush3.bf16.msra.mxu0 %v466_v7  ;;  %458 = vmatpush3.bf16.msra.mxu1 %v466_v7 }
  0x18   :  { %425 = vmatprep.subr.bf16.mxu0 %v467_v8  ;;  %451 = vmatprep.subr.bf16.mxu1 %v467_v8 }
  0x1b   :  { %426 = vmatpush3.bf16.msra.mxu0 %v467_v8  ;;  %459 = vmatpush3.bf16.msra.mxu1 %v467_v8 }
  0x1c   :  { %427 = vmatprep.subr.bf16.mxu0 %v468_v9  ;;  %452 = vmatprep.subr.bf16.mxu1 %v468_v9 }
  0x1f   :  { %428 = vmatpush3.bf16.msra.mxu0 %v468_v9  ;;  %460 = vmatpush3.bf16.msra.mxu1 %v468_v9 }
  0x22   :  { %430 = vmatmul.mubr.bf16.vlgmr.msra.gmra.mrb[0].mxu0 %v471_v10  ;;  %438 = vmatmul.mubr.bf16.vlgmr.msra.gmra.mrb[0].mxu1 %v472_v11 }
  0x23   :  { %433 = vmatprep.mubr.bf16.mxu0 %v473_v12  ;;  %441 = vmatprep.mubr.bf16.mxu1 %v474_v13 }
  0x2a   :  { %434 = vmatmul.mubr.bf16.gmra.mrb[4].mxu0 %v475_v14  ;;  %442 = vmatmul.mubr.bf16.gmra.mrb[4].mxu1 %v476_v15 }
  0xf5   :  { %v431_v17 = vpop.f32.mrb[0].mxu0  ;;  %v439_v18 = vpop.f32.mrb[0].mxu1 }
  0xf6   :  { %v193_v19 = vadd.f32 %v431_v17, %v348_v16  ;;  %v225_v20 = vadd.f32 %v439_v18, %v348_v16  ;;  %v184_v21 = vpop.f32.mrb[1].mxu0  ;;  %v216_v22 = vpop.f32.mrb[1].mxu1 }
  0xf7   :  { %v185_v23 = vadd.f32 %v348_v16, %v184_v21  ;;  %v217_v24 = vadd.f32 %v348_v16, %v216_v22  ;;  %v432_v25 = vpop.f32.mrb[2].mxu0  ;;  %v440_v26 = vpop.f32.mrb[2].mxu1 }
  0xf8   :  { %v249_v27 = vmax.f32 %v193_v19, 0.0  ;;  %v257_v28 = vmax.f32 %v225_v20, 0.0  ;;  %v196_v29 = vadd.f32 %v432_v25, %v348_v16  ;;  %v228_v30 = vadd.f32 %v440_v26, %v348_v16  ;;  %v187_v31 = vpop.f32.mrb[3].mxu0  ;;  %v219_v32 = vpop.f32.mrb[3].mxu1 }
  0xf9   :  { %v247_v33 = vmax.f32 %v185_v23, 0.0  ;;  %v255_v34 = vmax.f32 %v217_v24, 0.0  ;;  %v188_v35 = vadd.f32 %v348_v16, %v187_v31  ;;  %v220_v36 = vadd.f32 %v348_v16, %v219_v32 }
  0xfa   :  { %v383_v37 = vpack.c.bf16 %v249_v27, %v249_v27  ;;  %v391_v38 = vpack.c.bf16 %v257_v28, %v257_v28  ;;  %v250_v39 = vmax.f32 %v196_v29, 0.0  ;;  %v258_v40 = vmax.f32 %v228_v30, 0.0 }
  0xfb   :  { %v381_v41 = vpack.c.bf16 %v247_v33, %v247_v33  ;;  %v389_v42 = vpack.c.bf16 %v255_v34, %v255_v34  ;;  %v248_v43 = vmax.f32 %v188_v35, 0.0  ;;  %v256_v44 = vmax.f32 %v220_v36, 0.0 }
  0xfc   :  { %330 = vst.msk [vmem:[%s615_s3 + $0x8] sm:$0xf] %vm327_vm0, %v383_v37  ;;  %338 = vst.msk [vmem:[%s615_s3 + $0x28] sm:$0xf] %vm327_vm0, %v391_v38  ;;  %v384_v45 = vpack.c.bf16 %v250_v39, %v250_v39  ;;  %v392_v46 = vpack.c.bf16 %v258_v40, %v258_v40 }
  0xfd   :  { %328 = vst.msk [vmem:[%s615_s3] sm:$0xf] %vm327_vm0, %v381_v41  ;;  %336 = vst.msk [vmem:[%s615_s3 + $0x20] sm:$0xf] %vm327_vm0, %v389_v42  ;;  %v382_v47 = vpack.c.bf16 %v248_v43, %v248_v43  ;;  %v390_v48 = vpack.c.bf16 %v256_v44, %v256_v44  ;;  %v435_v49 = vpop.f32.mrb[4].mxu0  ;;  %v443_v50 = vpop.f32.mrb[4].mxu1 }
  0xfe   :  { %331 = vst.msk [vmem:[%s615_s3 + $0xc] sm:$0xf] %vm327_vm0, %v384_v45  ;;  %339 = vst.msk [vmem:[%s615_s3 + $0x2c] sm:$0xf] %vm327_vm0, %v392_v46  ;;  %v209_v51 = vadd.f32 %v435_v49, %v348_v16  ;;  %v241_v52 = vadd.f32 %v443_v50, %v348_v16  ;;  %v200_v53 = vpop.f32.mrb[5].mxu0  ;;  %v232_v54 = vpop.f32.mrb[5].mxu1 }
  0xff   :  { %329 = vst.msk [vmem:[%s615_s3 + $0x4] sm:$0xf] %vm327_vm0, %v382_v47  ;;  %337 = vst.msk [vmem:[%s615_s3 + $0x24] sm:$0xf] %vm327_vm0, %v390_v48  ;;  %v201_v55 = vadd.f32 %v348_v16, %v200_v53  ;;  %v233_v56 = vadd.f32 %v348_v16, %v232_v54  ;;  %v436_v57 = vpop.f32.mrb[6].mxu0  ;;  %v444_v58 = vpop.f32.mrb[6].mxu1 }
 0x100   :  { %v253_v59 = vmax.f32 %v209_v51, 0.0  ;;  %v261_v60 = vmax.f32 %v241_v52, 0.0  ;;  %v212_v61 = vadd.f32 %v436_v57, %v348_v16  ;;  %v244_v62 = vadd.f32 %v444_v58, %v348_v16  ;;  %v203_v63 = vpop.f32.mrb[7].mxu0  ;;  %v235_v0 = vpop.f32.mrb[7].mxu1 }
 0x101   :  { %v251_v1 = vmax.f32 %v201_v55, 0.0  ;;  %v259_v2 = vmax.f32 %v233_v56, 0.0  ;;  %v204_v3 = vadd.f32 %v348_v16, %v203_v63  ;;  %v236_v4 = vadd.f32 %v348_v16, %v235_v0 }
 0x102   :  { %v387_v5 = vpack.c.bf16 %v253_v59, %v253_v59  ;;  %v395_v6 = vpack.c.bf16 %v261_v60, %v261_v60  ;;  %v254_v7 = vmax.f32 %v212_v61, 0.0  ;;  %v262_v8 = vmax.f32 %v244_v62, 0.0 }
 0x103   :  { %v385_v9 = vpack.c.bf16 %v251_v1, %v251_v1  ;;  %v393_v10 = vpack.c.bf16 %v259_v2, %v259_v2  ;;  %v252_v11 = vmax.f32 %v204_v3, 0.0  ;;  %v260_v12 = vmax.f32 %v236_v4, 0.0 }
 0x104   :  { %334 = vst.msk [vmem:[%s615_s3 + $0x18] sm:$0xf] %vm327_vm0, %v387_v5  ;;  %342 = vst.msk [vmem:[%s615_s3 + $0x38] sm:$0xf] %vm327_vm0, %v395_v6  ;;  %v388_v13 = vpack.c.bf16 %v254_v7, %v254_v7  ;;  %v396_v14 = vpack.c.bf16 %v262_v8, %v262_v8 }
 0x105   :  { %332 = vst.msk [vmem:[%s615_s3 + $0x10] sm:$0xf] %vm327_vm0, %v385_v9  ;;  %340 = vst.msk [vmem:[%s615_s3 + $0x30] sm:$0xf] %vm327_vm0, %v393_v10  ;;  %v386_v15 = vpack.c.bf16 %v252_v11, %v252_v11  ;;  %v394_v16 = vpack.c.bf16 %v260_v12, %v260_v12 }
 0x106   :  { %335 = vst.msk [vmem:[%s615_s3 + $0x1c] sm:$0xf] %vm327_vm0, %v388_v13  ;;  %343 = vst.msk [vmem:[%s615_s3 + $0x3c] sm:$0xf] %vm327_vm0, %v396_v14 }
 0x107   :  { %333 = vst.msk [vmem:[%s615_s3 + $0x14] sm:$0xf] %vm327_vm0, %v386_v15  ;;  %341 = vst.msk [vmem:[%s615_s3 + $0x34] sm:$0xf] %vm327_vm0, %v394_v16 }

// kernel: autoencoder_forward.19
= control target key start
LH: loop header
LB: loop body
LE: loop exit
PB: predicated region body
PF: predicated region fallthrough
CT: control target
= control target key end

     0   :  { %vm278_vm0 = vcmask 523264   ;;  %vm1304_vm1 = vcmask 93184   ;;  %s2674_s1 = inlined_call_operand.vmem [shape: bf16[64,12], index: 1, kind: input, shape index: {}]   ;;  %s2675_s0 = inlined_call_operand.vmem [shape: bf16[512,64], index: 0, kind: input, shape index: {}]   ;;  %s2676_s2 = inlined_call_operand.vmem [shape: f32[1,12], index: 2, kind: input, shape index: {}]   ;;  %s2677_s3 = inlined_call_operand.vmem [shape: bf16[512,12], index: 3, kind: output, shape index: {}]  }
   0x1   :  { %v1750_v0 = vld [vmem:[%s2674_s1] sm:$0xff]   ;;  %v1751_v1 = vld [vmem:[%s2674_s1 + $0x8] sm:$0xff]   ;;  %v1752_v2 = vld [vmem:[%s2674_s1 + $0x10] sm:$0xff]  }
   0x2   :  { %1670 = vmatprep.subr.bf16.mxu0 %v1750_v0  ;;  %1742 = vmatprep.subr.bf16.mxu1 %v1750_v0  ;;  %v1754_v3 = vld [vmem:[%s2675_s0] sm:$0xff]   ;;  %v1753_v5 = vld [vmem:[%s2674_s1 + $0x18] sm:$0xff]   ;;  %v1756_v6 = vld [vmem:[%s2675_s0 + $0x8] sm:$0xff]  }
   0x3   :  { %1671 = vmatpush3.bf16.msra.mxu0 %v1750_v0  ;;  %1746 = vmatpush3.bf16.msra.mxu1 %v1750_v0  ;;  %v1755_v4 = vld [vmem:[%s2675_s0 + $0x80] sm:$0xff]   ;;  %v1757_v7 = vld [vmem:[%s2675_s0 + $0x88] sm:$0xff]   ;;  %v1758_v8 = vld [vmem:[%s2675_s0 + $0x10] sm:$0xff]  }
   0x4   :  { %1672 = vmatprep.subr.bf16.mxu0 %v1751_v1  ;;  %1743 = vmatprep.subr.bf16.mxu1 %v1751_v1  ;;  %v1759_v9 = vld [vmem:[%s2675_s0 + $0x90] sm:$0xff]   ;;  %v1760_v10 = vld [vmem:[%s2675_s0 + $0x18] sm:$0xff]   ;;  %v1762_v12 = vld [vmem:[%s2675_s0 + $0x20] sm:$0xff]  }
   0x5   :  { %1678 = vmatprep.mubr.msk.bf16.mxu0 %vm278_vm0, %v1754_v3  ;;  %1710 = vmatprep.mubr.msk.bf16.mxu1 %vm278_vm0, %v1755_v4  ;;  %v1761_v11 = vld [vmem:[%s2675_s0 + $0x98] sm:$0xff]   ;;  %v1763_v13 = vld [vmem:[%s2675_s0 + $0xa0] sm:$0xff]   ;;  %v1764_v14 = vld [vmem:[%s2675_s0 + $0x28] sm:$0xff]  }
   0x6   :  { %v1765_v15 = vld [vmem:[%s2675_s0 + $0xa8] sm:$0xff]   ;;  %v1766_v16 = vld [vmem:[%s2675_s0 + $0x30] sm:$0xff]   ;;  %v1768_v18 = vld [vmem:[%s2675_s0 + $0x38] sm:$0xff]  }
   0x7   :  { %1673 = vmatpush3.bf16.msra.mxu0 %v1751_v1  ;;  %1747 = vmatpush3.bf16.msra.mxu1 %v1751_v1  ;;  %v1767_v17 = vld [vmem:[%s2675_s0 + $0xb0] sm:$0xff]   ;;  %v1769_v19 = vld [vmem:[%s2675_s0 + $0xb8] sm:$0xff]   ;;  %v1770_v20 = vld [vmem:[%s2675_s0 + $0x40] sm:$0xff]  }
   0x8   :  { %1674 = vmatprep.subr.bf16.mxu0 %v1752_v2  ;;  %1744 = vmatprep.subr.bf16.mxu1 %v1752_v2  ;;  %v1771_v21 = vld [vmem:[%s2675_s0 + $0xc0] sm:$0xff]   ;;  %v1772_v22 = vld [vmem:[%s2675_s0 + $0x48] sm:$0xff]   ;;  %v1774_v24 = vld [vmem:[%s2675_s0 + $0x50] sm:$0xff]  }
   0x9   :  { %v1773_v23 = vld [vmem:[%s2675_s0 + $0xc8] sm:$0xff]   ;;  %v1775_v25 = vld [vmem:[%s2675_s0 + $0xd0] sm:$0xff]   ;;  %v1776_v26 = vld [vmem:[%s2675_s0 + $0x58] sm:$0xff]  }
   0xa   :  { %v1777_v27 = vld [vmem:[%s2675_s0 + $0xd8] sm:$0xff]   ;;  %v1778_v28 = vld [vmem:[%s2675_s0 + $0x60] sm:$0xff]   ;;  %v1780_v30 = vld [vmem:[%s2675_s0 + $0x68] sm:$0xff]  }
   0xb   :  { %1675 = vmatpush3.bf16.msra.mxu0 %v1752_v2  ;;  %1748 = vmatpush3.bf16.msra.mxu1 %v1752_v2  ;;  %v1779_v29 = vld [vmem:[%s2675_s0 + $0xe0] sm:$0xff]   ;;  %v1781_v31 = vld [vmem:[%s2675_s0 + $0xe8] sm:$0xff]   ;;  %v1782_v32 = vld [vmem:[%s2675_s0 + $0x70] sm:$0xff]  }
   0xc   :  { %1676 = vmatprep.subr.bf16.mxu0 %v1753_v5  ;;  %1745 = vmatprep.subr.bf16.mxu1 %v1753_v5  ;;  %v1783_v33 = vld [vmem:[%s2675_s0 + $0xf0] sm:$0xff]   ;;  %v1784_v34 = vld [vmem:[%s2675_s0 + $0x78] sm:$0xff]   ;;  %v2205_v36 = vld [vmem:[%s2676_s2] ss:$0 sm:$0xff] }
   0xd   :  { %v1785_v35 = vld [vmem:[%s2675_s0 + $0xf8] sm:$0xff]  }
   0xf   :  { %1677 = vmatpush3.bf16.msra.mxu0 %v1753_v5  ;;  %1749 = vmatpush3.bf16.msra.mxu1 %v1753_v5 }
  0x12   :  { %1679 = vmatmul.mubr.msk.bf16.vlgmr.msra.gmra.mrb[0].mxu0 %vm278_vm0, %v1756_v6  ;;  %1711 = vmatmul.mubr.msk.bf16.vlgmr.msra.gmra.mrb[0].mxu1 %vm278_vm0, %v1757_v7 }
  0x13   :  { %1682 = vmatprep.mubr.msk.bf16.mxu0 %vm278_vm0, %v1758_v8  ;;  %1714 = vmatprep.mubr.msk.bf16.mxu1 %vm278_vm0, %v1759_v9 }
  0x1a   :  { %1683 = vmatmul.mubr.msk.bf16.gmra.mrb[4].mxu0 %vm278_vm0, %v1760_v10  ;;  %1715 = vmatmul.mubr.msk.bf16.gmra.mrb[4].mxu1 %vm278_vm0, %v1761_v11 }
  0x1b   :  { %1686 = vmatprep.mubr.msk.bf16.mxu0 %vm278_vm0, %v1762_v12  ;;  %1718 = vmatprep.mubr.msk.bf16.mxu1 %vm278_vm0, %v1763_v13 }
  0x22   :  { %1687 = vmatmul.mubr.msk.bf16.gmra.mrb[8].mxu0 %vm278_vm0, %v1764_v14  ;;  %1719 = vmatmul.mubr.msk.bf16.gmra.mrb[8].mxu1 %vm278_vm0, %v1765_v15 }
  0x23   :  { %1690 = vmatprep.mubr.msk.bf16.mxu0 %vm278_vm0, %v1766_v16  ;;  %1722 = vmatprep.mubr.msk.bf16.mxu1 %vm278_vm0, %v1767_v17 }
  0x2a   :  { %1691 = vmatmul.mubr.msk.bf16.gmra.mrb[12].mxu0 %vm278_vm0, %v1768_v18  ;;  %1723 = vmatmul.mubr.msk.bf16.gmra.mrb[12].mxu1 %vm278_vm0, %v1769_v19 }
  0x2b   :  { %1694 = vmatprep.mubr.msk.bf16.mxu0 %vm278_vm0, %v1770_v20  ;;  %1726 = vmatprep.mubr.msk.bf16.mxu1 %vm278_vm0, %v1771_v21 }
  0x32   :  { %1695 = vmatmul.mubr.msk.bf16.gmra.mrb[16].mxu0 %vm278_vm0, %v1772_v22  ;;  %1727 = vmatmul.mubr.msk.bf16.gmra.mrb[16].mxu1 %vm278_vm0, %v1773_v23 }
  0x33   :  { %1698 = vmatprep.mubr.msk.bf16.mxu0 %vm278_vm0, %v1774_v24  ;;  %1730 = vmatprep.mubr.msk.bf16.mxu1 %vm278_vm0, %v1775_v25 }
  0x3a   :  { %1699 = vmatmul.mubr.msk.bf16.gmra.mrb[20].mxu0 %vm278_vm0, %v1776_v26  ;;  %1731 = vmatmul.mubr.msk.bf16.gmra.mrb[20].mxu1 %vm278_vm0, %v1777_v27 }
  0x3b   :  { %1702 = vmatprep.mubr.msk.bf16.mxu0 %vm278_vm0, %v1778_v28  ;;  %1734 = vmatprep.mubr.msk.bf16.mxu1 %vm278_vm0, %v1779_v29 }
  0x42   :  { %1703 = vmatmul.mubr.msk.bf16.gmra.mrb[24].mxu0 %vm278_vm0, %v1780_v30  ;;  %1735 = vmatmul.mubr.msk.bf16.gmra.mrb[24].mxu1 %vm278_vm0, %v1781_v31 }
  0x43   :  { %1706 = vmatprep.mubr.msk.bf16.mxu0 %vm278_vm0, %v1782_v32  ;;  %1738 = vmatprep.mubr.msk.bf16.mxu1 %vm278_vm0, %v1783_v33 }
  0x4a   :  { %1707 = vmatmul.mubr.msk.bf16.gmra.mrb[28].mxu0 %vm278_vm0, %v1784_v34  ;;  %1739 = vmatmul.mubr.msk.bf16.gmra.mrb[28].mxu1 %vm278_vm0, %v1785_v35 }
  0xe5   :  { %v1680_v37 = vpop.f32.mrb[0].mxu0  ;;  %v1712_v38 = vpop.f32.mrb[0].mxu1 }
  0xe6   :  { %v418_v39 = vadd.f32 %v1680_v37, %v2205_v36  ;;  %v546_v40 = vadd.f32 %v1712_v38, %v2205_v36  ;;  %v409_v41 = vpop.f32.mrb[1].mxu0  ;;  %v537_v42 = vpop.f32.mrb[1].mxu1 }
  0xe7   :  { %v410_v43 = vadd.f32 %v2205_v36, %v409_v41  ;;  %v538_v44 = vadd.f32 %v2205_v36, %v537_v42  ;;  %v1681_v45 = vpop.f32.mrb[2].mxu0  ;;  %v1713_v46 = vpop.f32.mrb[2].mxu1 }
  0xe8   :  { %v1444_v47 = vmul.f32 -1.442695, %v418_v39  ;;  %v1476_v48 = vmul.f32 -1.442695, %v546_v40  ;;  %v421_v49 = vadd.f32 %v1681_v45, %v2205_v36  ;;  %v549_v50 = vadd.f32 %v1713_v46, %v2205_v36  ;;  %v412_v51 = vpop.f32.mrb[3].mxu0  ;;  %v540_v52 = vpop.f32.mrb[3].mxu1 }
  0xe9   :  { %v1442_v53 = vmul.f32 -1.442695, %v410_v43  ;;  %v1474_v54 = vmul.f32 -1.442695, %v538_v44  ;;  %v413_v55 = vadd.f32 %v2205_v36, %v412_v51  ;;  %v541_v56 = vadd.f32 %v2205_v36, %v540_v52 }
  0xea   :  { %1786 = vpow2.f32 %v1444_v47  ;;  %v1445_v57 = vmul.f32 -1.442695, %v421_v49  ;;  %v1477_v58 = vmul.f32 -1.442695, %v549_v50 }
  0xeb   :  { %1788 = vpow2.f32 %v1476_v48  ;;  %v1443_v59 = vmul.f32 -1.442695, %v413_v55  ;;  %v1475_v60 = vmul.f32 -1.442695, %v541_v56 }
  0xec   :  { %1790 = vpow2.f32 %v1442_v53 }
  0xed   :  { %1792 = vpow2.f32 %v1474_v54  ;;  %v1684_v61 = vpop.f32.mrb[4].mxu0  ;;  %v1716_v62 = vpop.f32.mrb[4].mxu1 }
  0xee   :  { %1794 = vpow2.f32 %v1445_v57  ;;  %v434_v63 = vadd.f32 %v1684_v61, %v2205_v36  ;;  %v562_v0 = vadd.f32 %v1716_v62, %v2205_v36  ;;  %v425_v1 = vpop.f32.mrb[5].mxu0  ;;  %v553_v2 = vpop.f32.mrb[5].mxu1 }
  0xef   :  { %1796 = vpow2.f32 %v1477_v58  ;;  %v426_v3 = vadd.f32 %v2205_v36, %v425_v1  ;;  %v554_v4 = vadd.f32 %v2205_v36, %v553_v2  ;;  %v1685_v5 = vpop.f32.mrb[6].mxu0  ;;  %v1717_v6 = vpop.f32.mrb[6].mxu1 }
  0xf0   :  { %1798 = vpow2.f32 %v1443_v59  ;;  %v1448_v7 = vmul.f32 -1.442695, %v434_v63  ;;  %v1480_v8 = vmul.f32 -1.442695, %v562_v0  ;;  %v437_v9 = vadd.f32 %v1685_v5, %v2205_v36  ;;  %v428_v10 = vpop.f32.mrb[7].mxu0  ;;  %v556_v11 = vpop.f32.mrb[7].mxu1 }
  0xf1   :  { %1800 = vpow2.f32 %v1475_v60  ;;  %v1446_v12 = vmul.f32 -1.442695, %v426_v3  ;;  %v1478_v13 = vmul.f32 -1.442695, %v554_v4  ;;  %v565_v41 = vadd.f32 %v1717_v6, %v2205_v36 }
  0xf2   :  { %1802 = vpow2.f32 %v1448_v7  ;;  %v1449_v14 = vmul.f32 -1.442695, %v437_v9  ;;  %v429_v44 = vadd.f32 %v2205_v36, %v428_v10  ;;  %v557_v48 = vadd.f32 %v2205_v36, %v556_v11 }
  0xf3   :  { %1804 = vpow2.f32 %v1480_v8  ;;  %v1481_v58 = vmul.f32 -1.442695, %v565_v41 }
  0xf4   :  { %v1787_v15 = vpop.eup %1786  ;;  %1806 = vpow2.f32 %v1446_v12  ;;  %v1447_v0 = vmul.f32 -1.442695, %v429_v44  ;;  %v1479_v5 = vmul.f32 -1.442695, %v557_v48 }
  0xf5   :  { %v1789_v16 = vpop.eup %1788  ;;  %v858_v17 = vadd.f32 1.0, %v1787_v15  ;;  %1808 = vpow2.f32 %v1478_v13  ;;  %v1688_v18 = vpop.f32.mrb[8].mxu0 }
  0xf6   :  { %v1720_v19 = vpop.f32.mrb[8].mxu1  ;;  %v1791_v20 = vpop.eup %1790  ;;  %v890_v21 = vadd.f32 1.0, %v1789_v16  ;;  %1810 = vpow2.f32 %v1449_v14  ;;  %v450_v53 = vadd.f32 %v1688_v18, %v2205_v36 }
  0xf7   :  { %v441_v22 = vpop.f32.mrb[9].mxu0  ;;  %v569_v23 = vpop.f32.mrb[9].mxu1  ;;  %1812 = vrcp.f32 %v858_v17  ;;  %v856_v25 = vadd.f32 1.0, %v1791_v20  ;;  %v578_v59 = vadd.f32 %v1720_v19, %v2205_v36 }
  0xf8   :  { %v1793_v24 = vpop.eup %1792  ;;  %v1689_v26 = vpop.f32.mrb[10].mxu0  ;;  %1814 = vrcp.f32 %v890_v21  ;;  %v442_v1 = vadd.f32 %v2205_v36, %v441_v22  ;;  %v570_v6 = vadd.f32 %v2205_v36, %v569_v23  ;;  %v1452_v9 = vmul.f32 -1.442695, %v450_v53 }
  0xf9   :  { %v2220_v27 = vpop.f32.mrb[10].mxu1  ;;  %v1795_v28 = vpop.eup %1794  ;;  %v888_v29 = vadd.f32 1.0, %v1793_v24  ;;  %1816 = vrcp.f32 %v856_v25  ;;  %v453_v10 = vadd.f32 %v1689_v26, %v2205_v36  ;;  %v1484_v13 = vmul.f32 -1.442695, %v578_v59 }
  0xfa   :  { %v2222_v30 = vpop.f32.mrb[11].mxu0  ;;  %v1797_v31 = vpop.eup %1796  ;;  %v859_v32 = vadd.f32 1.0, %v1795_v28  ;;  %v581_v14 = vadd.f32 %v2220_v27, %v2205_v36  ;;  %v1450_v17 = vmul.f32 -1.442695, %v442_v1  ;;  %v1482_v23 = vmul.f32 -1.442695, %v570_v6 }
  0xfb   :  { %v2224_v33 = vpop.f32.mrb[11].mxu1  ;;  %v1799_v34 = vpop.eup %1798  ;;  %1818 = vrcp.f32 %v888_v29  ;;  %v891_v35 = vadd.f32 1.0, %v1797_v31  ;;  %v445_v18 = vadd.f32 %v2205_v36, %v2222_v30  ;;  %v1453_v29 = vmul.f32 -1.442695, %v453_v10 }
  0xfc   :  { %v1801_v37 = vpop.eup %1800  ;;  %1820 = vrcp.f32 %v859_v32  ;;  %v857_v38 = vadd.f32 1.0, %v1799_v34  ;;  %v573_v24 = vadd.f32 %v2205_v36, %v2224_v33 }
  0xfd   :  { %v1803_v39 = vpop.eup %1802  ;;  %1822 = vrcp.f32 %v891_v35  ;;  %v889_v40 = vadd.f32 1.0, %v1801_v37  ;;  %v2228_v45 = vpop.f32.mrb[12].mxu0  ;;  %v1485_v35 = vmul.f32 -1.442695, %v581_v14 }
  0xfe   :  { %v1805_v42 = vpop.eup %1804  ;;  %1824 = vrcp.f32 %v857_v38  ;;  %v862_v43 = vadd.f32 1.0, %v1803_v39  ;;  %v2231_v49 = vpop.f32.mrb[12].mxu1  ;;  %v466_v30 = vadd.f32 %v2228_v45, %v2205_v36  ;;  %v1483_v45 = vmul.f32 -1.442695, %v573_v24 }
  0xff   :  { %v1807_v46 = vpop.eup %1806  ;;  %1826 = vrcp.f32 %v889_v40  ;;  %v894_v47 = vadd.f32 1.0, %v1805_v42  ;;  %v2233_v50 = vpop.f32.mrb[13].mxu0  ;;  %v594_v37 = vadd.f32 %v2231_v49, %v2205_v36  ;;  %v1451_v42 = vmul.f32 -1.442695, %v445_v18 }
 0x100   :  { %v1809_v51 = vpop.eup %1808  ;;  %1828 = vrcp.f32 %v862_v43  ;;  %v860_v52 = vadd.f32 1.0, %v1807_v46  ;;  %v2236_v54 = vpop.f32.mrb[13].mxu1  ;;  %v458_v46 = vadd.f32 %v2205_v36, %v2233_v50  ;;  %v1456_v49 = vmul.f32 -1.442695, %v466_v30 }
 0x101   :  { %v2238_v55 = vpop.f32.mrb[14].mxu0  ;;  %v1811_v56 = vpop.eup %1810  ;;  %1830 = vrcp.f32 %v894_v47  ;;  %v892_v57 = vadd.f32 1.0, %v1809_v51  ;;  %v1488_v50 = vmul.f32 -1.442695, %v594_v37  ;;  %v586_v59 = vadd.f32 %v2205_v36, %v2236_v54 }
 0x102   :  { %v2241_v60 = vpop.f32.mrb[14].mxu1  ;;  %v2243_v61 = vpop.f32.mrb[15].mxu0  ;;  %1832 = vrcp.f32 %v860_v52  ;;  %v863_v63 = vadd.f32 1.0, %v1811_v56 }
 0x103   :  { %v1813_v62 = vpop.eup %1812  ;;  %v2246_v2 = vpop.f32.mrb[15].mxu1  ;;  %1834 = vrcp.f32 %v892_v57  ;;  %v461_v37 = vadd.f32 %v2205_v36, %v2243_v61 }
 0x104   :  { %v1815_v3 = vpop.eup %1814  ;;  %v1572_v4 = vpack.c.bf16 %v1813_v62, %v1813_v62  ;;  %1836 = vrcp.f32 %v863_v63 }
 0x105   :  { %v1817_v7 = vpop.eup %1816  ;;  %v1604_v8 = vpack.c.bf16 %v1815_v3, %v1815_v3  ;;  %1838 = vpow2.f32 %v1481_v58  ;;  %v2262_v19 = vpop.f32.mrb[16].mxu0 }
 0x106   :  { %v1819_v11 = vpop.eup %1818  ;;  %1307 = vst.msk [vmem:[%s2677_s3 + $0x8] sm:$0xf] %vm1304_vm1, %v1572_v4  ;;  %v1570_v12 = vpack.c.bf16 %v1817_v7, %v1817_v7  ;;  %1840 = vpow2.f32 %v1447_v0  ;;  %v2264_v20 = vpop.f32.mrb[16].mxu1 }
 0x107   :  { %v1821_v15 = vpop.eup %1820  ;;  %1339 = vst.msk [vmem:[%s2677_s3 + $0x88] sm:$0xf] %vm1304_vm1, %v1604_v8  ;;  %v1602_v16 = vpack.c.bf16 %v1819_v11, %v1819_v11  ;;  %1842 = vpow2.f32 %v1479_v5  ;;  %v2272_v25 = vpop.f32.mrb[17].mxu0 }
 0x108   :  { %v1823_v21 = vpop.eup %1822  ;;  %1305 = vst.msk [vmem:[%s2677_s3] sm:$0xf] %vm1304_vm1, %v1570_v12  ;;  %v1573_v22 = vpack.c.bf16 %v1821_v15, %v1821_v15  ;;  %v2274_v26 = vpop.f32.mrb[17].mxu1  ;;  %1844 = vpow2.f32 %v1452_v9 }
 0x109   :  { %v1825_v27 = vpop.eup %1824  ;;  %1337 = vst.msk [vmem:[%s2677_s3 + $0x80] sm:$0xf] %vm1304_vm1, %v1602_v16  ;;  %v1605_v28 = vpack.c.bf16 %v1823_v21, %v1823_v21  ;;  %v2282_v31 = vpop.f32.mrb[18].mxu0  ;;  %1846 = vpow2.f32 %v1484_v13  ;;  %v2343_v13 = vmul.f32 -1.442695, %v458_v46 }
 0x10a   :  { %v2284_v32 = vpop.f32.mrb[18].mxu1  ;;  %v1827_v33 = vpop.eup %1826  ;;  %1308 = vst.msk [vmem:[%s2677_s3 + $0xc] sm:$0xf] %vm1304_vm1, %v1573_v22  ;;  %v1571_v34 = vpack.c.bf16 %v1825_v27, %v1825_v27  ;;  %1848 = vpow2.f32 %v1450_v17  ;;  %v2348_v21 = vmul.f32 -1.442695, %v586_v59  ;;  %v469_v22 = vadd.f32 %v2238_v55, %v2205_v36 }
 0x10b   :  { %v476_v38 = vpop.f32.mrb[19].mxu0  ;;  %v604_v39 = vpop.f32.mrb[19].mxu1  ;;  %1340 = vst.msk [vmem:[%s2677_s3 + $0x8c] sm:$0xf] %vm1304_vm1, %v1605_v28  ;;  %v1603_v41 = vpack.c.bf16 %v1827_v33, %v1827_v33  ;;  %1850 = vpow2.f32 %v1482_v23  ;;  %v597_v27 = vadd.f32 %v2241_v60, %v2205_v36  ;;  %v2383_v59 = vmul.f32 -1.442695, %v461_v37 }
 0x10c   :  { %v1829_v40 = vpop.eup %1828  ;;  %1306 = vst.msk [vmem:[%s2677_s3 + $0x4] sm:$0xf] %vm1304_vm1, %v1571_v34  ;;  %1852 = vpow2.f32 %v1453_v29  ;;  %v2307_v51 = vadd.f32 %v2205_v36, %v476_v38  ;;  %v2314_v56 = vadd.f32 %v2205_v36, %v604_v39 }
 0x10d   :  { %v1831_v43 = vpop.eup %1830  ;;  %v1576_v44 = vpack.c.bf16 %v1829_v40, %v1829_v40  ;;  %1338 = vst.msk [vmem:[%s2677_s3 + $0x84] sm:$0xf] %vm1304_vm1, %v1603_v41  ;;  %1854 = vpow2.f32 %v1485_v35  ;;  %v1700_v62 = vpop.f32.mrb[20].mxu0  ;;  %v2368_v40 = vmul.f32 -1.442695, %v469_v22  ;;  %v589_v41 = vadd.f32 %v2205_v36, %v2246_v2 }
 0x10e   :  { %v1833_v47 = vpop.eup %1832  ;;  %v1608_v48 = vpack.c.bf16 %v1831_v43, %v1831_v43  ;;  %1856 = vpow2.f32 %v1451_v42  ;;  %v1732_v63 = vpop.f32.mrb[20].mxu1  ;;  %v2327_v3 = vadd.f32 %v1700_v62, %v2205_v36 }
 0x10f   :  { %v1835_v52 = vpop.eup %1834  ;;  %1311 = vst.msk [vmem:[%s2677_s3 + $0x18] sm:$0xf] %vm1304_vm1, %v1576_v44  ;;  %v1574_v53 = vpack.c.bf16 %v1833_v47, %v1833_v47  ;;  %1858 = vpow2.f32 %v1483_v45  ;;  %v489_v4 = vpop.f32.mrb[21].mxu0  ;;  %v2334_v7 = vadd.f32 %v1732_v63, %v2205_v36  ;;  %v2372_v45 = vmul.f32 -1.442695, %v597_v27 }
 0x110   :  { %v1837_v57 = vpop.eup %1836  ;;  %1343 = vst.msk [vmem:[%s2677_s3 + $0x98] sm:$0xf] %vm1304_vm1, %v1608_v48  ;;  %v1606_v58 = vpack.c.bf16 %v1835_v52, %v1835_v52  ;;  %v617_v5 = vpop.f32.mrb[21].mxu1  ;;  %1860 = vpow2.f32 %v1456_v49  ;;  %v2337_v8 = vadd.f32 %v2205_v36, %v489_v4 }
 0x111   :  { %v1839_v0 = vpop.eup %1838  ;;  %1309 = vst.msk [vmem:[%s2677_s3 + $0x10] sm:$0xf] %vm1304_vm1, %v1574_v53  ;;  %v1577_v1 = vpack.c.bf16 %v1837_v57, %v1837_v57  ;;  %v1701_v9 = vpop.f32.mrb[22].mxu0  ;;  %1862 = vpow2.f32 %v1488_v50  ;;  %v2346_v14 = vadd.f32 %v2205_v36, %v617_v5  ;;  %v2388_v5 = vmul.f32 -1.442695, %v589_v41 }
 0x112   :  { %v1841_v6 = vpop.eup %1840  ;;  %1341 = vst.msk [vmem:[%s2677_s3 + $0x90] sm:$0xf] %vm1304_vm1, %v1606_v58  ;;  %v895_v54 = vadd.f32 1.0, %v1839_v0  ;;  %v1733_v10 = vpop.f32.mrb[22].mxu1  ;;  %v2355_v28 = vadd.f32 %v1701_v9, %v2205_v36 }
 0x113   :  { %v1843_v11 = vpop.eup %1842  ;;  %1312 = vst.msk [vmem:[%s2677_s3 + $0x1c] sm:$0xf] %vm1304_vm1, %v1577_v1  ;;  %v861_v12 = vadd.f32 1.0, %v1841_v6  ;;  %v492_v15 = vpop.f32.mrb[23].mxu0  ;;  %v2358_v33 = vadd.f32 %v1733_v10, %v2205_v36  ;;  %v482_v6 = vadd.f32 %v2262_v19, %v2205_v36 }
 0x114   :  { %v620_v16 = vpop.f32.mrb[23].mxu1  ;;  %v1845_v17 = vpop.eup %1844  ;;  %1864 = vrcp.f32 %v895_v54  ;;  %v893_v18 = vadd.f32 1.0, %v1843_v11  ;;  %v2361_v34 = vadd.f32 %v2205_v36, %v492_v15  ;;  %v610_v11 = vadd.f32 %v2264_v20, %v2205_v36 }
 0x115   :  { %v1847_v23 = vpop.eup %1846  ;;  %1866 = vrcp.f32 %v861_v12  ;;  %v866_v24 = vadd.f32 1.0, %v1845_v17  ;;  %v2366_v60 = vadd.f32 %v2205_v36, %v620_v16  ;;  %v1704_v42 = vpop.f32.mrb[24].mxu0 }
 0x116   :  { %v1849_v29 = vpop.eup %1848  ;;  %1868 = vrcp.f32 %v893_v18  ;;  %v898_v30 = vadd.f32 1.0, %v1847_v23  ;;  %v2375_v46 = vadd.f32 %v1704_v42, %v2205_v36  ;;  %v1736_v61 = vpop.f32.mrb[24].mxu1  ;;  %v474_v23 = vadd.f32 %v2205_v36, %v2272_v25 }
 0x117   :  { %v1851_v35 = vpop.eup %1850  ;;  %1870 = vrcp.f32 %v866_v24  ;;  %v864_v55 = vadd.f32 1.0, %v1849_v29  ;;  %v505_v47 = vpop.f32.mrb[25].mxu0  ;;  %v2378_v52 = vadd.f32 %v1736_v61, %v2205_v36  ;;  %v1460_v29 = vmul.f32 -1.442695, %v482_v6 }
 0x118   :  { %v1853_v38 = vpop.eup %1852  ;;  %1872 = vrcp.f32 %v898_v30  ;;  %v896_v39 = vadd.f32 1.0, %v1851_v35  ;;  %v2381_v53 = vadd.f32 %v2205_v36, %v505_v47  ;;  %v633_v2 = vpop.f32.mrb[25].mxu1  ;;  %v602_v30 = vadd.f32 %v2205_v36, %v2274_v26 }
 0x119   :  { %v1855_v43 = vpop.eup %1854  ;;  %1874 = vrcp.f32 %v864_v55  ;;  %v867_v44 = vadd.f32 1.0, %v1853_v38  ;;  %v1705_v50 = vpop.f32.mrb[26].mxu0  ;;  %v2386_v62 = vadd.f32 %v2205_v36, %v633_v2  ;;  %v1492_v25 = vmul.f32 -1.442695, %v610_v11 }
 0x11a   :  { %v1857_v48 = vpop.eup %1856  ;;  %1876 = vrcp.f32 %v896_v39  ;;  %v899_v49 = vadd.f32 1.0, %v1855_v43  ;;  %v1737_v63 = vpop.f32.mrb[26].mxu1  ;;  %v2395_v12 = vadd.f32 %v1705_v50, %v2205_v36 }
 0x11b   :  { %v1859_v57 = vpop.eup %1858  ;;  %1878 = vrcp.f32 %v867_v44  ;;  %v865_v58 = vadd.f32 1.0, %v1857_v48  ;;  %v508_v0 = vpop.f32.mrb[27].mxu0  ;;  %v2398_v17 = vadd.f32 %v1737_v63, %v2205_v36 }
 0x11c   :  { %v1861_v1 = vpop.eup %1860  ;;  %1880 = vrcp.f32 %v899_v49  ;;  %v897_v4 = vadd.f32 1.0, %v1859_v57  ;;  %v636_v54 = vpop.f32.mrb[27].mxu1  ;;  %v2401_v18 = vadd.f32 %v2205_v36, %v508_v0  ;;  %v1458_v0 = vmul.f32 -1.442695, %v474_v23 }
 0x11d   :  { %v1863_v9 = vpop.eup %1862  ;;  %1882 = vrcp.f32 %v865_v58  ;;  %v870_v10 = vadd.f32 1.0, %v1861_v1  ;;  %v2406_v20 = vadd.f32 %v2205_v36, %v636_v54  ;;  %v1708_v35 = vpop.f32.mrb[28].mxu0 }
 0x11e   :  { %v1865_v15 = vpop.eup %1864  ;;  %1884 = vrcp.f32 %v897_v4  ;;  %v902_v16 = vadd.f32 1.0, %v1863_v9  ;;  %v1740_v55 = vpop.f32.mrb[28].mxu1  ;;  %v2416_v39 = vadd.f32 %v1708_v35, %v2205_v36  ;;  %v1490_v4 = vmul.f32 -1.442695, %v602_v30 }
 0x11f   :  { %v1867_v19 = vpop.eup %1866  ;;  %v1609_v22 = vpack.c.bf16 %v1865_v15, %v1865_v15  ;;  %1886 = vrcp.f32 %v870_v10  ;;  %v521_v41 = vpop.f32.mrb[29].mxu0  ;;  %v2424_v44 = vadd.f32 %v1740_v55, %v2205_v36 }
 0x120   :  { %v1869_v24 = vpop.eup %1868  ;;  %v1575_v27 = vpack.c.bf16 %v1867_v19, %v1867_v19  ;;  %1888 = vrcp.f32 %v902_v16  ;;  %v649_v42 = vpop.f32.mrb[29].mxu1 }
 0x121   :  { %v1871_v37 = vpop.eup %1870  ;;  %1344 = vst.msk [vmem:[%s2677_s3 + $0x9c] sm:$0xf] %vm1304_vm1, %v1609_v22  ;;  %v1607_v38 = vpack.c.bf16 %v1869_v24, %v1869_v24  ;;  %1890 = vpow2.f32 %v2343_v13  ;;  %v2427_v13 = vadd.f32 %v2205_v36, %v521_v41  ;;  %v1709_v61 = vpop.f32.mrb[30].mxu0  ;;  %v2437_v2 = vadd.f32 %v2205_v36, %v649_v42 }
 0x122   :  { %v1873_v43 = vpop.eup %1872  ;;  %1310 = vst.msk [vmem:[%s2677_s3 + $0x14] sm:$0xf] %vm1304_vm1, %v1575_v27  ;;  %v1580_v26 = vpack.c.bf16 %v1871_v37, %v1871_v37  ;;  %1892 = vpow2.f32 %v2348_v21  ;;  %v1741_v47 = vpop.f32.mrb[30].mxu1  ;;  %v485_v21 = vadd.f32 %v2282_v31, %v2205_v36  ;;  %v2452_v6 = vadd.f32 %v1709_v61, %v2205_v36 }
 0x123   :  { %v1875_v48 = vpop.eup %1874  ;;  %1342 = vst.msk [vmem:[%s2677_s3 + $0x94] sm:$0xf] %vm1304_vm1, %v1607_v38  ;;  %v1612_v49 = vpack.c.bf16 %v1873_v43, %v1873_v43  ;;  %1894 = vpow2.f32 %v2368_v40  ;;  %v524_v50 = vpop.f32.mrb[31].mxu0  ;;  %v613_v40 = vadd.f32 %v2284_v32, %v2205_v36 }
 0x124   :  { %v652_v57 = vpop.f32.mrb[31].mxu1  ;;  %v1877_v58 = vpop.eup %1876  ;;  %1315 = vst.msk [vmem:[%s2677_s3 + $0x28] sm:$0xf] %vm1304_vm1, %v1580_v26  ;;  %v1578_v63 = vpack.c.bf16 %v1875_v48, %v1875_v48  ;;  %1896 = vpow2.f32 %v2372_v45  ;;  %v2460_v45 = vadd.f32 %v1741_v47, %v2205_v36  ;;  %v2463_v9 = vadd.f32 %v2205_v36, %v524_v50 }
 0x125   :  { %v1879_v1 = vpop.eup %1878  ;;  %1347 = vst.msk [vmem:[%s2677_s3 + $0xa8] sm:$0xf] %vm1304_vm1, %v1612_v49  ;;  %v1610_v31 = vpack.c.bf16 %v1877_v58, %v1877_v58  ;;  %1898 = vpow2.f32 %v2383_v59  ;;  %v1461_v11 = vmul.f32 -1.442695, %v485_v21  ;;  %v2470_v15 = vadd.f32 %v2205_v36, %v652_v57 }
 0x126   :  { %v1881_v54 = vpop.eup %1880  ;;  %1313 = vst.msk [vmem:[%s2677_s3 + $0x20] sm:$0xf] %vm1304_vm1, %v1578_v63  ;;  %v1581_v32 = vpack.c.bf16 %v1879_v1, %v1879_v1  ;;  %1900 = vpow2.f32 %v2388_v5  ;;  %v1493_v19 = vmul.f32 -1.442695, %v613_v40  ;;  %v1459_v36 = vmul.f32 -1.442695, %v2307_v51 }
 0x127   :  { %v1883_v59 = vpop.eup %1882  ;;  %1345 = vst.msk [vmem:[%s2677_s3 + $0xa0] sm:$0xf] %vm1304_vm1, %v1610_v31  ;;  %v1613_v10 = vpack.c.bf16 %v1881_v54, %v1881_v54  ;;  %1902 = vpow2.f32 %v1460_v29  ;;  %v1491_v54 = vmul.f32 -1.442695, %v2314_v56 }
 0x128   :  { %v1885_v16 = vpop.eup %1884  ;;  %1316 = vst.msk [vmem:[%s2677_s3 + $0x2c] sm:$0xf] %vm1304_vm1, %v1581_v32  ;;  %v1579_v5 = vpack.c.bf16 %v1883_v59, %v1883_v59  ;;  %1904 = vpow2.f32 %v1492_v25 }
 0x129   :  { %v1887_v22 = vpop.eup %1886  ;;  %1348 = vst.msk [vmem:[%s2677_s3 + $0xac] sm:$0xf] %vm1304_vm1, %v1613_v10  ;;  %v1611_v23 = vpack.c.bf16 %v1885_v16, %v1885_v16  ;;  %1906 = vpow2.f32 %v1458_v0  ;;  %v1464_v10 = vmul.f32 -1.442695, %v2327_v3  ;;  %v1494_v3 = vmul.f32 -1.442695, %v2346_v14 }
 0x12a   :  { %v1889_v24 = vpop.eup %1888  ;;  %1314 = vst.msk [vmem:[%s2677_s3 + $0x24] sm:$0xf] %vm1304_vm1, %v1579_v5  ;;  %v1584_v27 = vpack.c.bf16 %v1887_v22, %v1887_v22  ;;  %1908 = vpow2.f32 %v1490_v4  ;;  %v1496_v5 = vmul.f32 -1.442695, %v2334_v7  ;;  %v1497_v14 = vmul.f32 -1.442695, %v2358_v33 }
 0x12b   :  { %v1891_v29 = vpop.eup %1890  ;;  %1346 = vst.msk [vmem:[%s2677_s3 + $0xa4] sm:$0xf] %vm1304_vm1, %v1611_v23  ;;  %v1616_v30 = vpack.c.bf16 %v1889_v24, %v1889_v24  ;;  %1910 = vpow2.f32 %v1461_v11  ;;  %v1462_v23 = vmul.f32 -1.442695, %v2337_v8  ;;  %v1465_v8 = vmul.f32 -1.442695, %v2355_v28 }
 0x12c   :  { %v1893_v35 = vpop.eup %1892  ;;  %1319 = vst.msk [vmem:[%s2677_s3 + $0x38] sm:$0xf] %vm1304_vm1, %v1584_v27  ;;  %v868_v51 = vadd.f32 1.0, %v1891_v29  ;;  %1912 = vpow2.f32 %v1493_v19  ;;  %v1463_v28 = vmul.f32 -1.442695, %v2361_v34 }
 0x12d   :  { %v1895_v55 = vpop.eup %1894  ;;  %1351 = vst.msk [vmem:[%s2677_s3 + $0xb8] sm:$0xf] %vm1304_vm1, %v1616_v30  ;;  %v900_v37 = vadd.f32 1.0, %v1893_v35  ;;  %1914 = vpow2.f32 %v1459_v36  ;;  %v1495_v33 = vmul.f32 -1.442695, %v2366_v60 }
 0x12e   :  { %v1897_v38 = vpop.eup %1896  ;;  %1916 = vrcp.f32 %v868_v51  ;;  %v871_v25 = vadd.f32 1.0, %v1895_v55  ;;  %v1468_v34 = vmul.f32 -1.442695, %v2375_v46  ;;  %v1500_v60 = vmul.f32 -1.442695, %v2378_v52 }
 0x12f   :  { %v1899_v41 = vpop.eup %1898  ;;  %1918 = vrcp.f32 %v900_v37  ;;  %v903_v42 = vadd.f32 1.0, %v1897_v38  ;;  %v1466_v46 = vmul.f32 -1.442695, %v2381_v53  ;;  %v1498_v52 = vmul.f32 -1.442695, %v2386_v62 }
 0x130   :  { %v1901_v43 = vpop.eup %1900  ;;  %1920 = vrcp.f32 %v871_v25  ;;  %v869_v26 = vadd.f32 1.0, %v1899_v41 }
 0x131   :  { %v1903_v61 = vpop.eup %1902  ;;  %1922 = vrcp.f32 %v903_v42  ;;  %v901_v47 = vadd.f32 1.0, %v1901_v43 }
 0x132   :  { %v1905_v48 = vpop.eup %1904  ;;  %1924 = vrcp.f32 %v869_v26  ;;  %v874_v49 = vadd.f32 1.0, %v1903_v61 }
 0x133   :  { %v1907_v21 = vpop.eup %1906  ;;  %1926 = vrcp.f32 %v901_v47  ;;  %v906_v50 = vadd.f32 1.0, %v1905_v48 }
 0x134   :  { %v1909_v57 = vpop.eup %1908  ;;  %1928 = vrcp.f32 %v874_v49  ;;  %v872_v58 = vadd.f32 1.0, %v1907_v21 }
 0x135   :  { %v1911_v63 = vpop.eup %1910  ;;  %1930 = vrcp.f32 %v906_v50  ;;  %v904_v0 = vadd.f32 1.0, %v1909_v57 }
 0x136   :  { %v1913_v40 = vpop.eup %1912  ;;  %1932 = vrcp.f32 %v872_v58  ;;  %v875_v1 = vadd.f32 1.0, %v1911_v63 }
 0x137   :  { %v1915_v31 = vpop.eup %1914  ;;  %1934 = vrcp.f32 %v904_v0  ;;  %v907_v4 = vadd.f32 1.0, %v1913_v40 }
 0x138   :  { %v1917_v32 = vpop.eup %1916  ;;  %1936 = vrcp.f32 %v875_v1  ;;  %v873_v59 = vadd.f32 1.0, %v1915_v31 }
 0x139   :  { %v1919_v11 = vpop.eup %1918  ;;  %v1582_v16 = vpack.c.bf16 %v1917_v32, %v1917_v32  ;;  %1938 = vrcp.f32 %v907_v4 }
 0x13a   :  { %v1921_v19 = vpop.eup %1920  ;;  %v1614_v22 = vpack.c.bf16 %v1919_v11, %v1919_v11  ;;  %1940 = vrcp.f32 %v873_v59 }
 0x13b   :  { %v1923_v36 = vpop.eup %1922  ;;  %1317 = vst.msk [vmem:[%s2677_s3 + $0x30] sm:$0xf] %vm1304_vm1, %v1582_v16  ;;  %v1585_v56 = vpack.c.bf16 %v1921_v19, %v1921_v19  ;;  %1942 = vpow2.f32 %v1491_v54 }
 0x13c   :  { %v1925_v24 = vpop.eup %1924  ;;  %1349 = vst.msk [vmem:[%s2677_s3 + $0xb0] sm:$0xf] %vm1304_vm1, %v1614_v22  ;;  %v1617_v7 = vpack.c.bf16 %v1923_v36, %v1923_v36  ;;  %1944 = vpow2.f32 %v1464_v10 }
 0x13d   :  { %v1927_v27 = vpop.eup %1926  ;;  %1320 = vst.msk [vmem:[%s2677_s3 + $0x3c] sm:$0xf] %vm1304_vm1, %v1585_v56  ;;  %v1583_v29 = vpack.c.bf16 %v1925_v24, %v1925_v24  ;;  %1946 = vpow2.f32 %v1496_v5  ;;  %v1469_v24 = vmul.f32 -1.442695, %v2395_v12 }
 0x13e   :  { %v1929_v30 = vpop.eup %1928  ;;  %1352 = vst.msk [vmem:[%s2677_s3 + $0xbc] sm:$0xf] %vm1304_vm1, %v1617_v7  ;;  %v1615_v35 = vpack.c.bf16 %v1927_v27, %v1927_v27  ;;  %1948 = vpow2.f32 %v1462_v23  ;;  %v1501_v27 = vmul.f32 -1.442695, %v2398_v17  ;;  %v1472_v17 = vmul.f32 -1.442695, %v2416_v39 }
 0x13f   :  { %v1931_v51 = vpop.eup %1930  ;;  %1318 = vst.msk [vmem:[%s2677_s3 + $0x34] sm:$0xf] %vm1304_vm1, %v1583_v29  ;;  %v1588_v55 = vpack.c.bf16 %v1929_v30, %v1929_v30  ;;  %1950 = vpow2.f32 %v1494_v3  ;;  %v1467_v30 = vmul.f32 -1.442695, %v2401_v18  ;;  %v1470_v39 = vmul.f32 -1.442695, %v2427_v13 }
 0x140   :  { %v1933_v37 = vpop.eup %1932  ;;  %1350 = vst.msk [vmem:[%s2677_s3 + $0xb4] sm:$0xf] %vm1304_vm1, %v1615_v35  ;;  %v1620_v38 = vpack.c.bf16 %v1931_v51, %v1931_v51  ;;  %1952 = vpow2.f32 %v1465_v8  ;;  %v1499_v51 = vmul.f32 -1.442695, %v2406_v20  ;;  %v1504_v20 = vmul.f32 -1.442695, %v2424_v44 }
 0x141   :  { %v1935_v25 = vpop.eup %1934  ;;  %1323 = vst.msk [vmem:[%s2677_s3 + $0x48] sm:$0xf] %vm1304_vm1, %v1588_v55  ;;  %v1586_v41 = vpack.c.bf16 %v1933_v37, %v1933_v37  ;;  %1954 = vpow2.f32 %v1497_v14  ;;  %v1502_v44 = vmul.f32 -1.442695, %v2437_v2  ;;  %v1473_v13 = vmul.f32 -1.442695, %v2452_v6 }
 0x142   :  { %v1937_v42 = vpop.eup %1936  ;;  %1355 = vst.msk [vmem:[%s2677_s3 + $0xc8] sm:$0xf] %vm1304_vm1, %v1620_v38  ;;  %v1618_v43 = vpack.c.bf16 %v1935_v25, %v1935_v25  ;;  %1956 = vpow2.f32 %v1463_v28  ;;  %v1505_v2 = vmul.f32 -1.442695, %v2460_v45  ;;  %v1471_v6 = vmul.f32 -1.442695, %v2463_v9 }
 0x143   :  { %v1939_v26 = vpop.eup %1938  ;;  %1321 = vst.msk [vmem:[%s2677_s3 + $0x40] sm:$0xf] %vm1304_vm1, %v1586_v41  ;;  %v1589_v61 = vpack.c.bf16 %v1937_v42, %v1937_v42  ;;  %1958 = vpow2.f32 %v1495_v33  ;;  %v1503_v45 = vmul.f32 -1.442695, %v2470_v15 }
 0x144   :  { %v1941_v47 = vpop.eup %1940  ;;  %1353 = vst.msk [vmem:[%s2677_s3 + $0xc0] sm:$0xf] %vm1304_vm1, %v1618_v43  ;;  %v1621_v48 = vpack.c.bf16 %v1939_v26, %v1939_v26  ;;  %1960 = vpow2.f32 %v1468_v34 }
 0x145   :  { %v1943_v49 = vpop.eup %1942  ;;  %1324 = vst.msk [vmem:[%s2677_s3 + $0x4c] sm:$0xf] %vm1304_vm1, %v1589_v61  ;;  %v1587_v53 = vpack.c.bf16 %v1941_v47, %v1941_v47  ;;  %1962 = vpow2.f32 %v1500_v60 }
 0x146   :  { %v1945_v21 = vpop.eup %1944  ;;  %1356 = vst.msk [vmem:[%s2677_s3 + $0xcc] sm:$0xf] %vm1304_vm1, %v1621_v48  ;;  %v905_v62 = vadd.f32 1.0, %v1943_v49  ;;  %1964 = vpow2.f32 %v1466_v46 }
 0x147   :  { %v1947_v50 = vpop.eup %1946  ;;  %1322 = vst.msk [vmem:[%s2677_s3 + $0x44] sm:$0xf] %vm1304_vm1, %v1587_v53  ;;  %v878_v57 = vadd.f32 1.0, %v1945_v21  ;;  %1966 = vpow2.f32 %v1498_v52 }
 0x148   :  { %v1949_v58 = vpop.eup %1948  ;;  %1968 = vrcp.f32 %v905_v62  ;;  %v910_v63 = vadd.f32 1.0, %v1947_v50 }
 0x149   :  { %v1951_v0 = vpop.eup %1950  ;;  %1970 = vrcp.f32 %v878_v57  ;;  %v876_v40 = vadd.f32 1.0, %v1949_v58 }
 0x14a   :  { %v1953_v1 = vpop.eup %1952  ;;  %1972 = vrcp.f32 %v910_v63  ;;  %v908_v31 = vadd.f32 1.0, %v1951_v0 }
 0x14b   :  { %v1955_v4 = vpop.eup %1954  ;;  %1974 = vrcp.f32 %v876_v40  ;;  %v879_v54 = vadd.f32 1.0, %v1953_v1 }
 0x14c   :  { %v1957_v32 = vpop.eup %1956  ;;  %1976 = vrcp.f32 %v908_v31  ;;  %v911_v59 = vadd.f32 1.0, %v1955_v4 }
 0x14d   :  { %v1959_v10 = vpop.eup %1958  ;;  %1978 = vrcp.f32 %v879_v54  ;;  %v877_v11 = vadd.f32 1.0, %v1957_v32 }
 0x14e   :  { %v1961_v16 = vpop.eup %1960  ;;  %1980 = vrcp.f32 %v911_v59  ;;  %v909_v5 = vadd.f32 1.0, %v1959_v10 }
 0x14f   :  { %v1963_v19 = vpop.eup %1962  ;;  %1982 = vrcp.f32 %v877_v11  ;;  %v882_v22 = vadd.f32 1.0, %v1961_v16 }
 0x150   :  { %v1965_v23 = vpop.eup %1964  ;;  %1984 = vrcp.f32 %v909_v5  ;;  %v914_v36 = vadd.f32 1.0, %v1963_v19 }
 0x151   :  { %v1967_v56 = vpop.eup %1966  ;;  %1986 = vrcp.f32 %v882_v22  ;;  %v880_v3 = vadd.f32 1.0, %v1965_v23 }
 0x152   :  { %v1969_v7 = vpop.eup %1968  ;;  %1988 = vrcp.f32 %v914_v36  ;;  %v912_v8 = vadd.f32 1.0, %v1967_v56 }
 0x153   :  { %v1971_v29 = vpop.eup %1970  ;;  %v1619_v14 = vpack.c.bf16 %v1969_v7, %v1969_v7  ;;  %1990 = vrcp.f32 %v880_v3 }
 0x154   :  { %v1973_v35 = vpop.eup %1972  ;;  %v1592_v28 = vpack.c.bf16 %v1971_v29, %v1971_v29  ;;  %1992 = vrcp.f32 %v912_v8 }
 0x155   :  { %v1975_v55 = vpop.eup %1974  ;;  %1354 = vst.msk [vmem:[%s2677_s3 + $0xc4] sm:$0xf] %vm1304_vm1, %v1619_v14  ;;  %v1624_v12 = vpack.c.bf16 %v1973_v35, %v1973_v35  ;;  %1994 = vpow2.f32 %v1469_v24 }
 0x156   :  { %v1977_v33 = vpop.eup %1976  ;;  %1327 = vst.msk [vmem:[%s2677_s3 + $0x58] sm:$0xf] %vm1304_vm1, %v1592_v28  ;;  %v1590_v18 = vpack.c.bf16 %v1975_v55, %v1975_v55  ;;  %1996 = vpow2.f32 %v1501_v27 }
 0x157   :  { %v1979_v37 = vpop.eup %1978  ;;  %1359 = vst.msk [vmem:[%s2677_s3 + $0xd8] sm:$0xf] %vm1304_vm1, %v1624_v12  ;;  %v1622_v38 = vpack.c.bf16 %v1977_v33, %v1977_v33  ;;  %1998 = vpow2.f32 %v1467_v30 }
 0x158   :  { %v1981_v34 = vpop.eup %1980  ;;  %1325 = vst.msk [vmem:[%s2677_s3 + $0x50] sm:$0xf] %vm1304_vm1, %v1590_v18  ;;  %v1593_v25 = vpack.c.bf16 %v1979_v37, %v1979_v37  ;;  %2000 = vpow2.f32 %v1499_v51 }
 0x159   :  { %v1983_v41 = vpop.eup %1982  ;;  %1357 = vst.msk [vmem:[%s2677_s3 + $0xd0] sm:$0xf] %vm1304_vm1, %v1622_v38  ;;  %v1625_v60 = vpack.c.bf16 %v1981_v34, %v1981_v34  ;;  %2002 = vpow2.f32 %v1472_v17 }
 0x15a   :  { %v1985_v42 = vpop.eup %1984  ;;  %1328 = vst.msk [vmem:[%s2677_s3 + $0x5c] sm:$0xf] %vm1304_vm1, %v1593_v25  ;;  %v1591_v43 = vpack.c.bf16 %v1983_v41, %v1983_v41  ;;  %2004 = vpow2.f32 %v1504_v20 }
 0x15b   :  { %v1987_v46 = vpop.eup %1986  ;;  %1360 = vst.msk [vmem:[%s2677_s3 + $0xdc] sm:$0xf] %vm1304_vm1, %v1625_v60  ;;  %v1623_v26 = vpack.c.bf16 %v1985_v42, %v1985_v42  ;;  %2006 = vpow2.f32 %v1470_v39 }
 0x15c   :  { %v1989_v61 = vpop.eup %1988  ;;  %1326 = vst.msk [vmem:[%s2677_s3 + $0x54] sm:$0xf] %vm1304_vm1, %v1591_v43  ;;  %v1596_v52 = vpack.c.bf16 %v1987_v46, %v1987_v46  ;;  %2008 = vpow2.f32 %v1502_v44 }
 0x15d   :  { %v1991_v47 = vpop.eup %1990  ;;  %1358 = vst.msk [vmem:[%s2677_s3 + $0xd4] sm:$0xf] %vm1304_vm1, %v1623_v26  ;;  %v1628_v48 = vpack.c.bf16 %v1989_v61, %v1989_v61  ;;  %2010 = vpow2.f32 %v1473_v13 }
 0x15e   :  { %v1993_v49 = vpop.eup %1992  ;;  %1331 = vst.msk [vmem:[%s2677_s3 + $0x68] sm:$0xf] %vm1304_vm1, %v1596_v52  ;;  %v1594_v9 = vpack.c.bf16 %v1991_v47, %v1991_v47  ;;  %2012 = vpow2.f32 %v1505_v2 }
 0x15f   :  { %v1995_v53 = vpop.eup %1994  ;;  %1363 = vst.msk [vmem:[%s2677_s3 + $0xe8] sm:$0xf] %vm1304_vm1, %v1628_v48  ;;  %v1626_v15 = vpack.c.bf16 %v1993_v49, %v1993_v49  ;;  %2014 = vpow2.f32 %v1471_v6 }
 0x160   :  { %v1997_v21 = vpop.eup %1996  ;;  %1329 = vst.msk [vmem:[%s2677_s3 + $0x60] sm:$0xf] %vm1304_vm1, %v1594_v9  ;;  %v883_v62 = vadd.f32 1.0, %v1995_v53  ;;  %2016 = vpow2.f32 %v1503_v45 }
 0x161   :  { %v1999_v50 = vpop.eup %1998  ;;  %1361 = vst.msk [vmem:[%s2677_s3 + $0xe0] sm:$0xf] %vm1304_vm1, %v1626_v15  ;;  %v915_v57 = vadd.f32 1.0, %v1997_v21 }
 0x162   :  { %v2001_v58 = vpop.eup %2000  ;;  %2018 = vrcp.f32 %v883_v62  ;;  %v881_v63 = vadd.f32 1.0, %v1999_v50 }
 0x163   :  { %v2003_v0 = vpop.eup %2002  ;;  %2020 = vrcp.f32 %v915_v57  ;;  %v913_v40 = vadd.f32 1.0, %v2001_v58 }
 0x164   :  { %v2005_v1 = vpop.eup %2004  ;;  %2022 = vrcp.f32 %v881_v63  ;;  %v886_v31 = vadd.f32 1.0, %v2003_v0 }
 0x165   :  { %v2007_v4 = vpop.eup %2006  ;;  %2024 = vrcp.f32 %v913_v40  ;;  %v918_v54 = vadd.f32 1.0, %v2005_v1 }
 0x166   :  { %v2009_v32 = vpop.eup %2008  ;;  %2026 = vrcp.f32 %v886_v31  ;;  %v884_v59 = vadd.f32 1.0, %v2007_v4 }
 0x167   :  { %v2011_v10 = vpop.eup %2010  ;;  %2028 = vrcp.f32 %v918_v54  ;;  %v916_v11 = vadd.f32 1.0, %v2009_v32 }
 0x168   :  { %v2013_v16 = vpop.eup %2012  ;;  %2030 = vrcp.f32 %v884_v59  ;;  %v887_v5 = vadd.f32 1.0, %v2011_v10 }
 0x169   :  { %v2015_v19 = vpop.eup %2014  ;;  %2032 = vrcp.f32 %v916_v11  ;;  %v919_v22 = vadd.f32 1.0, %v2013_v16 }
 0x16a   :  { %v2017_v23 = vpop.eup %2016  ;;  %2034 = vrcp.f32 %v887_v5  ;;  %v885_v36 = vadd.f32 1.0, %v2015_v19 }
 0x16b   :  { %2036 = vrcp.f32 %v919_v22  ;;  %v917_v56 = vadd.f32 1.0, %v2017_v23 }
 0x16c   :  { %v2019_v3 = vpop.eup %2018  ;;  %2038 = vrcp.f32 %v885_v36 }
 0x16d   :  { %v2021_v24 = vpop.eup %2020  ;;  %v1597_v7 = vpack.c.bf16 %v2019_v3, %v2019_v3  ;;  %2040 = vrcp.f32 %v917_v56 }
 0x16e   :  { %v2023_v8 = vpop.eup %2022  ;;  %v1629_v27 = vpack.c.bf16 %v2021_v24, %v2021_v24 }
 0x16f   :  { %v2025_v29 = vpop.eup %2024  ;;  %1332 = vst.msk [vmem:[%s2677_s3 + $0x6c] sm:$0xf] %vm1304_vm1, %v1597_v7  ;;  %v1595_v14 = vpack.c.bf16 %v2023_v8, %v2023_v8 }
 0x170   :  { %v2027_v30 = vpop.eup %2026  ;;  %1364 = vst.msk [vmem:[%s2677_s3 + $0xec] sm:$0xf] %vm1304_vm1, %v1629_v27  ;;  %v1627_v35 = vpack.c.bf16 %v2025_v29, %v2025_v29 }
 0x171   :  { %v2029_v28 = vpop.eup %2028  ;;  %1330 = vst.msk [vmem:[%s2677_s3 + $0x64] sm:$0xf] %vm1304_vm1, %v1595_v14  ;;  %v1600_v51 = vpack.c.bf16 %v2027_v30, %v2027_v30 }
 0x172   :  { %v2031_v55 = vpop.eup %2030  ;;  %1362 = vst.msk [vmem:[%s2677_s3 + $0xe4] sm:$0xf] %vm1304_vm1, %v1627_v35  ;;  %v1632_v12 = vpack.c.bf16 %v2029_v28, %v2029_v28 }
 0x173   :  { %v2033_v17 = vpop.eup %2032  ;;  %1335 = vst.msk [vmem:[%s2677_s3 + $0x78] sm:$0xf] %vm1304_vm1, %v1600_v51  ;;  %v1598_v33 = vpack.c.bf16 %v2031_v55, %v2031_v55 }
 0x174   :  { %v2035_v18 = vpop.eup %2034  ;;  %1367 = vst.msk [vmem:[%s2677_s3 + $0xf8] sm:$0xf] %vm1304_vm1, %v1632_v12  ;;  %v1630_v20 = vpack.c.bf16 %v2033_v17, %v2033_v17 }
 0x175   :  { %v2037_v37 = vpop.eup %2036  ;;  %1333 = vst.msk [vmem:[%s2677_s3 + $0x70] sm:$0xf] %vm1304_vm1, %v1598_v33  ;;  %v1601_v38 = vpack.c.bf16 %v2035_v18, %v2035_v18 }
 0x176   :  { %v2039_v39 = vpop.eup %2038  ;;  %1365 = vst.msk [vmem:[%s2677_s3 + $0xf0] sm:$0xf] %vm1304_vm1, %v1630_v20  ;;  %v1633_v34 = vpack.c.bf16 %v2037_v37, %v2037_v37 }
 0x177   :  { %v2041_v25 = vpop.eup %2040  ;;  %1336 = vst.msk [vmem:[%s2677_s3 + $0x7c] sm:$0xf] %vm1304_vm1, %v1601_v38  ;;  %v1599_v44 = vpack.c.bf16 %v2039_v39, %v2039_v39 }
 0x178   :  { %1368 = vst.msk [vmem:[%s2677_s3 + $0xfc] sm:$0xf] %vm1304_vm1, %v1633_v34  ;;  %v1631_v41 = vpack.c.bf16 %v2041_v25, %v2041_v25 }
 0x179   :  { %1334 = vst.msk [vmem:[%s2677_s3 + $0x74] sm:$0xf] %vm1304_vm1, %v1599_v44 }
 0x17a   :  { %1366 = vst.msk [vmem:[%s2677_s3 + $0xf4] sm:$0xf] %vm1304_vm1, %v1631_v41 }

</bundles_post_ra>
